<compile_context>
chip_gen: v7x
topology: tpu7x:2x2x1
jax: 0.10.0
libtpu: 0.0.40
codegen_flags: <defaults>
</compile_context>

<pallas_src>
import math

import jax
import jax.numpy as jnp
from jax import lax
from jax.experimental import pallas as pl
from jax.experimental.pallas import tpu as pltpu

# ----------------------------- configuration ------------------------------ #
CFG = dict(
    num_mel=16,          # num_mel_coeffs
    dict_size=10,        # phoneme dictionary size (embedding has dict_size+1 rows)
    pad_base=8,
    dim=32,              # embedding_dim
    heads=2,
    enc_convs=2,         # encoder prenet conv layers
    dec_prenet_hidden=32,
    enc_depth=1,
    dec_depth=1,
    ff_mult=2,           # feed-forward hidden = ff_mult * dim
    postnet_convs=3,
    kernel_size=5,
)
NEG_INF = -1e9

_CompilerParams = getattr(pltpu, "CompilerParams", None) or getattr(pltpu, "TPUCompilerParams")
_HAS_RECIP = hasattr(pl, "reciprocal")


def _params():
    return _CompilerParams(dimension_semantics=("parallel",),
                           vmem_limit_bytes=32 * 1024 * 1024)


def _recip(x):
    if _HAS_RECIP:
        return pl.reciprocal(x, approx=True)   # EUP slot, effectively free
    return 1.0 / x


# ----------------------------- in-kernel helpers --------------------------- #
def _gelu(y):
    # tanh-approximate GELU (EUP-friendly)
    return 0.5 * y * (1.0 + jnp.tanh(0.7978845608028654 * (y + 0.044715 * y * y * y)))


def _apply_act(y, activation):
    if activation == "relu":
        return jnp.maximum(y, 0.0)
    if activation == "tanh":
        return jnp.tanh(y)
    if activation == "gelu":
        return _gelu(y)
    return y


def _layernorm(x, g, b, eps=1e-5):
    mu = jnp.mean(x, axis=-1, keepdims=True)
    var = jnp.mean((x - mu) ** 2, axis=-1, keepdims=True)
    return (x - mu) * lax.rsqrt(var + eps) * g + b


def _mha(q, k, v, bias, wo_ref, heads, dh, scale, collect_probs):
    """Masked MHA.  q:(Tq,H*dh) k,v:(Tk,H*dh), bias broadcastable to (Tq,Tk).

    The output projection is accumulated per head (no lane concatenate of head
    outputs).  When collect_probs, the per-head probability matrices are packed
    into a single (Tq, H*Tk) slab so the caller does ONE lane-dense-ish store.
    """
    out = None
    probs = []
    for h in range(heads):
        sl = slice(h * dh, (h + 1) * dh)
        s = lax.dot_general(q[:, sl], k[:, sl], (((1,), (1,)), ((), ())),
                            preferred_element_type=jnp.float32) * scale + bias
        mx = jnp.max(s, axis=-1, keepdims=True)
        e = jnp.exp(s - mx)
        denom = jnp.sum(e, axis=-1, keepdims=True)
        if collect_probs:
            p = e / denom                    # exact — these probs are returned
        else:
            p = e * _recip(denom)            # approx reciprocal (EUP)
        oh = jnp.dot(p, v[:, sl], preferred_element_type=jnp.float32)
        # concat(o_h) @ Wo == sum_h o_h @ Wo[h*dh:(h+1)*dh, :]
        contrib = jnp.dot(oh, wo_ref[sl, :], preferred_element_type=jnp.float32)
        out = contrib if out is None else out + contrib
        if collect_probs:
            probs.append(p)
    packed = jnp.concatenate(probs, axis=-1) if collect_probs else None
    return out, packed


def _conv_bn_act(x, w_ref, scale_ref, shift_ref, k, act):
    """'Same' conv1d + folded BatchNorm (eval) + activation.

    Reformulated as y = sum_j shift_j(x) @ W[j] with value-space shifted taps
    (zero padding), avoiding the (T, K*Cin) im2col buffer and any
    sublane-unaligned scratch stores.  x: (T, Cin), w_ref: (K, Cin, Cout).
    """
    t, cin = x.shape
    pad = k // 2
    zpad = jnp.zeros((pad, cin), jnp.float32)
    xp = jnp.concatenate([zpad, x, zpad], axis=0)          # (T + K - 1, Cin)
    y = None
    for j in range(k):
        xs = xp[j:j + t, :]                                 # shifted tap (XLU shift)
        yj = jnp.dot(xs, w_ref[j], preferred_element_type=jnp.float32)
        y = yj if y is None else y + yj
    y = y * scale_ref[...] + shift_ref[...]                 # folded BatchNorm (eval)
    return _apply_act(y, act)


# --------------------------- fused encoder kernel --------------------------- #
def _make_encoder_kernel(n_conv, n_layers, heads, dh, ksz):
    d = heads * dh
    scale = 1.0 / math.sqrt(dh)

    def kernel(*refs):
        it = iter(refs)
        tok_ref = next(it)                 # (Tp, 1) int32
        kbias_ref = next(it)               # (1, Tp) additive key-padding bias row
        pe_ref = next(it)                  # (Tp, d) pre-scaled positional encoding
        emb_ref = next(it)                 # (V, d) embedding table (row 0 zeroed)
        conv_refs = [(next(it), next(it), next(it)) for _ in range(n_conv)]
        projw = next(it); projb = next(it)
        layer_refs = [[next(it) for _ in range(12)] for _ in range(n_layers)]
        o_ref = next(it)

        # --- embedding lookup as a one-hot matmul (no XLA gather between calls) ---
        tok = tok_ref[...]                                            # (Tp, 1)
        tq = tok.shape[0]
        vocab = emb_ref.shape[0]
        vid = lax.broadcasted_iota(jnp.int32, (tq, vocab), 1)
        onehot = (vid == tok).astype(jnp.float32)                     # (Tp, V)
        x = jnp.dot(onehot, emb_ref[...], preferred_element_type=jnp.float32)

        # --- encoder prenet: conv stack + linear projection + scaled PE ---
        for (w_ref, s_ref, sh_ref) in conv_refs:
            x = _conv_bn_act(x, w_ref, s_ref, sh_ref, ksz, "relu")
        x = jnp.dot(x, projw[...], preferred_element_type=jnp.float32) + projb[...]
        x = x + pe_ref[...]

        # --- key-padding bias built from a compact (1, Tp) row (broadcast over q) ---
        bias = kbias_ref[...]

        # --- transformer layers (unrolled; residuals stay in VMEM) ---
        for lr in layer_refs:
            (ln1g, ln1b, wqkv, bqkv, wo, bo, ln3g, ln3b, w1, b1, w2, b2) = lr
            xn = _layernorm(x, ln1g[...], ln1b[...])
            qkv = jnp.dot(xn, wqkv[...], preferred_element_type=jnp.float32) + bqkv[...]
            q, k, v = qkv[:, :d], qkv[:, d:2 * d], qkv[:, 2 * d:3 * d]
            att, _ = _mha(q, k, v, bias, wo, heads, dh, scale, False)
            x = x + att + bo[...]
            xn = _layernorm(x, ln3g[...], ln3b[...])
            h1 = _gelu(jnp.dot(xn, w1[...], preferred_element_type=jnp.float32) + b1[...])
            x = x + jnp.dot(h1, w2[...], preferred_element_type=jnp.float32) + b2[...]

        o_ref[...] = x.astype(o_ref.dtype)

    return kernel


def pallas_encoder(p, tokens, kbias, pe):
    bsz, tp, _ = tokens.shape
    d = CFG["dim"]
    heads = CFG["heads"]
    dh = d // heads
    ksz = CFG["kernel_size"]
    n_conv = len(p["prenet_convs"])
    n_layers = len(p["layers"])

    args, in_specs = [], []

    def add_batched(a, blk):
        args.append(a)
        in_specs.append(pl.BlockSpec(blk, lambda b, _n=len(blk) - 1: (b,) + (0,) * _n))

    def add_const(a):
        args.append(a)
        in_specs.append(pl.BlockSpec(a.shape, lambda b, _n=a.ndim: (0,) * _n))

    add_batched(tokens, (None, tp, 1))
    add_batched(kbias, (None, 1, tp))
    add_const(pe)
    add_const(p["embedding"])
    for c in p["prenet_convs"]:
        add_const(c["w"]); add_const(c["scale"]); add_const(c["shift"])
    add_const(p["prenet_proj"]["w"]); add_const(p["prenet_proj"]["b"])
    for lyr in p["layers"]:
        for nm in ("ln1_g", "ln1_b", "wqkv", "bqkv", "wo", "bo",
                   "ln3_g", "ln3_b", "ff1_w", "ff1_b", "ff2_w", "ff2_b"):
            add_const(lyr[nm])

    kern = _make_encoder_kernel(n_conv, n_layers, heads, dh, ksz)
    return pl.pallas_call(
        kern,
        out_shape=jax.ShapeDtypeStruct((bsz, tp, d), jnp.float32),
        grid=(bsz,),
        in_specs=in_specs,
        out_specs=pl.BlockSpec((None, tp, d), lambda b: (b, 0, 0)),
        compiler_params=_params(),
    )(*args)


# --------------------------- fused decoder kernel --------------------------- #
def _make_decoder_kernel(n_layers, heads, dh, ksz, n_post, m):
    d = heads * dh
    scale = 1.0 / math.sqrt(dh)

    def kernel(*refs):
        it = iter(refs)
        spec_ref = next(it)               # (Ts, m)
        keys_ref = next(it)               # (Tk, d)
        sbias_ref = next(it)              # (1, Ts) key-padding bias for self-attn
        cbias_ref = next(it)              # (1, Tk) key-padding bias for cross-attn
        pe_ref = next(it)                 # (Ts, d)
        fc1w = next(it); fc1b = next(it); fc2w = next(it); fc2b = next(it)
        layer_refs = [[next(it) for _ in range(20)] for _ in range(n_layers)]
        msw = next(it); msb = next(it)    # fused mel+stop projection
        post_refs = [(next(it), next(it), next(it)) for _ in range(n_post)]
        o_ref = next(it)                  # (Ts, 2*m+1) packed mel|stop|mel_postnet
        p_ref = next(it)                  # (n_layers, Ts, heads*Tk) packed probs

        x_in = spec_ref[...].astype(jnp.float32)
        keys = keys_ref[...].astype(jnp.float32)
        ts = x_in.shape[0]

        # --- decoder prenet (two ReLU linears; dropout = eval no-op) + scaled PE ---
        h = jnp.maximum(jnp.dot(x_in, fc1w[...], preferred_element_type=jnp.float32)
                        + fc1b[...], 0.0)
        h = jnp.maximum(jnp.dot(h, fc2w[...], preferred_element_type=jnp.float32)
                        + fc2b[...], 0.0)
        x = h + pe_ref[...]

        # --- biases built in-kernel: causal via iota + compact key-padding rows ---
        qi = lax.broadcasted_iota(jnp.int32, (ts, ts), 0)
        ki = lax.broadcasted_iota(jnp.int32, (ts, ts), 1)
        self_bias = jnp.where(ki <= qi, 0.0, NEG_INF) + sbias_ref[...]
        cross_bias = cbias_ref[...]

        for li, lr in enumerate(layer_refs):
            (ln1g, ln1b, wqkv, bqkv, wo, bo,
             ln2g, ln2b, wq_c, bq_c, wkv_c, bkv_c, wo_c, bo_c,
             ln3g, ln3b, w1, b1, w2, b2) = lr

            # masked causal self-attention (fused QKV; probs never materialized)
            xn = _layernorm(x, ln1g[...], ln1b[...])
            qkv = jnp.dot(xn, wqkv[...], preferred_element_type=jnp.float32) + bqkv[...]
            q, k, v = qkv[:, :d], qkv[:, d:2 * d], qkv[:, 2 * d:3 * d]
            att, _ = _mha(q, k, v, self_bias, wo, heads, dh, scale, False)
            x = x + att + bo[...]

            # cross-attention over encoder keys; probs packed into one (Ts, H*Tk) slab
            xn = _layernorm(x, ln2g[...], ln2b[...])
            qc = jnp.dot(xn, wq_c[...], preferred_element_type=jnp.float32) + bq_c[...]
            kvc = jnp.dot(keys, wkv_c[...], preferred_element_type=jnp.float32) + bkv_c[...]
            kc, vc = kvc[:, :d], kvc[:, d:2 * d]
            catt, packed_p = _mha(qc, kc, vc, cross_bias, wo_c, heads, dh, scale, True)
            x = x + catt + bo_c[...]
            p_ref[li, :, :] = packed_p.astype(p_ref.dtype)

            # feed-forward
            xn = _layernorm(x, ln3g[...], ln3b[...])
            h1 = _gelu(jnp.dot(xn, w1[...], preferred_element_type=jnp.float32) + b1[...])
            x = x + jnp.dot(h1, w2[...], preferred_element_type=jnp.float32) + b2[...]

        # --- fused mel + stop projection (stays in VMEM; no extra launch) ---
        melstop = jnp.dot(x, msw[...], preferred_element_type=jnp.float32) + msb[...]
        mel = melstop[:, :m]

        # --- postnet conv stack + residual add, fused in the same kernel ---
        cur = mel
        for si, (w_ref, s_ref, sh_ref) in enumerate(post_refs):
            act = "tanh" if si < n_post - 1 else None
            cur = _conv_bn_act(cur, w_ref, s_ref, sh_ref, ksz, act)
        mel_post = mel + cur

        # single packed store: [mel (m) | stop (1) | mel_postnet (m)]
        o_ref[...] = jnp.concatenate([melstop, mel_post], axis=-1).astype(o_ref.dtype)

    return kernel


def pallas_decoder(p, postnet_p, spec, keys, sbias, cbias, pe):
    bsz, ts, m = spec.shape
    tk = keys.shape[1]
    d = CFG["dim"]
    heads = CFG["heads"]
    dh = d // heads
    ksz = CFG["kernel_size"]
    n_layers = len(p["layers"])
    n_post = len(postnet_p["convs"])

    args, in_specs = [], []

    def add_batched(a, blk):
        args.append(a)
        in_specs.append(pl.BlockSpec(blk, lambda b, _n=len(blk) - 1: (b,) + (0,) * _n))

    def add_const(a):
        args.append(a)
        in_specs.append(pl.BlockSpec(a.shape, lambda b, _n=a.ndim: (0,) * _n))

    add_batched(spec, (None, ts, m))
    add_batched(keys, (None, tk, d))
    add_batched(sbias, (None, 1, ts))
    add_batched(cbias, (None, 1, tk))
    add_const(pe)
    add_const(p["prenet_fc1"]["w"]); add_const(p["prenet_fc1"]["b"])
    add_const(p["prenet_fc2"]["w"]); add_const(p["prenet_fc2"]["b"])
    for lyr in p["layers"]:
        for nm in ("ln1_g", "ln1_b", "wqkv", "bqkv", "wo", "bo",
                   "ln2_g", "ln2_b", "wq_c", "bq_c", "wkv_c", "bkv_c", "wo_c", "bo_c",
                   "ln3_g", "ln3_b", "ff1_w", "ff1_b", "ff2_w", "ff2_b"):
            add_const(lyr[nm])
    add_const(p["melstop"]["w"]); add_const(p["melstop"]["b"])
    for c in postnet_p["convs"]:
        add_const(c["w"]); add_const(c["scale"]); add_const(c["shift"])

    kern = _make_decoder_kernel(n_layers, heads, dh, ksz, n_post, m)
    out_shape = (jax.ShapeDtypeStruct((bsz, ts, 2 * m + 1), jnp.float32),
                 jax.ShapeDtypeStruct((bsz, n_layers, ts, heads * tk), jnp.float32))
    out_specs = (pl.BlockSpec((None, ts, 2 * m + 1), lambda b: (b, 0, 0)),
                 pl.BlockSpec((None, n_layers, ts, heads * tk), lambda b: (b, 0, 0, 0)))
    packed, probs = pl.pallas_call(
        kern,
        out_shape=out_shape,
        grid=(bsz,),
        in_specs=in_specs,
        out_specs=out_specs,
        compiler_params=_params(),
    )(*args)
    return packed, probs


# ----------------------------- model components ---------------------------- #
def pad_to_multiple(x, pad_base):
    """x: (B, T, C) -> zero-pad T up to a multiple of pad_base."""
    new_len = ((x.shape[1] - 1) // pad_base + 1) * pad_base
    pad = new_len - x.shape[1]
    return jnp.pad(x, ((0, 0), (0, pad), (0, 0)))


def sinusoidal_pe(t, d):
    # scatter-free construction (stack + reshape interleave)
    pos = jnp.arange(t, dtype=jnp.float32)[:, None]
    div = jnp.power(10000.0, jnp.arange(0, d, 2, dtype=jnp.float32) / d)
    ang = pos / div[None, :]
    return jnp.stack([jnp.sin(ang), jnp.cos(ang)], axis=-1).reshape(t, d)


def reformer_tts_forward(params, phonemes, spectrogram):
    pad_base = CFG["pad_base"]
    m = CFG["num_mel"]
    d = CFG["dim"]
    heads = CFG["heads"]

    pad_phonemes = pad_to_multiple(phonemes[:, :, None], pad_base)[:, :, 0]      # (B, Tp)
    phoneme_mask = pad_phonemes != 0
    spec_mask = jnp.ones(spectrogram.shape[:2], jnp.float32)                     # spectrogram_mask=None branch
    spec_mask = pad_to_multiple(spec_mask[:, :, None], pad_base)[:, :, 0] != 0
    pad_spec = pad_to_multiple(spectrogram, pad_base)

    bsz, tp = pad_phonemes.shape
    ts = pad_spec.shape[1]

    # compact (B, 1, T) additive key-padding bias rows (broadcast over queries in-kernel)
    enc_kbias = jnp.where(phoneme_mask, 0.0, NEG_INF).astype(jnp.float32)[:, None, :]
    dec_sbias = jnp.where(spec_mask, 0.0, NEG_INF).astype(jnp.float32)[:, None, :]
    dec_cbias = enc_kbias                       # key_padding_mask == ~phoneme_mask

    tokens = pad_phonemes.astype(jnp.int32)[:, :, None]                          # (B, Tp, 1)
    pe_enc = sinusoidal_pe(tp, d) * params["enc"]["pos_alpha"]
    pe_dec = sinusoidal_pe(ts, d) * params["dec"]["pos_alpha"]

    keys = pallas_encoder(params["enc"], tokens, enc_kbias, pe_enc)
    packed, probs = pallas_decoder(params["dec"], params["postnet"],
                                   pad_spec, keys, dec_sbias, dec_cbias, pe_dec)

    mel = packed[..., :m]
    stop = packed[..., m:m + 1]
    mel_postnet = packed[..., m + 1:2 * m + 1]

    depth = probs.shape[1]
    attn = probs.reshape(bsz, depth, ts, heads, tp)
    attn = jnp.transpose(attn, (1, 0, 3, 2, 4))        # (depth, B, H, Ts, Tk)

    cutoff = spectrogram.shape[1]
    return mel[:, :cutoff], mel_postnet[:, :cutoff], stop[:, :cutoff], attn


# ------------------------------ parameter init ----------------------------- #
class KeyGen:
    def __init__(self, key):
        self.key = key

    def __call__(self):
        self.key, sub = jax.random.split(self.key)
        return sub


def _dense(kg, din, dout):
    return {"w": jax.random.normal(kg(), (din, dout), jnp.float32) * 0.1,
            "b": jnp.zeros((1, dout), jnp.float32)}


def _conv(kg, k, cin, cout):
    bn_scale = 1.0 / math.sqrt(1.0 + 1e-5)     # BatchNorm eval: mean=0, var=1, gamma=1, beta=0
    bias = jax.random.normal(kg(), (cout,), jnp.float32) * 0.01
    return {"w": jax.random.normal(kg(), (k, cin, cout), jnp.float32) * 0.1,  # (K, Cin, Cout)
            "scale": jnp.full((1, cout), bn_scale, jnp.float32),
            "shift": (bias * bn_scale).reshape(1, cout)}


def _layer(kg, d, ff, cross):
    def dense(din, dout):
        return (jax.random.normal(kg(), (din, dout), jnp.float32) * 0.1,
                jnp.zeros((1, dout), jnp.float32))

    p = {"ln1_g": jnp.ones((1, d), jnp.float32), "ln1_b": jnp.zeros((1, d), jnp.float32),
         "ln3_g": jnp.ones((1, d), jnp.float32), "ln3_b": jnp.zeros((1, d), jnp.float32)}
    p["wqkv"], p["bqkv"] = dense(d, 3 * d)        # fused q/k/v projection
    p["wo"], p["bo"] = dense(d, d)
    if cross:
        p["ln2_g"] = jnp.ones((1, d), jnp.float32)
        p["ln2_b"] = jnp.zeros((1, d), jnp.float32)
        p["wq_c"], p["bq_c"] = dense(d, d)
        p["wkv_c"], p["bkv_c"] = dense(d, 2 * d)  # fused k/v projection for cross-attn
        p["wo_c"], p["bo_c"] = dense(d, d)
    p["ff1_w"], p["ff1_b"] = dense(d, ff)
    p["ff2_w"], p["ff2_b"] = dense(ff, d)
    return p


def init_params(key):
    kg = KeyGen(key)
    d, m, ksz = CFG["dim"], CFG["num_mel"], CFG["kernel_size"]
    ff = CFG["ff_mult"] * d
    hdim = CFG["dec_prenet_hidden"]

    emb = jax.random.normal(kg(), (CFG["dict_size"] + 1, d), jnp.float32) * 0.1
    emb = emb.at[0].set(0.0)                                   # padding_idx=0

    enc = {
        "embedding": emb,
        "prenet_convs": [_conv(kg, ksz, d, d) for _ in range(CFG["enc_convs"])],
        "prenet_proj": _dense(kg, d, d),
        "pos_alpha": jnp.array(1.0, jnp.float32),
        "layers": [_layer(kg, d, ff, cross=False) for _ in range(CFG["enc_depth"])],
    }
    dec = {
        "prenet_fc1": _dense(kg, m, hdim),
        "prenet_fc2": _dense(kg, hdim, d),
        "pos_alpha": jnp.array(1.0, jnp.float32),
        "layers": [_layer(kg, d, ff, cross=True) for _ in range(CFG["dec_depth"])],
        "melstop": _dense(kg, d, m + 1),          # fused mel (m) + stop (1) projection
    }
    post_ch = [m] + [d] * (CFG["postnet_convs"] - 1) + [m]
    post = {"convs": [_conv(kg, ksz, post_ch[i], post_ch[i + 1])
                      for i in range(CFG["postnet_convs"])]}
    return {"enc": enc, "dec": dec, "postnet": post}


# ----------------------------------- main ----------------------------------- #
if __name__ == "__main__":
    key = jax.random.PRNGKey(0)
    kparam, kph, kspec = jax.random.split(key, 3)

    B, LP, LS = 2, 7, 13
    params = init_params(kparam)
    phonemes = jax.random.randint(kph, (B, LP), 1, CFG["dict_size"] + 1, dtype=jnp.int32)
    spectrogram = jax.random.normal(kspec, (B, LS, CFG["num_mel"]), jnp.float32)

    fwd = jax.jit(reformer_tts_forward)
    mel, mel_postnet, stop, attn = fwd(params, phonemes, spectrogram)
    jax.block_until_ready((mel, mel_postnet, stop, attn))

    assert mel.shape == (B, LS, CFG["num_mel"])
    assert mel_postnet.shape == (B, LS, CFG["num_mel"])
    assert stop.shape == (B, LS, 1)
    assert attn.shape == (CFG["dec_depth"], B, CFG["heads"], 16, 8)
    assert bool(jnp.all(jnp.isfinite(mel))) and bool(jnp.all(jnp.isfinite(mel_postnet)))
    assert bool(jnp.all(jnp.isfinite(stop))) and bool(jnp.all(jnp.isfinite(attn)))
    print("KERNEL_OK")
</pallas_src>

<mosaic_0001>
module attributes {stable_mosaic.version = 11 : i64} {
  func.func @kernel(%arg0: i32, %arg1: memref<1x8x1xi32, #tpu.memory_space<vmem>>, %arg2: memref<1x1x8xf32, #tpu.memory_space<vmem>>, %arg3: memref<8x32xf32, #tpu.memory_space<vmem>>, %arg4: memref<11x32xf32, #tpu.memory_space<vmem>>, %arg5: memref<5x32x32xf32, #tpu.memory_space<vmem>>, %arg6: memref<1x32xf32, #tpu.memory_space<vmem>>, %arg7: memref<1x32xf32, #tpu.memory_space<vmem>>, %arg8: memref<5x32x32xf32, #tpu.memory_space<vmem>>, %arg9: memref<1x32xf32, #tpu.memory_space<vmem>>, %arg10: memref<1x32xf32, #tpu.memory_space<vmem>>, %arg11: memref<32x32xf32, #tpu.memory_space<vmem>>, %arg12: memref<1x32xf32, #tpu.memory_space<vmem>>, %arg13: memref<1x32xf32, #tpu.memory_space<vmem>>, %arg14: memref<1x32xf32, #tpu.memory_space<vmem>>, %arg15: memref<32x96xf32, #tpu.memory_space<vmem>>, %arg16: memref<1x96xf32, #tpu.memory_space<vmem>>, %arg17: memref<32x32xf32, #tpu.memory_space<vmem>>, %arg18: memref<1x32xf32, #tpu.memory_space<vmem>>, %arg19: memref<1x32xf32, #tpu.memory_space<vmem>>, %arg20: memref<1x32xf32, #tpu.memory_space<vmem>>, %arg21: memref<32x64xf32, #tpu.memory_space<vmem>>, %arg22: memref<1x64xf32, #tpu.memory_space<vmem>>, %arg23: memref<64x32xf32, #tpu.memory_space<vmem>>, %arg24: memref<1x32xf32, #tpu.memory_space<vmem>>, %arg25: memref<1x8x32xf32, #tpu.memory_space<vmem>>) attributes {dimension_semantics = [#tpu.dimension_semantics<parallel>], iteration_bounds = array<i64: 2>, scalar_prefetch = 0 : i64, scratch_operands = 0 : i64, tpu.core_type = #tpu.core_type<tc>, window_params = [{transform_indices = @transform_0, window_bounds = array<i64: 1, 8, 1>}, {transform_indices = @transform_1, window_bounds = array<i64: 1, 1, 8>}, {pipeline_mode = #tpu.pipeline_mode<synchronous>, transform_indices = @transform_2, window_bounds = array<i64: 8, 32>}, {pipeline_mode = #tpu.pipeline_mode<synchronous>, transform_indices = @transform_3, window_bounds = array<i64: 11, 32>}, {pipeline_mode = #tpu.pipeline_mode<synchronous>, transform_indices = @transform_4, window_bounds = array<i64: 5, 32, 32>}, {pipeline_mode = #tpu.pipeline_mode<synchronous>, transform_indices = @transform_5, window_bounds = array<i64: 1, 32>}, {pipeline_mode = #tpu.pipeline_mode<synchronous>, transform_indices = @transform_6, window_bounds = array<i64: 1, 32>}, {pipeline_mode = #tpu.pipeline_mode<synchronous>, transform_indices = @transform_7, window_bounds = array<i64: 5, 32, 32>}, {pipeline_mode = #tpu.pipeline_mode<synchronous>, transform_indices = @transform_8, window_bounds = array<i64: 1, 32>}, {pipeline_mode = #tpu.pipeline_mode<synchronous>, transform_indices = @transform_9, window_bounds = array<i64: 1, 32>}, {pipeline_mode = #tpu.pipeline_mode<synchronous>, transform_indices = @transform_10, window_bounds = array<i64: 32, 32>}, {pipeline_mode = #tpu.pipeline_mode<synchronous>, transform_indices = @transform_11, window_bounds = array<i64: 1, 32>}, {pipeline_mode = #tpu.pipeline_mode<synchronous>, transform_indices = @transform_12, window_bounds = array<i64: 1, 32>}, {pipeline_mode = #tpu.pipeline_mode<synchronous>, transform_indices = @transform_13, window_bounds = array<i64: 1, 32>}, {pipeline_mode = #tpu.pipeline_mode<synchronous>, transform_indices = @transform_14, window_bounds = array<i64: 32, 96>}, {pipeline_mode = #tpu.pipeline_mode<synchronous>, transform_indices = @transform_15, window_bounds = array<i64: 1, 96>}, {pipeline_mode = #tpu.pipeline_mode<synchronous>, transform_indices = @transform_16, window_bounds = array<i64: 32, 32>}, {pipeline_mode = #tpu.pipeline_mode<synchronous>, transform_indices = @transform_17, window_bounds = array<i64: 1, 32>}, {pipeline_mode = #tpu.pipeline_mode<synchronous>, transform_indices = @transform_18, window_bounds = array<i64: 1, 32>}, {pipeline_mode = #tpu.pipeline_mode<synchronous>, transform_indices = @transform_19, window_bounds = array<i64: 1, 32>}, {pipeline_mode = #tpu.pipeline_mode<synchronous>, transform_indices = @transform_20, window_bounds = array<i64: 32, 64>}, {pipeline_mode = #tpu.pipeline_mode<synchronous>, transform_indices = @transform_21, window_bounds = array<i64: 1, 64>}, {pipeline_mode = #tpu.pipeline_mode<synchronous>, transform_indices = @transform_22, window_bounds = array<i64: 64, 32>}, {pipeline_mode = #tpu.pipeline_mode<synchronous>, transform_indices = @transform_23, window_bounds = array<i64: 1, 32>}, {transform_indices = @transform_24, window_bounds = array<i64: 1, 8, 32>}]} {
    %c0 = arith.constant 0 : index
    %c0_0 = arith.constant 0 : index
    %c0_1 = arith.constant 0 : index
    %0 = vector.load %arg1[%c0, %c0_0, %c0_1] : memref<1x8x1xi32, #tpu.memory_space<vmem>>, vector<1x8x1xi32>
    %1 = vector.shape_cast %0 : vector<1x8x1xi32> to vector<8x1xi32>
    %2 = tpu.iota {dimensions = array<i32: 1>} : vector<8x11xi32>
    %3 = vector.broadcast %1 : vector<8x1xi32> to vector<8x11xi32>
    %4 = arith.cmpi eq, %2, %3 : vector<8x11xi32>
    %5 = arith.extui %4 : vector<8x11xi1> to vector<8x11xi32>
    %6 = arith.sitofp %5 : vector<8x11xi32> to vector<8x11xf32>
    %c0_2 = arith.constant 0 : index
    %c0_3 = arith.constant 0 : index
    %7 = vector.load %arg4[%c0_2, %c0_3] : memref<11x32xf32, #tpu.memory_space<vmem>>, vector<11x32xf32>
    %cst = arith.constant dense<0.000000e+00> : vector<8x32xf32>
    %8 = tpu.matmul %6, %7, %cst {dimension_numbers = #tpu.dot_dimension_numbers<[1], [0], [0], [1], [0, 0, 1, 1], [], []>} : vector<8x11xf32>, vector<11x32xf32>, vector<8x32xf32> -> vector<8x32xf32>
    %cst_4 = arith.constant 0.000000e+00 : f32
    %9 = vector.broadcast %cst_4 : f32 to vector<2x32xf32>
    %10 = tpu.concatenate %9, %8, %9 in 0 : vector<2x32xf32>, vector<8x32xf32>, vector<2x32xf32> -> vector<12x32xf32>
    %11 = vector.extract_strided_slice %10 {offsets = [0, 0], sizes = [8, 32], strides = [1, 1]} : vector<12x32xf32> to vector<8x32xf32>
    %c0_5 = arith.constant 0 : index
    %c0_6 = arith.constant 0 : index
    %c0_7 = arith.constant 0 : index
    %12 = vector.load %arg5[%c0_5, %c0_6, %c0_7] : memref<5x32x32xf32, #tpu.memory_space<vmem>>, vector<1x32x32xf32>
    %13 = vector.shape_cast %12 : vector<1x32x32xf32> to vector<32x32xf32>
    %cst_8 = arith.constant dense<0.000000e+00> : vector<8x32xf32>
    %14 = tpu.matmul %11, %13, %cst_8 {dimension_numbers = #tpu.dot_dimension_numbers<[1], [0], [0], [1], [0, 0, 1, 1], [], []>} : vector<8x32xf32>, vector<32x32xf32>, vector<8x32xf32> -> vector<8x32xf32>
    %15 = vector.extract_strided_slice %10 {offsets = [1, 0], sizes = [8, 32], strides = [1, 1]} : vector<12x32xf32> to vector<8x32xf32>
    %c1 = arith.constant 1 : index
    %c0_9 = arith.constant 0 : index
    %c0_10 = arith.constant 0 : index
    %16 = vector.load %arg5[%c1, %c0_9, %c0_10] : memref<5x32x32xf32, #tpu.memory_space<vmem>>, vector<1x32x32xf32>
    %17 = vector.shape_cast %16 : vector<1x32x32xf32> to vector<32x32xf32>
    %cst_11 = arith.constant dense<0.000000e+00> : vector<8x32xf32>
    %18 = tpu.matmul %15, %17, %cst_11 {dimension_numbers = #tpu.dot_dimension_numbers<[1], [0], [0], [1], [0, 0, 1, 1], [], []>} : vector<8x32xf32>, vector<32x32xf32>, vector<8x32xf32> -> vector<8x32xf32>
    %19 = arith.addf %14, %18 : vector<8x32xf32>
    %20 = vector.extract_strided_slice %10 {offsets = [2, 0], sizes = [8, 32], strides = [1, 1]} : vector<12x32xf32> to vector<8x32xf32>
    %c2 = arith.constant 2 : index
    %c0_12 = arith.constant 0 : index
    %c0_13 = arith.constant 0 : index
    %21 = vector.load %arg5[%c2, %c0_12, %c0_13] : memref<5x32x32xf32, #tpu.memory_space<vmem>>, vector<1x32x32xf32>
    %22 = vector.shape_cast %21 : vector<1x32x32xf32> to vector<32x32xf32>
    %cst_14 = arith.constant dense<0.000000e+00> : vector<8x32xf32>
    %23 = tpu.matmul %20, %22, %cst_14 {dimension_numbers = #tpu.dot_dimension_numbers<[1], [0], [0], [1], [0, 0, 1, 1], [], []>} : vector<8x32xf32>, vector<32x32xf32>, vector<8x32xf32> -> vector<8x32xf32>
    %24 = arith.addf %19, %23 : vector<8x32xf32>
    %25 = vector.extract_strided_slice %10 {offsets = [3, 0], sizes = [8, 32], strides = [1, 1]} : vector<12x32xf32> to vector<8x32xf32>
    %c3 = arith.constant 3 : index
    %c0_15 = arith.constant 0 : index
    %c0_16 = arith.constant 0 : index
    %26 = vector.load %arg5[%c3, %c0_15, %c0_16] : memref<5x32x32xf32, #tpu.memory_space<vmem>>, vector<1x32x32xf32>
    %27 = vector.shape_cast %26 : vector<1x32x32xf32> to vector<32x32xf32>
    %cst_17 = arith.constant dense<0.000000e+00> : vector<8x32xf32>
    %28 = tpu.matmul %25, %27, %cst_17 {dimension_numbers = #tpu.dot_dimension_numbers<[1], [0], [0], [1], [0, 0, 1, 1], [], []>} : vector<8x32xf32>, vector<32x32xf32>, vector<8x32xf32> -> vector<8x32xf32>
    %29 = arith.addf %24, %28 : vector<8x32xf32>
    %30 = vector.extract_strided_slice %10 {offsets = [4, 0], sizes = [8, 32], strides = [1, 1]} : vector<12x32xf32> to vector<8x32xf32>
    %c4 = arith.constant 4 : index
    %c0_18 = arith.constant 0 : index
    %c0_19 = arith.constant 0 : index
    %31 = vector.load %arg5[%c4, %c0_18, %c0_19] : memref<5x32x32xf32, #tpu.memory_space<vmem>>, vector<1x32x32xf32>
    %32 = vector.shape_cast %31 : vector<1x32x32xf32> to vector<32x32xf32>
    %cst_20 = arith.constant dense<0.000000e+00> : vector<8x32xf32>
    %33 = tpu.matmul %30, %32, %cst_20 {dimension_numbers = #tpu.dot_dimension_numbers<[1], [0], [0], [1], [0, 0, 1, 1], [], []>} : vector<8x32xf32>, vector<32x32xf32>, vector<8x32xf32> -> vector<8x32xf32>
    %34 = arith.addf %29, %33 : vector<8x32xf32>
    %c0_21 = arith.constant 0 : index
    %c0_22 = arith.constant 0 : index
    %35 = vector.load %arg6[%c0_21, %c0_22] : memref<1x32xf32, #tpu.memory_space<vmem>>, vector<1x32xf32>
    %36 = vector.broadcast %35 : vector<1x32xf32> to vector<8x32xf32>
    %37 = arith.mulf %34, %36 : vector<8x32xf32>
    %c0_23 = arith.constant 0 : index
    %c0_24 = arith.constant 0 : index
    %38 = vector.load %arg7[%c0_23, %c0_24] : memref<1x32xf32, #tpu.memory_space<vmem>>, vector<1x32xf32>
    %39 = vector.broadcast %38 : vector<1x32xf32> to vector<8x32xf32>
    %40 = arith.addf %37, %39 : vector<8x32xf32>
    %cst_25 = arith.constant 0.000000e+00 : f32
    %41 = vector.broadcast %cst_25 : f32 to vector<8x32xf32>
    %42 = arith.maximumf %40, %41 : vector<8x32xf32>
    %cst_26 = arith.constant 0.000000e+00 : f32
    %43 = vector.broadcast %cst_26 : f32 to vector<2x32xf32>
    %44 = tpu.concatenate %43, %42, %43 in 0 : vector<2x32xf32>, vector<8x32xf32>, vector<2x32xf32> -> vector<12x32xf32>
    %45 = vector.extract_strided_slice %44 {offsets = [0, 0], sizes = [8, 32], strides = [1, 1]} : vector<12x32xf32> to vector<8x32xf32>
    %c0_27 = arith.constant 0 : index
    %c0_28 = arith.constant 0 : index
    %c0_29 = arith.constant 0 : index
    %46 = vector.load %arg8[%c0_27, %c0_28, %c0_29] : memref<5x32x32xf32, #tpu.memory_space<vmem>>, vector<1x32x32xf32>
    %47 = vector.shape_cast %46 : vector<1x32x32xf32> to vector<32x32xf32>
    %cst_30 = arith.constant dense<0.000000e+00> : vector<8x32xf32>
    %48 = tpu.matmul %45, %47, %cst_30 {dimension_numbers = #tpu.dot_dimension_numbers<[1], [0], [0], [1], [0, 0, 1, 1], [], []>} : vector<8x32xf32>, vector<32x32xf32>, vector<8x32xf32> -> vector<8x32xf32>
    %49 = vector.extract_strided_slice %44 {offsets = [1, 0], sizes = [8, 32], strides = [1, 1]} : vector<12x32xf32> to vector<8x32xf32>
    %c1_31 = arith.constant 1 : index
    %c0_32 = arith.constant 0 : index
    %c0_33 = arith.constant 0 : index
    %50 = vector.load %arg8[%c1_31, %c0_32, %c0_33] : memref<5x32x32xf32, #tpu.memory_space<vmem>>, vector<1x32x32xf32>
    %51 = vector.shape_cast %50 : vector<1x32x32xf32> to vector<32x32xf32>
    %cst_34 = arith.constant dense<0.000000e+00> : vector<8x32xf32>
    %52 = tpu.matmul %49, %51, %cst_34 {dimension_numbers = #tpu.dot_dimension_numbers<[1], [0], [0], [1], [0, 0, 1, 1], [], []>} : vector<8x32xf32>, vector<32x32xf32>, vector<8x32xf32> -> vector<8x32xf32>
    %53 = arith.addf %48, %52 : vector<8x32xf32>
    %54 = vector.extract_strided_slice %44 {offsets = [2, 0], sizes = [8, 32], strides = [1, 1]} : vector<12x32xf32> to vector<8x32xf32>
    %c2_35 = arith.constant 2 : index
    %c0_36 = arith.constant 0 : index
    %c0_37 = arith.constant 0 : index
    %55 = vector.load %arg8[%c2_35, %c0_36, %c0_37] : memref<5x32x32xf32, #tpu.memory_space<vmem>>, vector<1x32x32xf32>
    %56 = vector.shape_cast %55 : vector<1x32x32xf32> to vector<32x32xf32>
    %cst_38 = arith.constant dense<0.000000e+00> : vector<8x32xf32>
    %57 = tpu.matmul %54, %56, %cst_38 {dimension_numbers = #tpu.dot_dimension_numbers<[1], [0], [0], [1], [0, 0, 1, 1], [], []>} : vector<8x32xf32>, vector<32x32xf32>, vector<8x32xf32> -> vector<8x32xf32>
    %58 = arith.addf %53, %57 : vector<8x32xf32>
    %59 = vector.extract_strided_slice %44 {offsets = [3, 0], sizes = [8, 32], strides = [1, 1]} : vector<12x32xf32> to vector<8x32xf32>
    %c3_39 = arith.constant 3 : index
    %c0_40 = arith.constant 0 : index
    %c0_41 = arith.constant 0 : index
    %60 = vector.load %arg8[%c3_39, %c0_40, %c0_41] : memref<5x32x32xf32, #tpu.memory_space<vmem>>, vector<1x32x32xf32>
    %61 = vector.shape_cast %60 : vector<1x32x32xf32> to vector<32x32xf32>
    %cst_42 = arith.constant dense<0.000000e+00> : vector<8x32xf32>
    %62 = tpu.matmul %59, %61, %cst_42 {dimension_numbers = #tpu.dot_dimension_numbers<[1], [0], [0], [1], [0, 0, 1, 1], [], []>} : vector<8x32xf32>, vector<32x32xf32>, vector<8x32xf32> -> vector<8x32xf32>
    %63 = arith.addf %58, %62 : vector<8x32xf32>
    %64 = vector.extract_strided_slice %44 {offsets = [4, 0], sizes = [8, 32], strides = [1, 1]} : vector<12x32xf32> to vector<8x32xf32>
    %c4_43 = arith.constant 4 : index
    %c0_44 = arith.constant 0 : index
    %c0_45 = arith.constant 0 : index
    %65 = vector.load %arg8[%c4_43, %c0_44, %c0_45] : memref<5x32x32xf32, #tpu.memory_space<vmem>>, vector<1x32x32xf32>
    %66 = vector.shape_cast %65 : vector<1x32x32xf32> to vector<32x32xf32>
    %cst_46 = arith.constant dense<0.000000e+00> : vector<8x32xf32>
    %67 = tpu.matmul %64, %66, %cst_46 {dimension_numbers = #tpu.dot_dimension_numbers<[1], [0], [0], [1], [0, 0, 1, 1], [], []>} : vector<8x32xf32>, vector<32x32xf32>, vector<8x32xf32> -> vector<8x32xf32>
    %68 = arith.addf %63, %67 : vector<8x32xf32>
    %c0_47 = arith.constant 0 : index
    %c0_48 = arith.constant 0 : index
    %69 = vector.load %arg9[%c0_47, %c0_48] : memref<1x32xf32, #tpu.memory_space<vmem>>, vector<1x32xf32>
    %70 = vector.broadcast %69 : vector<1x32xf32> to vector<8x32xf32>
    %71 = arith.mulf %68, %70 : vector<8x32xf32>
    %c0_49 = arith.constant 0 : index
    %c0_50 = arith.constant 0 : index
    %72 = vector.load %arg10[%c0_49, %c0_50] : memref<1x32xf32, #tpu.memory_space<vmem>>, vector<1x32xf32>
    %73 = vector.broadcast %72 : vector<1x32xf32> to vector<8x32xf32>
    %74 = arith.addf %71, %73 : vector<8x32xf32>
    %cst_51 = arith.constant 0.000000e+00 : f32
    %75 = vector.broadcast %cst_51 : f32 to vector<8x32xf32>
    %76 = arith.maximumf %74, %75 : vector<8x32xf32>
    %c0_52 = arith.constant 0 : index
    %c0_53 = arith.constant 0 : index
    %77 = vector.load %arg11[%c0_52, %c0_53] : memref<32x32xf32, #tpu.memory_space<vmem>>, vector<32x32xf32>
    %cst_54 = arith.constant dense<0.000000e+00> : vector<8x32xf32>
    %78 = tpu.matmul %76, %77, %cst_54 {dimension_numbers = #tpu.dot_dimension_numbers<[1], [0], [0], [1], [0, 0, 1, 1], [], []>} : vector<8x32xf32>, vector<32x32xf32>, vector<8x32xf32> -> vector<8x32xf32>
    %c0_55 = arith.constant 0 : index
    %c0_56 = arith.constant 0 : index
    %79 = vector.load %arg12[%c0_55, %c0_56] : memref<1x32xf32, #tpu.memory_space<vmem>>, vector<1x32xf32>
    %80 = vector.broadcast %79 : vector<1x32xf32> to vector<8x32xf32>
    %81 = arith.addf %78, %80 : vector<8x32xf32>
    %c0_57 = arith.constant 0 : index
    %c0_58 = arith.constant 0 : index
    %82 = vector.load %arg3[%c0_57, %c0_58] : memref<8x32xf32, #tpu.memory_space<vmem>>, vector<8x32xf32>
    %83 = arith.addf %81, %82 : vector<8x32xf32>
    %c0_59 = arith.constant 0 : index
    %c0_60 = arith.constant 0 : index
    %c0_61 = arith.constant 0 : index
    %84 = vector.load %arg2[%c0_59, %c0_60, %c0_61] : memref<1x1x8xf32, #tpu.memory_space<vmem>>, vector<1x1x8xf32>
    %85 = vector.shape_cast %84 : vector<1x1x8xf32> to vector<1x8xf32>
    %c0_62 = arith.constant 0 : index
    %c0_63 = arith.constant 0 : index
    %86 = vector.load %arg13[%c0_62, %c0_63] : memref<1x32xf32, #tpu.memory_space<vmem>>, vector<1x32xf32>
    %c0_64 = arith.constant 0 : index
    %c0_65 = arith.constant 0 : index
    %87 = vector.load %arg14[%c0_64, %c0_65] : memref<1x32xf32, #tpu.memory_space<vmem>>, vector<1x32xf32>
    %cst_66 = arith.constant dense<0.000000e+00> : vector<8xf32>
    %88 = vector.multi_reduction <add>, %83, %cst_66 [1] : vector<8x32xf32> to vector<8xf32>
    %89 = vector.shape_cast %88 : vector<8xf32> to vector<8x1xf32>
    %cst_67 = arith.constant 3.200000e+01 : f32
    %90 = vector.broadcast %cst_67 : f32 to vector<8x1xf32>
    %91 = arith.divf %89, %90 : vector<8x1xf32>
    %92 = vector.broadcast %91 : vector<8x1xf32> to vector<8x32xf32>
    %93 = arith.subf %83, %92 : vector<8x32xf32>
    %94 = arith.mulf %93, %93 : vector<8x32xf32>
    %cst_68 = arith.constant dense<0.000000e+00> : vector<8xf32>
    %95 = vector.multi_reduction <add>, %94, %cst_68 [1] : vector<8x32xf32> to vector<8xf32>
    %96 = vector.shape_cast %95 : vector<8xf32> to vector<8x1xf32>
    %cst_69 = arith.constant 3.200000e+01 : f32
    %97 = vector.broadcast %cst_69 : f32 to vector<8x1xf32>
    %98 = arith.divf %96, %97 : vector<8x1xf32>
    %99 = vector.broadcast %91 : vector<8x1xf32> to vector<8x32xf32>
    %100 = arith.subf %83, %99 : vector<8x32xf32>
    %cst_70 = arith.constant 9.99999974E-6 : f32
    %101 = vector.broadcast %cst_70 : f32 to vector<8x1xf32>
    %102 = arith.addf %98, %101 : vector<8x1xf32>
    %103 = math.rsqrt %102 : vector<8x1xf32>
    %104 = vector.broadcast %103 : vector<8x1xf32> to vector<8x32xf32>
    %105 = arith.mulf %100, %104 : vector<8x32xf32>
    %106 = vector.broadcast %86 : vector<1x32xf32> to vector<8x32xf32>
    %107 = arith.mulf %105, %106 : vector<8x32xf32>
    %108 = vector.broadcast %87 : vector<1x32xf32> to vector<8x32xf32>
    %109 = arith.addf %107, %108 : vector<8x32xf32>
    %c0_71 = arith.constant 0 : index
    %c0_72 = arith.constant 0 : index
    %110 = vector.load %arg15[%c0_71, %c0_72] : memref<32x96xf32, #tpu.memory_space<vmem>>, vector<32x96xf32>
    %cst_73 = arith.constant dense<0.000000e+00> : vector<8x96xf32>
    %111 = tpu.matmul %109, %110, %cst_73 {dimension_numbers = #tpu.dot_dimension_numbers<[1], [0], [0], [1], [0, 0, 1, 1], [], []>} : vector<8x32xf32>, vector<32x96xf32>, vector<8x96xf32> -> vector<8x96xf32>
    %c0_74 = arith.constant 0 : index
    %c0_75 = arith.constant 0 : index
    %112 = vector.load %arg16[%c0_74, %c0_75] : memref<1x96xf32, #tpu.memory_space<vmem>>, vector<1x96xf32>
    %113 = vector.broadcast %112 : vector<1x96xf32> to vector<8x96xf32>
    %114 = arith.addf %111, %113 : vector<8x96xf32>
    %115 = vector.extract_strided_slice %114 {offsets = [0, 0], sizes = [8, 32], strides = [1, 1]} : vector<8x96xf32> to vector<8x32xf32>
    %116 = vector.extract_strided_slice %114 {offsets = [0, 32], sizes = [8, 32], strides = [1, 1]} : vector<8x96xf32> to vector<8x32xf32>
    %117 = vector.extract_strided_slice %114 {offsets = [0, 64], sizes = [8, 32], strides = [1, 1]} : vector<8x96xf32> to vector<8x32xf32>
    %118 = vector.extract_strided_slice %115 {offsets = [0, 0], sizes = [8, 16], strides = [1, 1]} : vector<8x32xf32> to vector<8x16xf32>
    %119 = vector.extract_strided_slice %116 {offsets = [0, 0], sizes = [8, 16], strides = [1, 1]} : vector<8x32xf32> to vector<8x16xf32>
    %cst_76 = arith.constant dense<0.000000e+00> : vector<8x8xf32>
    %120 = tpu.matmul %118, %119, %cst_76 {dimension_numbers = #tpu.dot_dimension_numbers<[1], [1], [0], [0], [0, 0, 1, 0], [], []>} : vector<8x16xf32>, vector<8x16xf32>, vector<8x8xf32> -> vector<8x8xf32>
    %cst_77 = arith.constant 2.500000e-01 : f32
    %121 = vector.broadcast %cst_77 : f32 to vector<8x8xf32>
    %122 = arith.mulf %120, %121 : vector<8x8xf32>
    %123 = vector.broadcast %85 : vector<1x8xf32> to vector<8x8xf32>
    %124 = arith.addf %122, %123 : vector<8x8xf32>
    %cst_78 = arith.constant dense<0xFF800000> : vector<8xf32>
    %125 = vector.multi_reduction <maximumf>, %124, %cst_78 [1] : vector<8x8xf32> to vector<8xf32>
    %126 = vector.shape_cast %125 : vector<8xf32> to vector<8x1xf32>
    %127 = vector.broadcast %126 : vector<8x1xf32> to vector<8x8xf32>
    %128 = arith.subf %124, %127 : vector<8x8xf32>
    %129 = math.exp %128 : vector<8x8xf32>
    %cst_79 = arith.constant dense<0.000000e+00> : vector<8xf32>
    %130 = vector.multi_reduction <add>, %129, %cst_79 [1] : vector<8x8xf32> to vector<8xf32>
    %131 = vector.shape_cast %130 : vector<8xf32> to vector<8x1xf32>
    %132 = tpu.reciprocal %131 {approx = true} : vector<8x1xf32> -> vector<8x1xf32>
    %133 = vector.broadcast %132 : vector<8x1xf32> to vector<8x8xf32>
    %134 = arith.mulf %129, %133 : vector<8x8xf32>
    %135 = vector.extract_strided_slice %117 {offsets = [0, 0], sizes = [8, 16], strides = [1, 1]} : vector<8x32xf32> to vector<8x16xf32>
    %cst_80 = arith.constant dense<0.000000e+00> : vector<8x16xf32>
    %136 = tpu.matmul %134, %135, %cst_80 {dimension_numbers = #tpu.dot_dimension_numbers<[1], [0], [0], [1], [0, 0, 1, 1], [], []>} : vector<8x8xf32>, vector<8x16xf32>, vector<8x16xf32> -> vector<8x16xf32>
    %c0_81 = arith.constant 0 : index
    %c0_82 = arith.constant 0 : index
    %137 = vector.load %arg17[%c0_81, %c0_82] : memref<32x32xf32, #tpu.memory_space<vmem>>, vector<16x32xf32>
    %cst_83 = arith.constant dense<0.000000e+00> : vector<8x32xf32>
    %138 = tpu.matmul %136, %137, %cst_83 {dimension_numbers = #tpu.dot_dimension_numbers<[1], [0], [0], [1], [0, 0, 1, 1], [], []>} : vector<8x16xf32>, vector<16x32xf32>, vector<8x32xf32> -> vector<8x32xf32>
    %139 = vector.extract_strided_slice %115 {offsets = [0, 16], sizes = [8, 16], strides = [1, 1]} : vector<8x32xf32> to vector<8x16xf32>
    %140 = vector.extract_strided_slice %116 {offsets = [0, 16], sizes = [8, 16], strides = [1, 1]} : vector<8x32xf32> to vector<8x16xf32>
    %cst_84 = arith.constant dense<0.000000e+00> : vector<8x8xf32>
    %141 = tpu.matmul %139, %140, %cst_84 {dimension_numbers = #tpu.dot_dimension_numbers<[1], [1], [0], [0], [0, 0, 1, 0], [], []>} : vector<8x16xf32>, vector<8x16xf32>, vector<8x8xf32> -> vector<8x8xf32>
    %cst_85 = arith.constant 2.500000e-01 : f32
    %142 = vector.broadcast %cst_85 : f32 to vector<8x8xf32>
    %143 = arith.mulf %141, %142 : vector<8x8xf32>
    %144 = vector.broadcast %85 : vector<1x8xf32> to vector<8x8xf32>
    %145 = arith.addf %143, %144 : vector<8x8xf32>
    %cst_86 = arith.constant dense<0xFF800000> : vector<8xf32>
    %146 = vector.multi_reduction <maximumf>, %145, %cst_86 [1] : vector<8x8xf32> to vector<8xf32>
    %147 = vector.shape_cast %146 : vector<8xf32> to vector<8x1xf32>
    %148 = vector.broadcast %147 : vector<8x1xf32> to vector<8x8xf32>
    %149 = arith.subf %145, %148 : vector<8x8xf32>
    %150 = math.exp %149 : vector<8x8xf32>
    %cst_87 = arith.constant dense<0.000000e+00> : vector<8xf32>
    %151 = vector.multi_reduction <add>, %150, %cst_87 [1] : vector<8x8xf32> to vector<8xf32>
    %152 = vector.shape_cast %151 : vector<8xf32> to vector<8x1xf32>
    %153 = tpu.reciprocal %152 {approx = true} : vector<8x1xf32> -> vector<8x1xf32>
    %154 = vector.broadcast %153 : vector<8x1xf32> to vector<8x8xf32>
    %155 = arith.mulf %150, %154 : vector<8x8xf32>
    %156 = vector.extract_strided_slice %117 {offsets = [0, 16], sizes = [8, 16], strides = [1, 1]} : vector<8x32xf32> to vector<8x16xf32>
    %cst_88 = arith.constant dense<0.000000e+00> : vector<8x16xf32>
    %157 = tpu.matmul %155, %156, %cst_88 {dimension_numbers = #tpu.dot_dimension_numbers<[1], [0], [0], [1], [0, 0, 1, 1], [], []>} : vector<8x8xf32>, vector<8x16xf32>, vector<8x16xf32> -> vector<8x16xf32>
    %c16 = arith.constant 16 : index
    %c0_89 = arith.constant 0 : index
    %158 = vector.load %arg17[%c16, %c0_89] : memref<32x32xf32, #tpu.memory_space<vmem>>, vector<16x32xf32>
    %cst_90 = arith.constant dense<0.000000e+00> : vector<8x32xf32>
    %159 = tpu.matmul %157, %158, %cst_90 {dimension_numbers = #tpu.dot_dimension_numbers<[1], [0], [0], [1], [0, 0, 1, 1], [], []>} : vector<8x16xf32>, vector<16x32xf32>, vector<8x32xf32> -> vector<8x32xf32>
    %160 = arith.addf %138, %159 : vector<8x32xf32>
    %161 = arith.addf %83, %160 : vector<8x32xf32>
    %c0_91 = arith.constant 0 : index
    %c0_92 = arith.constant 0 : index
    %162 = vector.load %arg18[%c0_91, %c0_92] : memref<1x32xf32, #tpu.memory_space<vmem>>, vector<1x32xf32>
    %163 = vector.broadcast %162 : vector<1x32xf32> to vector<8x32xf32>
    %164 = arith.addf %161, %163 : vector<8x32xf32>
    %c0_93 = arith.constant 0 : index
    %c0_94 = arith.constant 0 : index
    %165 = vector.load %arg19[%c0_93, %c0_94] : memref<1x32xf32, #tpu.memory_space<vmem>>, vector<1x32xf32>
    %c0_95 = arith.constant 0 : index
    %c0_96 = arith.constant 0 : index
    %166 = vector.load %arg20[%c0_95, %c0_96] : memref<1x32xf32, #tpu.memory_space<vmem>>, vector<1x32xf32>
    %cst_97 = arith.constant dense<0.000000e+00> : vector<8xf32>
    %167 = vector.multi_reduction <add>, %164, %cst_97 [1] : vector<8x32xf32> to vector<8xf32>
    %168 = vector.shape_cast %167 : vector<8xf32> to vector<8x1xf32>
    %cst_98 = arith.constant 3.200000e+01 : f32
    %169 = vector.broadcast %cst_98 : f32 to vector<8x1xf32>
    %170 = arith.divf %168, %169 : vector<8x1xf32>
    %171 = vector.broadcast %170 : vector<8x1xf32> to vector<8x32xf32>
    %172 = arith.subf %164, %171 : vector<8x32xf32>
    %173 = arith.mulf %172, %172 : vector<8x32xf32>
    %cst_99 = arith.constant dense<0.000000e+00> : vector<8xf32>
    %174 = vector.multi_reduction <add>, %173, %cst_99 [1] : vector<8x32xf32> to vector<8xf32>
    %175 = vector.shape_cast %174 : vector<8xf32> to vector<8x1xf32>
    %cst_100 = arith.constant 3.200000e+01 : f32
    %176 = vector.broadcast %cst_100 : f32 to vector<8x1xf32>
    %177 = arith.divf %175, %176 : vector<8x1xf32>
    %178 = vector.broadcast %170 : vector<8x1xf32> to vector<8x32xf32>
    %179 = arith.subf %164, %178 : vector<8x32xf32>
    %cst_101 = arith.constant 9.99999974E-6 : f32
    %180 = vector.broadcast %cst_101 : f32 to vector<8x1xf32>
    %181 = arith.addf %177, %180 : vector<8x1xf32>
    %182 = math.rsqrt %181 : vector<8x1xf32>
    %183 = vector.broadcast %182 : vector<8x1xf32> to vector<8x32xf32>
    %184 = arith.mulf %179, %183 : vector<8x32xf32>
    %185 = vector.broadcast %165 : vector<1x32xf32> to vector<8x32xf32>
    %186 = arith.mulf %184, %185 : vector<8x32xf32>
    %187 = vector.broadcast %166 : vector<1x32xf32> to vector<8x32xf32>
    %188 = arith.addf %186, %187 : vector<8x32xf32>
    %c0_102 = arith.constant 0 : index
    %c0_103 = arith.constant 0 : index
    %189 = vector.load %arg21[%c0_102, %c0_103] : memref<32x64xf32, #tpu.memory_space<vmem>>, vector<32x64xf32>
    %cst_104 = arith.constant dense<0.000000e+00> : vector<8x64xf32>
    %190 = tpu.matmul %188, %189, %cst_104 {dimension_numbers = #tpu.dot_dimension_numbers<[1], [0], [0], [1], [0, 0, 1, 1], [], []>} : vector<8x32xf32>, vector<32x64xf32>, vector<8x64xf32> -> vector<8x64xf32>
    %c0_105 = arith.constant 0 : index
    %c0_106 = arith.constant 0 : index
    %191 = vector.load %arg22[%c0_105, %c0_106] : memref<1x64xf32, #tpu.memory_space<vmem>>, vector<1x64xf32>
    %192 = vector.broadcast %191 : vector<1x64xf32> to vector<8x64xf32>
    %193 = arith.addf %190, %192 : vector<8x64xf32>
    %cst_107 = arith.constant 5.000000e-01 : f32
    %194 = vector.broadcast %cst_107 : f32 to vector<8x64xf32>
    %195 = arith.mulf %194, %193 : vector<8x64xf32>
    %cst_108 = arith.constant 4.471500e-02 : f32
    %196 = vector.broadcast %cst_108 : f32 to vector<8x64xf32>
    %197 = arith.mulf %196, %193 : vector<8x64xf32>
    %198 = arith.mulf %197, %193 : vector<8x64xf32>
    %199 = arith.mulf %198, %193 : vector<8x64xf32>
    %200 = arith.addf %193, %199 : vector<8x64xf32>
    %cst_109 = arith.constant 0.797884583 : f32
    %201 = vector.broadcast %cst_109 : f32 to vector<8x64xf32>
    %202 = arith.mulf %201, %200 : vector<8x64xf32>
    %203 = math.tanh %202 : vector<8x64xf32>
    %cst_110 = arith.constant 1.000000e+00 : f32
    %204 = vector.broadcast %cst_110 : f32 to vector<8x64xf32>
    %205 = arith.addf %204, %203 : vector<8x64xf32>
    %206 = arith.mulf %195, %205 : vector<8x64xf32>
    %c0_111 = arith.constant 0 : index
    %c0_112 = arith.constant 0 : index
    %207 = vector.load %arg23[%c0_111, %c0_112] : memref<64x32xf32, #tpu.memory_space<vmem>>, vector<64x32xf32>
    %cst_113 = arith.constant dense<0.000000e+00> : vector<8x32xf32>
    %208 = tpu.matmul %206, %207, %cst_113 {dimension_numbers = #tpu.dot_dimension_numbers<[1], [0], [0], [1], [0, 0, 1, 1], [], []>} : vector<8x64xf32>, vector<64x32xf32>, vector<8x32xf32> -> vector<8x32xf32>
    %209 = arith.addf %164, %208 : vector<8x32xf32>
    %c0_114 = arith.constant 0 : index
    %c0_115 = arith.constant 0 : index
    %210 = vector.load %arg24[%c0_114, %c0_115] : memref<1x32xf32, #tpu.memory_space<vmem>>, vector<1x32xf32>
    %211 = vector.broadcast %210 : vector<1x32xf32> to vector<8x32xf32>
    %212 = arith.addf %209, %211 : vector<8x32xf32>
    %c0_116 = arith.constant 0 : index
    %c0_117 = arith.constant 0 : index
    %c0_118 = arith.constant 0 : index
    %213 = vector.load %arg25[%c0_116, %c0_117, %c0_118] : memref<1x8x32xf32, #tpu.memory_space<vmem>>, vector<1x8x32xf32>
    %214 = vector.shape_cast %213 : vector<1x8x32xf32> to vector<8x32xf32>
    %215 = vector.shape_cast %212 : vector<8x32xf32> to vector<1x8x32xf32>
    tpu.vector_store %arg25[%c0_116, %c0_117, %c0_118], %215 {strides = array<i32>} : memref<1x8x32xf32, #tpu.memory_space<vmem>>, vector<1x8x32xf32>,
    return
  }
  func.func @transform_0(%arg0: i32) -> (i32, i32, i32) {
    %c0_i32 = arith.constant 0 : i32
    %c0_i32_0 = arith.constant 0 : i32
    %c0_i32_1 = arith.constant 0 : i32
    return %arg0, %c0_i32, %c0_i32_0 : i32, i32, i32
  }
  func.func @transform_1(%arg0: i32) -> (i32, i32, i32) {
    %c0_i32 = arith.constant 0 : i32
    %c0_i32_0 = arith.constant 0 : i32
    %c0_i32_1 = arith.constant 0 : i32
    return %arg0, %c0_i32, %c0_i32_0 : i32, i32, i32
  }
  func.func @transform_2(%arg0: i32) -> (i32, i32) {
    %c0_i32 = arith.constant 0 : i32
    %c0_i32_0 = arith.constant 0 : i32
    %c0_i32_1 = arith.constant 0 : i32
    return %c0_i32, %c0_i32_0 : i32, i32
  }
  func.func @transform_3(%arg0: i32) -> (i32, i32) {
    %c0_i32 = arith.constant 0 : i32
    %c0_i32_0 = arith.constant 0 : i32
    %c0_i32_1 = arith.constant 0 : i32
    return %c0_i32, %c0_i32_0 : i32, i32
  }
  func.func @transform_4(%arg0: i32) -> (i32, i32, i32) {
    %c0_i32 = arith.constant 0 : i32
    %c0_i32_0 = arith.constant 0 : i32
    %c0_i32_1 = arith.constant 0 : i32
    %c0_i32_2 = arith.constant 0 : i32
    return %c0_i32, %c0_i32_0, %c0_i32_1 : i32, i32, i32
  }
  func.func @transform_5(%arg0: i32) -> (i32, i32) {
    %c0_i32 = arith.constant 0 : i32
    %c0_i32_0 = arith.constant 0 : i32
    %c0_i32_1 = arith.constant 0 : i32
    return %c0_i32, %c0_i32_0 : i32, i32
  }
  func.func @transform_6(%arg0: i32) -> (i32, i32) {
    %c0_i32 = arith.constant 0 : i32
    %c0_i32_0 = arith.constant 0 : i32
    %c0_i32_1 = arith.constant 0 : i32
    return %c0_i32, %c0_i32_0 : i32, i32
  }
  func.func @transform_7(%arg0: i32) -> (i32, i32, i32) {
    %c0_i32 = arith.constant 0 : i32
    %c0_i32_0 = arith.constant 0 : i32
    %c0_i32_1 = arith.constant 0 : i32
    %c0_i32_2 = arith.constant 0 : i32
    return %c0_i32, %c0_i32_0, %c0_i32_1 : i32, i32, i32
  }
  func.func @transform_8(%arg0: i32) -> (i32, i32) {
    %c0_i32 = arith.constant 0 : i32
    %c0_i32_0 = arith.constant 0 : i32
    %c0_i32_1 = arith.constant 0 : i32
    return %c0_i32, %c0_i32_0 : i32, i32
  }
  func.func @transform_9(%arg0: i32) -> (i32, i32) {
    %c0_i32 = arith.constant 0 : i32
    %c0_i32_0 = arith.constant 0 : i32
    %c0_i32_1 = arith.constant 0 : i32
    return %c0_i32, %c0_i32_0 : i32, i32
  }
  func.func @transform_10(%arg0: i32) -> (i32, i32) {
    %c0_i32 = arith.constant 0 : i32
    %c0_i32_0 = arith.constant 0 : i32
    %c0_i32_1 = arith.constant 0 : i32
    return %c0_i32, %c0_i32_0 : i32, i32
  }
  func.func @transform_11(%arg0: i32) -> (i32, i32) {
    %c0_i32 = arith.constant 0 : i32
    %c0_i32_0 = arith.constant 0 : i32
    %c0_i32_1 = arith.constant 0 : i32
    return %c0_i32, %c0_i32_0 : i32, i32
  }
  func.func @transform_12(%arg0: i32) -> (i32, i32) {
    %c0_i32 = arith.constant 0 : i32
    %c0_i32_0 = arith.constant 0 : i32
    %c0_i32_1 = arith.constant 0 : i32
    return %c0_i32, %c0_i32_0 : i32, i32
  }
  func.func @transform_13(%arg0: i32) -> (i32, i32) {
    %c0_i32 = arith.constant 0 : i32
    %c0_i32_0 = arith.constant 0 : i32
    %c0_i32_1 = arith.constant 0 : i32
    return %c0_i32, %c0_i32_0 : i32, i32
  }
  func.func @transform_14(%arg0: i32) -> (i32, i32) {
    %c0_i32 = arith.constant 0 : i32
    %c0_i32_0 = arith.constant 0 : i32
    %c0_i32_1 = arith.constant 0 : i32
    return %c0_i32, %c0_i32_0 : i32, i32
  }
  func.func @transform_15(%arg0: i32) -> (i32, i32) {
    %c0_i32 = arith.constant 0 : i32
    %c0_i32_0 = arith.constant 0 : i32
    %c0_i32_1 = arith.constant 0 : i32
    return %c0_i32, %c0_i32_0 : i32, i32
  }
  func.func @transform_16(%arg0: i32) -> (i32, i32) {
    %c0_i32 = arith.constant 0 : i32
    %c0_i32_0 = arith.constant 0 : i32
    %c0_i32_1 = arith.constant 0 : i32
    return %c0_i32, %c0_i32_0 : i32, i32
  }
  func.func @transform_17(%arg0: i32) -> (i32, i32) {
    %c0_i32 = arith.constant 0 : i32
    %c0_i32_0 = arith.constant 0 : i32
    %c0_i32_1 = arith.constant 0 : i32
    return %c0_i32, %c0_i32_0 : i32, i32
  }
  func.func @transform_18(%arg0: i32) -> (i32, i32) {
    %c0_i32 = arith.constant 0 : i32
    %c0_i32_0 = arith.constant 0 : i32
    %c0_i32_1 = arith.constant 0 : i32
    return %c0_i32, %c0_i32_0 : i32, i32
  }
  func.func @transform_19(%arg0: i32) -> (i32, i32) {
    %c0_i32 = arith.constant 0 : i32
    %c0_i32_0 = arith.constant 0 : i32
    %c0_i32_1 = arith.constant 0 : i32
    return %c0_i32, %c0_i32_0 : i32, i32
  }
  func.func @transform_20(%arg0: i32) -> (i32, i32) {
    %c0_i32 = arith.constant 0 : i32
    %c0_i32_0 = arith.constant 0 : i32
    %c0_i32_1 = arith.constant 0 : i32
    return %c0_i32, %c0_i32_0 : i32, i32
  }
  func.func @transform_21(%arg0: i32) -> (i32, i32) {
    %c0_i32 = arith.constant 0 : i32
    %c0_i32_0 = arith.constant 0 : i32
    %c0_i32_1 = arith.constant 0 : i32
    return %c0_i32, %c0_i32_0 : i32, i32
  }
  func.func @transform_22(%arg0: i32) -> (i32, i32) {
    %c0_i32 = arith.constant 0 : i32
    %c0_i32_0 = arith.constant 0 : i32
    %c0_i32_1 = arith.constant 0 : i32
    return %c0_i32, %c0_i32_0 : i32, i32
  }
  func.func @transform_23(%arg0: i32) -> (i32, i32) {
    %c0_i32 = arith.constant 0 : i32
    %c0_i32_0 = arith.constant 0 : i32
    %c0_i32_1 = arith.constant 0 : i32
    return %c0_i32, %c0_i32_0 : i32, i32
  }
  func.func @transform_24(%arg0: i32) -> (i32, i32, i32) {
    %c0_i32 = arith.constant 0 : i32
    %c0_i32_0 = arith.constant 0 : i32
    %c0_i32_1 = arith.constant 0 : i32
    return %arg0, %c0_i32, %c0_i32_0 : i32, i32, i32
  }
}

module attributes {stable_mosaic.version = 11 : i64} {
  func.func @kernel(%arg0: i32, %arg1: memref<1x16x16xf32, #tpu.memory_space<vmem>>, %arg2: memref<1x8x32xf32, #tpu.memory_space<vmem>>, %arg3: memref<1x1x16xf32, #tpu.memory_space<vmem>>, %arg4: memref<1x1x8xf32, #tpu.memory_space<vmem>>, %arg5: memref<16x32xf32, #tpu.memory_space<vmem>>, %arg6: memref<16x32xf32, #tpu.memory_space<vmem>>, %arg7: memref<1x32xf32, #tpu.memory_space<vmem>>, %arg8: memref<32x32xf32, #tpu.memory_space<vmem>>, %arg9: memref<1x32xf32, #tpu.memory_space<vmem>>, %arg10: memref<1x32xf32, #tpu.memory_space<vmem>>, %arg11: memref<1x32xf32, #tpu.memory_space<vmem>>, %arg12: memref<32x96xf32, #tpu.memory_space<vmem>>, %arg13: memref<1x96xf32, #tpu.memory_space<vmem>>, %arg14: memref<32x32xf32, #tpu.memory_space<vmem>>, %arg15: memref<1x32xf32, #tpu.memory_space<vmem>>, %arg16: memref<1x32xf32, #tpu.memory_space<vmem>>, %arg17: memref<1x32xf32, #tpu.memory_space<vmem>>, %arg18: memref<32x32xf32, #tpu.memory_space<vmem>>, %arg19: memref<1x32xf32, #tpu.memory_space<vmem>>, %arg20: memref<32x64xf32, #tpu.memory_space<vmem>>, %arg21: memref<1x64xf32, #tpu.memory_space<vmem>>, %arg22: memref<32x32xf32, #tpu.memory_space<vmem>>, %arg23: memref<1x32xf32, #tpu.memory_space<vmem>>, %arg24: memref<1x32xf32, #tpu.memory_space<vmem>>, %arg25: memref<1x32xf32, #tpu.memory_space<vmem>>, %arg26: memref<32x64xf32, #tpu.memory_space<vmem>>, %arg27: memref<1x64xf32, #tpu.memory_space<vmem>>, %arg28: memref<64x32xf32, #tpu.memory_space<vmem>>, %arg29: memref<1x32xf32, #tpu.memory_space<vmem>>, %arg30: memref<32x17xf32, #tpu.memory_space<vmem>>, %arg31: memref<1x17xf32, #tpu.memory_space<vmem>>, %arg32: memref<5x16x32xf32, #tpu.memory_space<vmem>>, %arg33: memref<1x32xf32, #tpu.memory_space<vmem>>, %arg34: memref<1x32xf32, #tpu.memory_space<vmem>>, %arg35: memref<5x32x32xf32, #tpu.memory_space<vmem>>, %arg36: memref<1x32xf32, #tpu.memory_space<vmem>>, %arg37: memref<1x32xf32, #tpu.memory_space<vmem>>, %arg38: memref<5x32x16xf32, #tpu.memory_space<vmem>>, %arg39: memref<1x16xf32, #tpu.memory_space<vmem>>, %arg40: memref<1x16xf32, #tpu.memory_space<vmem>>, %arg41: memref<1x16x33xf32, #tpu.memory_space<vmem>>, %arg42: memref<1x1x16x16xf32, #tpu.memory_space<vmem>>) attributes {dimension_semantics = [#tpu.dimension_semantics<parallel>], iteration_bounds = array<i64: 2>, scalar_prefetch = 0 : i64, scratch_operands = 0 : i64, tpu.core_type = #tpu.core_type<tc>, window_params = [{transform_indices = @transform_0, window_bounds = array<i64: 1, 16, 16>}, {transform_indices = @transform_1, window_bounds = array<i64: 1, 8, 32>}, {transform_indices = @transform_2, window_bounds = array<i64: 1, 1, 16>}, {transform_indices = @transform_3, window_bounds = array<i64: 1, 1, 8>}, {pipeline_mode = #tpu.pipeline_mode<synchronous>, transform_indices = @transform_4, window_bounds = array<i64: 16, 32>}, {pipeline_mode = #tpu.pipeline_mode<synchronous>, transform_indices = @transform_5, window_bounds = array<i64: 16, 32>}, {pipeline_mode = #tpu.pipeline_mode<synchronous>, transform_indices = @transform_6, window_bounds = array<i64: 1, 32>}, {pipeline_mode = #tpu.pipeline_mode<synchronous>, transform_indices = @transform_7, window_bounds = array<i64: 32, 32>}, {pipeline_mode = #tpu.pipeline_mode<synchronous>, transform_indices = @transform_8, window_bounds = array<i64: 1, 32>}, {pipeline_mode = #tpu.pipeline_mode<synchronous>, transform_indices = @transform_9, window_bounds = array<i64: 1, 32>}, {pipeline_mode = #tpu.pipeline_mode<synchronous>, transform_indices = @transform_10, window_bounds = array<i64: 1, 32>}, {pipeline_mode = #tpu.pipeline_mode<synchronous>, transform_indices = @transform_11, window_bounds = array<i64: 32, 96>}, {pipeline_mode = #tpu.pipeline_mode<synchronous>, transform_indices = @transform_12, window_bounds = array<i64: 1, 96>}, {pipeline_mode = #tpu.pipeline_mode<synchronous>, transform_indices = @transform_13, window_bounds = array<i64: 32, 32>}, {pipeline_mode = #tpu.pipeline_mode<synchronous>, transform_indices = @transform_14, window_bounds = array<i64: 1, 32>}, {pipeline_mode = #tpu.pipeline_mode<synchronous>, transform_indices = @transform_15, window_bounds = array<i64: 1, 32>}, {pipeline_mode = #tpu.pipeline_mode<synchronous>, transform_indices = @transform_16, window_bounds = array<i64: 1, 32>}, {pipeline_mode = #tpu.pipeline_mode<synchronous>, transform_indices = @transform_17, window_bounds = array<i64: 32, 32>}, {pipeline_mode = #tpu.pipeline_mode<synchronous>, transform_indices = @transform_18, window_bounds = array<i64: 1, 32>}, {pipeline_mode = #tpu.pipeline_mode<synchronous>, transform_indices = @transform_19, window_bounds = array<i64: 32, 64>}, {pipeline_mode = #tpu.pipeline_mode<synchronous>, transform_indices = @transform_20, window_bounds = array<i64: 1, 64>}, {pipeline_mode = #tpu.pipeline_mode<synchronous>, transform_indices = @transform_21, window_bounds = array<i64: 32, 32>}, {pipeline_mode = #tpu.pipeline_mode<synchronous>, transform_indices = @transform_22, window_bounds = array<i64: 1, 32>}, {pipeline_mode = #tpu.pipeline_mode<synchronous>, transform_indices = @transform_23, window_bounds = array<i64: 1, 32>}, {pipeline_mode = #tpu.pipeline_mode<synchronous>, transform_indices = @transform_24, window_bounds = array<i64: 1, 32>}, {pipeline_mode = #tpu.pipeline_mode<synchronous>, transform_indices = @transform_25, window_bounds = array<i64: 32, 64>}, {pipeline_mode = #tpu.pipeline_mode<synchronous>, transform_indices = @transform_26, window_bounds = array<i64: 1, 64>}, {pipeline_mode = #tpu.pipeline_mode<synchronous>, transform_indices = @transform_27, window_bounds = array<i64: 64, 32>}, {pipeline_mode = #tpu.pipeline_mode<synchronous>, transform_indices = @transform_28, window_bounds = array<i64: 1, 32>}, {pipeline_mode = #tpu.pipeline_mode<synchronous>, transform_indices = @transform_29, window_bounds = array<i64: 32, 17>}, {pipeline_mode = #tpu.pipeline_mode<synchronous>, transform_indices = @transform_30, window_bounds = array<i64: 1, 17>}, {pipeline_mode = #tpu.pipeline_mode<synchronous>, transform_indices = @transform_31, window_bounds = array<i64: 5, 16, 32>}, {pipeline_mode = #tpu.pipeline_mode<synchronous>, transform_indices = @transform_32, window_bounds = array<i64: 1, 32>}, {pipeline_mode = #tpu.pipeline_mode<synchronous>, transform_indices = @transform_33, window_bounds = array<i64: 1, 32>}, {pipeline_mode = #tpu.pipeline_mode<synchronous>, transform_indices = @transform_34, window_bounds = array<i64: 5, 32, 32>}, {pipeline_mode = #tpu.pipeline_mode<synchronous>, transform_indices = @transform_35, window_bounds = array<i64: 1, 32>}, {pipeline_mode = #tpu.pipeline_mode<synchronous>, transform_indices = @transform_36, window_bounds = array<i64: 1, 32>}, {pipeline_mode = #tpu.pipeline_mode<synchronous>, transform_indices = @transform_37, window_bounds = array<i64: 5, 32, 16>}, {pipeline_mode = #tpu.pipeline_mode<synchronous>, transform_indices = @transform_38, window_bounds = array<i64: 1, 16>}, {pipeline_mode = #tpu.pipeline_mode<synchronous>, transform_indices = @transform_39, window_bounds = array<i64: 1, 16>}, {transform_indices = @transform_40, window_bounds = array<i64: 1, 16, 33>}, {transform_indices = @transform_41, window_bounds = array<i64: 1, 1, 16, 16>}]} {
    %c0 = arith.constant 0 : index
    %c0_0 = arith.constant 0 : index
    %c0_1 = arith.constant 0 : index
    %0 = vector.load %arg1[%c0, %c0_0, %c0_1] : memref<1x16x16xf32, #tpu.memory_space<vmem>>, vector<1x16x16xf32>
    %1 = vector.shape_cast %0 : vector<1x16x16xf32> to vector<16x16xf32>
    %c0_2 = arith.constant 0 : index
    %c0_3 = arith.constant 0 : index
    %c0_4 = arith.constant 0 : index
    %2 = vector.load %arg2[%c0_2, %c0_3, %c0_4] : memref<1x8x32xf32, #tpu.memory_space<vmem>>, vector<1x8x32xf32>
    %3 = vector.shape_cast %2 : vector<1x8x32xf32> to vector<8x32xf32>
    %c0_5 = arith.constant 0 : index
    %c0_6 = arith.constant 0 : index
    %4 = vector.load %arg6[%c0_5, %c0_6] : memref<16x32xf32, #tpu.memory_space<vmem>>, vector<16x32xf32>
    %cst = arith.constant dense<0.000000e+00> : vector<16x32xf32>
    %5 = tpu.matmul %1, %4, %cst {dimension_numbers = #tpu.dot_dimension_numbers<[1], [0], [0], [1], [0, 0, 1, 1], [], []>} : vector<16x16xf32>, vector<16x32xf32>, vector<16x32xf32> -> vector<16x32xf32>
    %c0_7 = arith.constant 0 : index
    %c0_8 = arith.constant 0 : index
    %6 = vector.load %arg7[%c0_7, %c0_8] : memref<1x32xf32, #tpu.memory_space<vmem>>, vector<1x32xf32>
    %7 = vector.broadcast %6 : vector<1x32xf32> to vector<16x32xf32>
    %8 = arith.addf %5, %7 : vector<16x32xf32>
    %cst_9 = arith.constant 0.000000e+00 : f32
    %9 = vector.broadcast %cst_9 : f32 to vector<16x32xf32>
    %10 = arith.maximumf %8, %9 : vector<16x32xf32>
    %c0_10 = arith.constant 0 : index
    %c0_11 = arith.constant 0 : index
    %11 = vector.load %arg8[%c0_10, %c0_11] : memref<32x32xf32, #tpu.memory_space<vmem>>, vector<32x32xf32>
    %cst_12 = arith.constant dense<0.000000e+00> : vector<16x32xf32>
    %12 = tpu.matmul %10, %11, %cst_12 {dimension_numbers = #tpu.dot_dimension_numbers<[1], [0], [0], [1], [0, 0, 1, 1], [], []>} : vector<16x32xf32>, vector<32x32xf32>, vector<16x32xf32> -> vector<16x32xf32>
    %c0_13 = arith.constant 0 : index
    %c0_14 = arith.constant 0 : index
    %13 = vector.load %arg9[%c0_13, %c0_14] : memref<1x32xf32, #tpu.memory_space<vmem>>, vector<1x32xf32>
    %14 = vector.broadcast %13 : vector<1x32xf32> to vector<16x32xf32>
    %15 = arith.addf %12, %14 : vector<16x32xf32>
    %cst_15 = arith.constant 0.000000e+00 : f32
    %16 = vector.broadcast %cst_15 : f32 to vector<16x32xf32>
    %17 = arith.maximumf %15, %16 : vector<16x32xf32>
    %c0_16 = arith.constant 0 : index
    %c0_17 = arith.constant 0 : index
    %18 = vector.load %arg5[%c0_16, %c0_17] : memref<16x32xf32, #tpu.memory_space<vmem>>, vector<16x32xf32>
    %19 = arith.addf %17, %18 : vector<16x32xf32>
    %20 = tpu.iota {dimensions = array<i32: 0>} : vector<16x16xi32>
    %21 = tpu.iota {dimensions = array<i32: 1>} : vector<16x16xi32>
    %22 = arith.cmpi sle, %21, %20 : vector<16x16xi32>
    %cst_18 = arith.constant 0.000000e+00 : f32
    %cst_19 = arith.constant -1.000000e+09 : f32
    %23 = vector.broadcast %cst_18 : f32 to vector<16x16xf32>
    %24 = vector.broadcast %cst_19 : f32 to vector<16x16xf32>
    %25 = arith.select %22, %23, %24 : vector<16x16xi1>, vector<16x16xf32>
    %c0_20 = arith.constant 0 : index
    %c0_21 = arith.constant 0 : index
    %c0_22 = arith.constant 0 : index
    %26 = vector.load %arg3[%c0_20, %c0_21, %c0_22] : memref<1x1x16xf32, #tpu.memory_space<vmem>>, vector<1x1x16xf32>
    %27 = vector.shape_cast %26 : vector<1x1x16xf32> to vector<1x16xf32>
    %28 = vector.broadcast %27 : vector<1x16xf32> to vector<16x16xf32>
    %29 = arith.addf %25, %28 : vector<16x16xf32>
    %c0_23 = arith.constant 0 : index
    %c0_24 = arith.constant 0 : index
    %c0_25 = arith.constant 0 : index
    %30 = vector.load %arg4[%c0_23, %c0_24, %c0_25] : memref<1x1x8xf32, #tpu.memory_space<vmem>>, vector<1x1x8xf32>
    %31 = vector.shape_cast %30 : vector<1x1x8xf32> to vector<1x8xf32>
    %c0_26 = arith.constant 0 : index
    %c0_27 = arith.constant 0 : index
    %32 = vector.load %arg10[%c0_26, %c0_27] : memref<1x32xf32, #tpu.memory_space<vmem>>, vector<1x32xf32>
    %c0_28 = arith.constant 0 : index
    %c0_29 = arith.constant 0 : index
    %33 = vector.load %arg11[%c0_28, %c0_29] : memref<1x32xf32, #tpu.memory_space<vmem>>, vector<1x32xf32>
    %cst_30 = arith.constant dense<0.000000e+00> : vector<16xf32>
    %34 = vector.multi_reduction <add>, %19, %cst_30 [1] : vector<16x32xf32> to vector<16xf32>
    %35 = vector.shape_cast %34 : vector<16xf32> to vector<16x1xf32>
    %cst_31 = arith.constant 3.200000e+01 : f32
    %36 = vector.broadcast %cst_31 : f32 to vector<16x1xf32>
    %37 = arith.divf %35, %36 : vector<16x1xf32>
    %38 = vector.broadcast %37 : vector<16x1xf32> to vector<16x32xf32>
    %39 = arith.subf %19, %38 : vector<16x32xf32>
    %40 = arith.mulf %39, %39 : vector<16x32xf32>
    %cst_32 = arith.constant dense<0.000000e+00> : vector<16xf32>
    %41 = vector.multi_reduction <add>, %40, %cst_32 [1] : vector<16x32xf32> to vector<16xf32>
    %42 = vector.shape_cast %41 : vector<16xf32> to vector<16x1xf32>
    %cst_33 = arith.constant 3.200000e+01 : f32
    %43 = vector.broadcast %cst_33 : f32 to vector<16x1xf32>
    %44 = arith.divf %42, %43 : vector<16x1xf32>
    %45 = vector.broadcast %37 : vector<16x1xf32> to vector<16x32xf32>
    %46 = arith.subf %19, %45 : vector<16x32xf32>
    %cst_34 = arith.constant 9.99999974E-6 : f32
    %47 = vector.broadcast %cst_34 : f32 to vector<16x1xf32>
    %48 = arith.addf %44, %47 : vector<16x1xf32>
    %49 = math.rsqrt %48 : vector<16x1xf32>
    %50 = vector.broadcast %49 : vector<16x1xf32> to vector<16x32xf32>
    %51 = arith.mulf %46, %50 : vector<16x32xf32>
    %52 = vector.broadcast %32 : vector<1x32xf32> to vector<16x32xf32>
    %53 = arith.mulf %51, %52 : vector<16x32xf32>
    %54 = vector.broadcast %33 : vector<1x32xf32> to vector<16x32xf32>
    %55 = arith.addf %53, %54 : vector<16x32xf32>
    %c0_35 = arith.constant 0 : index
    %c0_36 = arith.constant 0 : index
    %56 = vector.load %arg12[%c0_35, %c0_36] : memref<32x96xf32, #tpu.memory_space<vmem>>, vector<32x96xf32>
    %cst_37 = arith.constant dense<0.000000e+00> : vector<16x96xf32>
    %57 = tpu.matmul %55, %56, %cst_37 {dimension_numbers = #tpu.dot_dimension_numbers<[1], [0], [0], [1], [0, 0, 1, 1], [], []>} : vector<16x32xf32>, vector<32x96xf32>, vector<16x96xf32> -> vector<16x96xf32>
    %c0_38 = arith.constant 0 : index
    %c0_39 = arith.constant 0 : index
    %58 = vector.load %arg13[%c0_38, %c0_39] : memref<1x96xf32, #tpu.memory_space<vmem>>, vector<1x96xf32>
    %59 = vector.broadcast %58 : vector<1x96xf32> to vector<16x96xf32>
    %60 = arith.addf %57, %59 : vector<16x96xf32>
    %61 = vector.extract_strided_slice %60 {offsets = [0, 0], sizes = [16, 32], strides = [1, 1]} : vector<16x96xf32> to vector<16x32xf32>
    %62 = vector.extract_strided_slice %60 {offsets = [0, 32], sizes = [16, 32], strides = [1, 1]} : vector<16x96xf32> to vector<16x32xf32>
    %63 = vector.extract_strided_slice %60 {offsets = [0, 64], sizes = [16, 32], strides = [1, 1]} : vector<16x96xf32> to vector<16x32xf32>
    %64 = vector.extract_strided_slice %61 {offsets = [0, 0], sizes = [16, 16], strides = [1, 1]} : vector<16x32xf32> to vector<16x16xf32>
    %65 = vector.extract_strided_slice %62 {offsets = [0, 0], sizes = [16, 16], strides = [1, 1]} : vector<16x32xf32> to vector<16x16xf32>
    %cst_40 = arith.constant dense<0.000000e+00> : vector<16x16xf32>
    %66 = tpu.matmul %64, %65, %cst_40 {dimension_numbers = #tpu.dot_dimension_numbers<[1], [1], [0], [0], [0, 0, 1, 0], [], []>} : vector<16x16xf32>, vector<16x16xf32>, vector<16x16xf32> -> vector<16x16xf32>
    %cst_41 = arith.constant 2.500000e-01 : f32
    %67 = vector.broadcast %cst_41 : f32 to vector<16x16xf32>
    %68 = arith.mulf %66, %67 : vector<16x16xf32>
    %69 = arith.addf %68, %29 : vector<16x16xf32>
    %cst_42 = arith.constant dense<0xFF800000> : vector<16xf32>
    %70 = vector.multi_reduction <maximumf>, %69, %cst_42 [1] : vector<16x16xf32> to vector<16xf32>
    %71 = vector.shape_cast %70 : vector<16xf32> to vector<16x1xf32>
    %72 = vector.broadcast %71 : vector<16x1xf32> to vector<16x16xf32>
    %73 = arith.subf %69, %72 : vector<16x16xf32>
    %74 = math.exp %73 : vector<16x16xf32>
    %cst_43 = arith.constant dense<0.000000e+00> : vector<16xf32>
    %75 = vector.multi_reduction <add>, %74, %cst_43 [1] : vector<16x16xf32> to vector<16xf32>
    %76 = vector.shape_cast %75 : vector<16xf32> to vector<16x1xf32>
    %77 = tpu.reciprocal %76 {approx = true} : vector<16x1xf32> -> vector<16x1xf32>
    %78 = vector.broadcast %77 : vector<16x1xf32> to vector<16x16xf32>
    %79 = arith.mulf %74, %78 : vector<16x16xf32>
    %80 = vector.extract_strided_slice %63 {offsets = [0, 0], sizes = [16, 16], strides = [1, 1]} : vector<16x32xf32> to vector<16x16xf32>
    %cst_44 = arith.constant dense<0.000000e+00> : vector<16x16xf32>
    %81 = tpu.matmul %79, %80, %cst_44 {dimension_numbers = #tpu.dot_dimension_numbers<[1], [0], [0], [1], [0, 0, 1, 1], [], []>} : vector<16x16xf32>, vector<16x16xf32>, vector<16x16xf32> -> vector<16x16xf32>
    %c0_45 = arith.constant 0 : index
    %c0_46 = arith.constant 0 : index
    %82 = vector.load %arg14[%c0_45, %c0_46] : memref<32x32xf32, #tpu.memory_space<vmem>>, vector<16x32xf32>
    %cst_47 = arith.constant dense<0.000000e+00> : vector<16x32xf32>
    %83 = tpu.matmul %81, %82, %cst_47 {dimension_numbers = #tpu.dot_dimension_numbers<[1], [0], [0], [1], [0, 0, 1, 1], [], []>} : vector<16x16xf32>, vector<16x32xf32>, vector<16x32xf32> -> vector<16x32xf32>
    %84 = vector.extract_strided_slice %61 {offsets = [0, 16], sizes = [16, 16], strides = [1, 1]} : vector<16x32xf32> to vector<16x16xf32>
    %85 = vector.extract_strided_slice %62 {offsets = [0, 16], sizes = [16, 16], strides = [1, 1]} : vector<16x32xf32> to vector<16x16xf32>
    %cst_48 = arith.constant dense<0.000000e+00> : vector<16x16xf32>
    %86 = tpu.matmul %84, %85, %cst_48 {dimension_numbers = #tpu.dot_dimension_numbers<[1], [1], [0], [0], [0, 0, 1, 0], [], []>} : vector<16x16xf32>, vector<16x16xf32>, vector<16x16xf32> -> vector<16x16xf32>
    %cst_49 = arith.constant 2.500000e-01 : f32
    %87 = vector.broadcast %cst_49 : f32 to vector<16x16xf32>
    %88 = arith.mulf %86, %87 : vector<16x16xf32>
    %89 = arith.addf %88, %29 : vector<16x16xf32>
    %cst_50 = arith.constant dense<0xFF800000> : vector<16xf32>
    %90 = vector.multi_reduction <maximumf>, %89, %cst_50 [1] : vector<16x16xf32> to vector<16xf32>
    %91 = vector.shape_cast %90 : vector<16xf32> to vector<16x1xf32>
    %92 = vector.broadcast %91 : vector<16x1xf32> to vector<16x16xf32>
    %93 = arith.subf %89, %92 : vector<16x16xf32>
    %94 = math.exp %93 : vector<16x16xf32>
    %cst_51 = arith.constant dense<0.000000e+00> : vector<16xf32>
    %95 = vector.multi_reduction <add>, %94, %cst_51 [1] : vector<16x16xf32> to vector<16xf32>
    %96 = vector.shape_cast %95 : vector<16xf32> to vector<16x1xf32>
    %97 = tpu.reciprocal %96 {approx = true} : vector<16x1xf32> -> vector<16x1xf32>
    %98 = vector.broadcast %97 : vector<16x1xf32> to vector<16x16xf32>
    %99 = arith.mulf %94, %98 : vector<16x16xf32>
    %100 = vector.extract_strided_slice %63 {offsets = [0, 16], sizes = [16, 16], strides = [1, 1]} : vector<16x32xf32> to vector<16x16xf32>
    %cst_52 = arith.constant dense<0.000000e+00> : vector<16x16xf32>
    %101 = tpu.matmul %99, %100, %cst_52 {dimension_numbers = #tpu.dot_dimension_numbers<[1], [0], [0], [1], [0, 0, 1, 1], [], []>} : vector<16x16xf32>, vector<16x16xf32>, vector<16x16xf32> -> vector<16x16xf32>
    %c16 = arith.constant 16 : index
    %c0_53 = arith.constant 0 : index
    %102 = vector.load %arg14[%c16, %c0_53] : memref<32x32xf32, #tpu.memory_space<vmem>>, vector<16x32xf32>
    %cst_54 = arith.constant dense<0.000000e+00> : vector<16x32xf32>
    %103 = tpu.matmul %101, %102, %cst_54 {dimension_numbers = #tpu.dot_dimension_numbers<[1], [0], [0], [1], [0, 0, 1, 1], [], []>} : vector<16x16xf32>, vector<16x32xf32>, vector<16x32xf32> -> vector<16x32xf32>
    %104 = arith.addf %83, %103 : vector<16x32xf32>
    %105 = arith.addf %19, %104 : vector<16x32xf32>
    %c0_55 = arith.constant 0 : index
    %c0_56 = arith.constant 0 : index
    %106 = vector.load %arg15[%c0_55, %c0_56] : memref<1x32xf32, #tpu.memory_space<vmem>>, vector<1x32xf32>
    %107 = vector.broadcast %106 : vector<1x32xf32> to vector<16x32xf32>
    %108 = arith.addf %105, %107 : vector<16x32xf32>
    %c0_57 = arith.constant 0 : index
    %c0_58 = arith.constant 0 : index
    %109 = vector.load %arg16[%c0_57, %c0_58] : memref<1x32xf32, #tpu.memory_space<vmem>>, vector<1x32xf32>
    %c0_59 = arith.constant 0 : index
    %c0_60 = arith.constant 0 : index
    %110 = vector.load %arg17[%c0_59, %c0_60] : memref<1x32xf32, #tpu.memory_space<vmem>>, vector<1x32xf32>
    %cst_61 = arith.constant dense<0.000000e+00> : vector<16xf32>
    %111 = vector.multi_reduction <add>, %108, %cst_61 [1] : vector<16x32xf32> to vector<16xf32>
    %112 = vector.shape_cast %111 : vector<16xf32> to vector<16x1xf32>
    %cst_62 = arith.constant 3.200000e+01 : f32
    %113 = vector.broadcast %cst_62 : f32 to vector<16x1xf32>
    %114 = arith.divf %112, %113 : vector<16x1xf32>
    %115 = vector.broadcast %114 : vector<16x1xf32> to vector<16x32xf32>
    %116 = arith.subf %108, %115 : vector<16x32xf32>
    %117 = arith.mulf %116, %116 : vector<16x32xf32>
    %cst_63 = arith.constant dense<0.000000e+00> : vector<16xf32>
    %118 = vector.multi_reduction <add>, %117, %cst_63 [1] : vector<16x32xf32> to vector<16xf32>
    %119 = vector.shape_cast %118 : vector<16xf32> to vector<16x1xf32>
    %cst_64 = arith.constant 3.200000e+01 : f32
    %120 = vector.broadcast %cst_64 : f32 to vector<16x1xf32>
    %121 = arith.divf %119, %120 : vector<16x1xf32>
    %122 = vector.broadcast %114 : vector<16x1xf32> to vector<16x32xf32>
    %123 = arith.subf %108, %122 : vector<16x32xf32>
    %cst_65 = arith.constant 9.99999974E-6 : f32
    %124 = vector.broadcast %cst_65 : f32 to vector<16x1xf32>
    %125 = arith.addf %121, %124 : vector<16x1xf32>
    %126 = math.rsqrt %125 : vector<16x1xf32>
    %127 = vector.broadcast %126 : vector<16x1xf32> to vector<16x32xf32>
    %128 = arith.mulf %123, %127 : vector<16x32xf32>
    %129 = vector.broadcast %109 : vector<1x32xf32> to vector<16x32xf32>
    %130 = arith.mulf %128, %129 : vector<16x32xf32>
    %131 = vector.broadcast %110 : vector<1x32xf32> to vector<16x32xf32>
    %132 = arith.addf %130, %131 : vector<16x32xf32>
    %c0_66 = arith.constant 0 : index
    %c0_67 = arith.constant 0 : index
    %133 = vector.load %arg18[%c0_66, %c0_67] : memref<32x32xf32, #tpu.memory_space<vmem>>, vector<32x32xf32>
    %cst_68 = arith.constant dense<0.000000e+00> : vector<16x32xf32>
    %134 = tpu.matmul %132, %133, %cst_68 {dimension_numbers = #tpu.dot_dimension_numbers<[1], [0], [0], [1], [0, 0, 1, 1], [], []>} : vector<16x32xf32>, vector<32x32xf32>, vector<16x32xf32> -> vector<16x32xf32>
    %c0_69 = arith.constant 0 : index
    %c0_70 = arith.constant 0 : index
    %135 = vector.load %arg19[%c0_69, %c0_70] : memref<1x32xf32, #tpu.memory_space<vmem>>, vector<1x32xf32>
    %136 = vector.broadcast %135 : vector<1x32xf32> to vector<16x32xf32>
    %137 = arith.addf %134, %136 : vector<16x32xf32>
    %c0_71 = arith.constant 0 : index
    %c0_72 = arith.constant 0 : index
    %138 = vector.load %arg20[%c0_71, %c0_72] : memref<32x64xf32, #tpu.memory_space<vmem>>, vector<32x64xf32>
    %cst_73 = arith.constant dense<0.000000e+00> : vector<8x64xf32>
    %139 = tpu.matmul %3, %138, %cst_73 {dimension_numbers = #tpu.dot_dimension_numbers<[1], [0], [0], [1], [0, 0, 1, 1], [], []>} : vector<8x32xf32>, vector<32x64xf32>, vector<8x64xf32> -> vector<8x64xf32>
    %c0_74 = arith.constant 0 : index
    %c0_75 = arith.constant 0 : index
    %140 = vector.load %arg21[%c0_74, %c0_75] : memref<1x64xf32, #tpu.memory_space<vmem>>, vector<1x64xf32>
    %141 = vector.broadcast %140 : vector<1x64xf32> to vector<8x64xf32>
    %142 = arith.addf %139, %141 : vector<8x64xf32>
    %143 = vector.extract_strided_slice %142 {offsets = [0, 0], sizes = [8, 32], strides = [1, 1]} : vector<8x64xf32> to vector<8x32xf32>
    %144 = vector.extract_strided_slice %142 {offsets = [0, 32], sizes = [8, 32], strides = [1, 1]} : vector<8x64xf32> to vector<8x32xf32>
    %145 = vector.extract_strided_slice %137 {offsets = [0, 0], sizes = [16, 16], strides = [1, 1]} : vector<16x32xf32> to vector<16x16xf32>
    %146 = vector.extract_strided_slice %143 {offsets = [0, 0], sizes = [8, 16], strides = [1, 1]} : vector<8x32xf32> to vector<8x16xf32>
    %cst_76 = arith.constant dense<0.000000e+00> : vector<16x8xf32>
    %147 = tpu.matmul %145, %146, %cst_76 {dimension_numbers = #tpu.dot_dimension_numbers<[1], [1], [0], [0], [0, 0, 1, 0], [], []>} : vector<16x16xf32>, vector<8x16xf32>, vector<16x8xf32> -> vector<16x8xf32>
    %cst_77 = arith.constant 2.500000e-01 : f32
    %148 = vector.broadcast %cst_77 : f32 to vector<16x8xf32>
    %149 = arith.mulf %147, %148 : vector<16x8xf32>
    %150 = vector.broadcast %31 : vector<1x8xf32> to vector<16x8xf32>
    %151 = arith.addf %149, %150 : vector<16x8xf32>
    %cst_78 = arith.constant dense<0xFF800000> : vector<16xf32>
    %152 = vector.multi_reduction <maximumf>, %151, %cst_78 [1] : vector<16x8xf32> to vector<16xf32>
    %153 = vector.shape_cast %152 : vector<16xf32> to vector<16x1xf32>
    %154 = vector.broadcast %153 : vector<16x1xf32> to vector<16x8xf32>
    %155 = arith.subf %151, %154 : vector<16x8xf32>
    %156 = math.exp %155 : vector<16x8xf32>
    %cst_79 = arith.constant dense<0.000000e+00> : vector<16xf32>
    %157 = vector.multi_reduction <add>, %156, %cst_79 [1] : vector<16x8xf32> to vector<16xf32>
    %158 = vector.shape_cast %157 : vector<16xf32> to vector<16x1xf32>
    %159 = vector.broadcast %158 : vector<16x1xf32> to vector<16x8xf32>
    %160 = arith.divf %156, %159 : vector<16x8xf32>
    %161 = vector.extract_strided_slice %144 {offsets = [0, 0], sizes = [8, 16], strides = [1, 1]} : vector<8x32xf32> to vector<8x16xf32>
    %cst_80 = arith.constant dense<0.000000e+00> : vector<16x16xf32>
    %162 = tpu.matmul %160, %161, %cst_80 {dimension_numbers = #tpu.dot_dimension_numbers<[1], [0], [0], [1], [0, 0, 1, 1], [], []>} : vector<16x8xf32>, vector<8x16xf32>, vector<16x16xf32> -> vector<16x16xf32>
    %c0_81 = arith.constant 0 : index
    %c0_82 = arith.constant 0 : index
    %163 = vector.load %arg22[%c0_81, %c0_82] : memref<32x32xf32, #tpu.memory_space<vmem>>, vector<16x32xf32>
    %cst_83 = arith.constant dense<0.000000e+00> : vector<16x32xf32>
    %164 = tpu.matmul %162, %163, %cst_83 {dimension_numbers = #tpu.dot_dimension_numbers<[1], [0], [0], [1], [0, 0, 1, 1], [], []>} : vector<16x16xf32>, vector<16x32xf32>, vector<16x32xf32> -> vector<16x32xf32>
    %165 = vector.extract_strided_slice %137 {offsets = [0, 16], sizes = [16, 16], strides = [1, 1]} : vector<16x32xf32> to vector<16x16xf32>
    %166 = vector.extract_strided_slice %143 {offsets = [0, 16], sizes = [8, 16], strides = [1, 1]} : vector<8x32xf32> to vector<8x16xf32>
    %cst_84 = arith.constant dense<0.000000e+00> : vector<16x8xf32>
    %167 = tpu.matmul %165, %166, %cst_84 {dimension_numbers = #tpu.dot_dimension_numbers<[1], [1], [0], [0], [0, 0, 1, 0], [], []>} : vector<16x16xf32>, vector<8x16xf32>, vector<16x8xf32> -> vector<16x8xf32>
    %cst_85 = arith.constant 2.500000e-01 : f32
    %168 = vector.broadcast %cst_85 : f32 to vector<16x8xf32>
    %169 = arith.mulf %167, %168 : vector<16x8xf32>
    %170 = vector.broadcast %31 : vector<1x8xf32> to vector<16x8xf32>
    %171 = arith.addf %169, %170 : vector<16x8xf32>
    %cst_86 = arith.constant dense<0xFF800000> : vector<16xf32>
    %172 = vector.multi_reduction <maximumf>, %171, %cst_86 [1] : vector<16x8xf32> to vector<16xf32>
    %173 = vector.shape_cast %172 : vector<16xf32> to vector<16x1xf32>
    %174 = vector.broadcast %173 : vector<16x1xf32> to vector<16x8xf32>
    %175 = arith.subf %171, %174 : vector<16x8xf32>
    %176 = math.exp %175 : vector<16x8xf32>
    %cst_87 = arith.constant dense<0.000000e+00> : vector<16xf32>
    %177 = vector.multi_reduction <add>, %176, %cst_87 [1] : vector<16x8xf32> to vector<16xf32>
    %178 = vector.shape_cast %177 : vector<16xf32> to vector<16x1xf32>
    %179 = vector.broadcast %178 : vector<16x1xf32> to vector<16x8xf32>
    %180 = arith.divf %176, %179 : vector<16x8xf32>
    %181 = vector.extract_strided_slice %144 {offsets = [0, 16], sizes = [8, 16], strides = [1, 1]} : vector<8x32xf32> to vector<8x16xf32>
    %cst_88 = arith.constant dense<0.000000e+00> : vector<16x16xf32>
    %182 = tpu.matmul %180, %181, %cst_88 {dimension_numbers = #tpu.dot_dimension_numbers<[1], [0], [0], [1], [0, 0, 1, 1], [], []>} : vector<16x8xf32>, vector<8x16xf32>, vector<16x16xf32> -> vector<16x16xf32>
    %c16_89 = arith.constant 16 : index
    %c0_90 = arith.constant 0 : index
    %183 = vector.load %arg22[%c16_89, %c0_90] : memref<32x32xf32, #tpu.memory_space<vmem>>, vector<16x32xf32>
    %cst_91 = arith.constant dense<0.000000e+00> : vector<16x32xf32>
    %184 = tpu.matmul %182, %183, %cst_91 {dimension_numbers = #tpu.dot_dimension_numbers<[1], [0], [0], [1], [0, 0, 1, 1], [], []>} : vector<16x16xf32>, vector<16x32xf32>, vector<16x32xf32> -> vector<16x32xf32>
    %185 = arith.addf %164, %184 : vector<16x32xf32>
    %186 = tpu.concatenate %160, %180 in 1 : vector<16x8xf32>, vector<16x8xf32> -> vector<16x16xf32>
    %187 = arith.addf %108, %185 : vector<16x32xf32>
    %c0_92 = arith.constant 0 : index
    %c0_93 = arith.constant 0 : index
    %188 = vector.load %arg23[%c0_92, %c0_93] : memref<1x32xf32, #tpu.memory_space<vmem>>, vector<1x32xf32>
    %189 = vector.broadcast %188 : vector<1x32xf32> to vector<16x32xf32>
    %190 = arith.addf %187, %189 : vector<16x32xf32>
    %c0_94 = arith.constant 0 : index
    %c0_95 = arith.constant 0 : index
    %c0_96 = arith.constant 0 : index
    %c0_97 = arith.constant 0 : index
    %191 = vector.load %arg42[%c0_94, %c0_95, %c0_96, %c0_97] : memref<1x1x16x16xf32, #tpu.memory_space<vmem>>, vector<1x1x16x16xf32>
    %192 = vector.shape_cast %191 : vector<1x1x16x16xf32> to vector<16x16xf32>
    %193 = vector.shape_cast %186 : vector<16x16xf32> to vector<1x1x16x16xf32>
    tpu.vector_store %arg42[%c0_94, %c0_95, %c0_96, %c0_97], %193 {strides = array<i32>} : memref<1x1x16x16xf32, #tpu.memory_space<vmem>>, vector<1x1x16x16xf32>,
    %c0_98 = arith.constant 0 : index
    %c0_99 = arith.constant 0 : index
    %194 = vector.load %arg24[%c0_98, %c0_99] : memref<1x32xf32, #tpu.memory_space<vmem>>, vector<1x32xf32>
    %c0_100 = arith.constant 0 : index
    %c0_101 = arith.constant 0 : index
    %195 = vector.load %arg25[%c0_100, %c0_101] : memref<1x32xf32, #tpu.memory_space<vmem>>, vector<1x32xf32>
    %cst_102 = arith.constant dense<0.000000e+00> : vector<16xf32>
    %196 = vector.multi_reduction <add>, %190, %cst_102 [1] : vector<16x32xf32> to vector<16xf32>
    %197 = vector.shape_cast %196 : vector<16xf32> to vector<16x1xf32>
    %cst_103 = arith.constant 3.200000e+01 : f32
    %198 = vector.broadcast %cst_103 : f32 to vector<16x1xf32>
    %199 = arith.divf %197, %198 : vector<16x1xf32>
    %200 = vector.broadcast %199 : vector<16x1xf32> to vector<16x32xf32>
    %201 = arith.subf %190, %200 : vector<16x32xf32>
    %202 = arith.mulf %201, %201 : vector<16x32xf32>
    %cst_104 = arith.constant dense<0.000000e+00> : vector<16xf32>
    %203 = vector.multi_reduction <add>, %202, %cst_104 [1] : vector<16x32xf32> to vector<16xf32>
    %204 = vector.shape_cast %203 : vector<16xf32> to vector<16x1xf32>
    %cst_105 = arith.constant 3.200000e+01 : f32
    %205 = vector.broadcast %cst_105 : f32 to vector<16x1xf32>
    %206 = arith.divf %204, %205 : vector<16x1xf32>
    %207 = vector.broadcast %199 : vector<16x1xf32> to vector<16x32xf32>
    %208 = arith.subf %190, %207 : vector<16x32xf32>
    %cst_106 = arith.constant 9.99999974E-6 : f32
    %209 = vector.broadcast %cst_106 : f32 to vector<16x1xf32>
    %210 = arith.addf %206, %209 : vector<16x1xf32>
    %211 = math.rsqrt %210 : vector<16x1xf32>
    %212 = vector.broadcast %211 : vector<16x1xf32> to vector<16x32xf32>
    %213 = arith.mulf %208, %212 : vector<16x32xf32>
    %214 = vector.broadcast %194 : vector<1x32xf32> to vector<16x32xf32>
    %215 = arith.mulf %213, %214 : vector<16x32xf32>
    %216 = vector.broadcast %195 : vector<1x32xf32> to vector<16x32xf32>
    %217 = arith.addf %215, %216 : vector<16x32xf32>
    %c0_107 = arith.constant 0 : index
    %c0_108 = arith.constant 0 : index
    %218 = vector.load %arg26[%c0_107, %c0_108] : memref<32x64xf32, #tpu.memory_space<vmem>>, vector<32x64xf32>
    %cst_109 = arith.constant dense<0.000000e+00> : vector<16x64xf32>
    %219 = tpu.matmul %217, %218, %cst_109 {dimension_numbers = #tpu.dot_dimension_numbers<[1], [0], [0], [1], [0, 0, 1, 1], [], []>} : vector<16x32xf32>, vector<32x64xf32>, vector<16x64xf32> -> vector<16x64xf32>
    %c0_110 = arith.constant 0 : index
    %c0_111 = arith.constant 0 : index
    %220 = vector.load %arg27[%c0_110, %c0_111] : memref<1x64xf32, #tpu.memory_space<vmem>>, vector<1x64xf32>
    %221 = vector.broadcast %220 : vector<1x64xf32> to vector<16x64xf32>
    %222 = arith.addf %219, %221 : vector<16x64xf32>
    %cst_112 = arith.constant 5.000000e-01 : f32
    %223 = vector.broadcast %cst_112 : f32 to vector<16x64xf32>
    %224 = arith.mulf %223, %222 : vector<16x64xf32>
    %cst_113 = arith.constant 4.471500e-02 : f32
    %225 = vector.broadcast %cst_113 : f32 to vector<16x64xf32>
    %226 = arith.mulf %225, %222 : vector<16x64xf32>
    %227 = arith.mulf %226, %222 : vector<16x64xf32>
    %228 = arith.mulf %227, %222 : vector<16x64xf32>
    %229 = arith.addf %222, %228 : vector<16x64xf32>
    %cst_114 = arith.constant 0.797884583 : f32
    %230 = vector.broadcast %cst_114 : f32 to vector<16x64xf32>
    %231 = arith.mulf %230, %229 : vector<16x64xf32>
    %232 = math.tanh %231 : vector<16x64xf32>
    %cst_115 = arith.constant 1.000000e+00 : f32
    %233 = vector.broadcast %cst_115 : f32 to vector<16x64xf32>
    %234 = arith.addf %233, %232 : vector<16x64xf32>
    %235 = arith.mulf %224, %234 : vector<16x64xf32>
    %c0_116 = arith.constant 0 : index
    %c0_117 = arith.constant 0 : index
    %236 = vector.load %arg28[%c0_116, %c0_117] : memref<64x32xf32, #tpu.memory_space<vmem>>, vector<64x32xf32>
    %cst_118 = arith.constant dense<0.000000e+00> : vector<16x32xf32>
    %237 = tpu.matmul %235, %236, %cst_118 {dimension_numbers = #tpu.dot_dimension_numbers<[1], [0], [0], [1], [0, 0, 1, 1], [], []>} : vector<16x64xf32>, vector<64x32xf32>, vector<16x32xf32> -> vector<16x32xf32>
    %238 = arith.addf %190, %237 : vector<16x32xf32>
    %c0_119 = arith.constant 0 : index
    %c0_120 = arith.constant 0 : index
    %239 = vector.load %arg29[%c0_119, %c0_120] : memref<1x32xf32, #tpu.memory_space<vmem>>, vector<1x32xf32>
    %240 = vector.broadcast %239 : vector<1x32xf32> to vector<16x32xf32>
    %241 = arith.addf %238, %240 : vector<16x32xf32>
    %c0_121 = arith.constant 0 : index
    %c0_122 = arith.constant 0 : index
    %242 = vector.load %arg30[%c0_121, %c0_122] : memref<32x17xf32, #tpu.memory_space<vmem>>, vector<32x17xf32>
    %cst_123 = arith.constant dense<0.000000e+00> : vector<16x17xf32>
    %243 = tpu.matmul %241, %242, %cst_123 {dimension_numbers = #tpu.dot_dimension_numbers<[1], [0], [0], [1], [0, 0, 1, 1], [], []>} : vector<16x32xf32>, vector<32x17xf32>, vector<16x17xf32> -> vector<16x17xf32>
    %c0_124 = arith.constant 0 : index
    %c0_125 = arith.constant 0 : index
    %244 = vector.load %arg31[%c0_124, %c0_125] : memref<1x17xf32, #tpu.memory_space<vmem>>, vector<1x17xf32>
    %245 = vector.broadcast %244 : vector<1x17xf32> to vector<16x17xf32>
    %246 = arith.addf %243, %245 : vector<16x17xf32>
    %247 = vector.extract_strided_slice %246 {offsets = [0, 0], sizes = [16, 16], strides = [1, 1]} : vector<16x17xf32> to vector<16x16xf32>
    %cst_126 = arith.constant 0.000000e+00 : f32
    %248 = vector.broadcast %cst_126 : f32 to vector<2x16xf32>
    %249 = tpu.concatenate %248, %247, %248 in 0 : vector<2x16xf32>, vector<16x16xf32>, vector<2x16xf32> -> vector<20x16xf32>
    %250 = vector.extract_strided_slice %249 {offsets = [0, 0], sizes = [16, 16], strides = [1, 1]} : vector<20x16xf32> to vector<16x16xf32>
    %c0_127 = arith.constant 0 : index
    %c0_128 = arith.constant 0 : index
    %c0_129 = arith.constant 0 : index
    %251 = vector.load %arg32[%c0_127, %c0_128, %c0_129] : memref<5x16x32xf32, #tpu.memory_space<vmem>>, vector<1x16x32xf32>
    %252 = vector.shape_cast %251 : vector<1x16x32xf32> to vector<16x32xf32>
    %cst_130 = arith.constant dense<0.000000e+00> : vector<16x32xf32>
    %253 = tpu.matmul %250, %252, %cst_130 {dimension_numbers = #tpu.dot_dimension_numbers<[1], [0], [0], [1], [0, 0, 1, 1], [], []>} : vector<16x16xf32>, vector<16x32xf32>, vector<16x32xf32> -> vector<16x32xf32>
    %254 = vector.extract_strided_slice %249 {offsets = [1, 0], sizes = [16, 16], strides = [1, 1]} : vector<20x16xf32> to vector<16x16xf32>
    %c1 = arith.constant 1 : index
    %c0_131 = arith.constant 0 : index
    %c0_132 = arith.constant 0 : index
    %255 = vector.load %arg32[%c1, %c0_131, %c0_132] : memref<5x16x32xf32, #tpu.memory_space<vmem>>, vector<1x16x32xf32>
    %256 = vector.shape_cast %255 : vector<1x16x32xf32> to vector<16x32xf32>
    %cst_133 = arith.constant dense<0.000000e+00> : vector<16x32xf32>
    %257 = tpu.matmul %254, %256, %cst_133 {dimension_numbers = #tpu.dot_dimension_numbers<[1], [0], [0], [1], [0, 0, 1, 1], [], []>} : vector<16x16xf32>, vector<16x32xf32>, vector<16x32xf32> -> vector<16x32xf32>
    %258 = arith.addf %253, %257 : vector<16x32xf32>
    %259 = vector.extract_strided_slice %249 {offsets = [2, 0], sizes = [16, 16], strides = [1, 1]} : vector<20x16xf32> to vector<16x16xf32>
    %c2 = arith.constant 2 : index
    %c0_134 = arith.constant 0 : index
    %c0_135 = arith.constant 0 : index
    %260 = vector.load %arg32[%c2, %c0_134, %c0_135] : memref<5x16x32xf32, #tpu.memory_space<vmem>>, vector<1x16x32xf32>
    %261 = vector.shape_cast %260 : vector<1x16x32xf32> to vector<16x32xf32>
    %cst_136 = arith.constant dense<0.000000e+00> : vector<16x32xf32>
    %262 = tpu.matmul %259, %261, %cst_136 {dimension_numbers = #tpu.dot_dimension_numbers<[1], [0], [0], [1], [0, 0, 1, 1], [], []>} : vector<16x16xf32>, vector<16x32xf32>, vector<16x32xf32> -> vector<16x32xf32>
    %263 = arith.addf %258, %262 : vector<16x32xf32>
    %264 = vector.extract_strided_slice %249 {offsets = [3, 0], sizes = [16, 16], strides = [1, 1]} : vector<20x16xf32> to vector<16x16xf32>
    %c3 = arith.constant 3 : index
    %c0_137 = arith.constant 0 : index
    %c0_138 = arith.constant 0 : index
    %265 = vector.load %arg32[%c3, %c0_137, %c0_138] : memref<5x16x32xf32, #tpu.memory_space<vmem>>, vector<1x16x32xf32>
    %266 = vector.shape_cast %265 : vector<1x16x32xf32> to vector<16x32xf32>
    %cst_139 = arith.constant dense<0.000000e+00> : vector<16x32xf32>
    %267 = tpu.matmul %264, %266, %cst_139 {dimension_numbers = #tpu.dot_dimension_numbers<[1], [0], [0], [1], [0, 0, 1, 1], [], []>} : vector<16x16xf32>, vector<16x32xf32>, vector<16x32xf32> -> vector<16x32xf32>
    %268 = arith.addf %263, %267 : vector<16x32xf32>
    %269 = vector.extract_strided_slice %249 {offsets = [4, 0], sizes = [16, 16], strides = [1, 1]} : vector<20x16xf32> to vector<16x16xf32>
    %c4 = arith.constant 4 : index
    %c0_140 = arith.constant 0 : index
    %c0_141 = arith.constant 0 : index
    %270 = vector.load %arg32[%c4, %c0_140, %c0_141] : memref<5x16x32xf32, #tpu.memory_space<vmem>>, vector<1x16x32xf32>
    %271 = vector.shape_cast %270 : vector<1x16x32xf32> to vector<16x32xf32>
    %cst_142 = arith.constant dense<0.000000e+00> : vector<16x32xf32>
    %272 = tpu.matmul %269, %271, %cst_142 {dimension_numbers = #tpu.dot_dimension_numbers<[1], [0], [0], [1], [0, 0, 1, 1], [], []>} : vector<16x16xf32>, vector<16x32xf32>, vector<16x32xf32> -> vector<16x32xf32>
    %273 = arith.addf %268, %272 : vector<16x32xf32>
    %c0_143 = arith.constant 0 : index
    %c0_144 = arith.constant 0 : index
    %274 = vector.load %arg33[%c0_143, %c0_144] : memref<1x32xf32, #tpu.memory_space<vmem>>, vector<1x32xf32>
    %275 = vector.broadcast %274 : vector<1x32xf32> to vector<16x32xf32>
    %276 = arith.mulf %273, %275 : vector<16x32xf32>
    %c0_145 = arith.constant 0 : index
    %c0_146 = arith.constant 0 : index
    %277 = vector.load %arg34[%c0_145, %c0_146] : memref<1x32xf32, #tpu.memory_space<vmem>>, vector<1x32xf32>
    %278 = vector.broadcast %277 : vector<1x32xf32> to vector<16x32xf32>
    %279 = arith.addf %276, %278 : vector<16x32xf32>
    %280 = math.tanh %279 : vector<16x32xf32>
    %cst_147 = arith.constant 0.000000e+00 : f32
    %281 = vector.broadcast %cst_147 : f32 to vector<2x32xf32>
    %282 = tpu.concatenate %281, %280, %281 in 0 : vector<2x32xf32>, vector<16x32xf32>, vector<2x32xf32> -> vector<20x32xf32>
    %283 = vector.extract_strided_slice %282 {offsets = [0, 0], sizes = [16, 32], strides = [1, 1]} : vector<20x32xf32> to vector<16x32xf32>
    %c0_148 = arith.constant 0 : index
    %c0_149 = arith.constant 0 : index
    %c0_150 = arith.constant 0 : index
    %284 = vector.load %arg35[%c0_148, %c0_149, %c0_150] : memref<5x32x32xf32, #tpu.memory_space<vmem>>, vector<1x32x32xf32>
    %285 = vector.shape_cast %284 : vector<1x32x32xf32> to vector<32x32xf32>
    %cst_151 = arith.constant dense<0.000000e+00> : vector<16x32xf32>
    %286 = tpu.matmul %283, %285, %cst_151 {dimension_numbers = #tpu.dot_dimension_numbers<[1], [0], [0], [1], [0, 0, 1, 1], [], []>} : vector<16x32xf32>, vector<32x32xf32>, vector<16x32xf32> -> vector<16x32xf32>
    %287 = vector.extract_strided_slice %282 {offsets = [1, 0], sizes = [16, 32], strides = [1, 1]} : vector<20x32xf32> to vector<16x32xf32>
    %c1_152 = arith.constant 1 : index
    %c0_153 = arith.constant 0 : index
    %c0_154 = arith.constant 0 : index
    %288 = vector.load %arg35[%c1_152, %c0_153, %c0_154] : memref<5x32x32xf32, #tpu.memory_space<vmem>>, vector<1x32x32xf32>
    %289 = vector.shape_cast %288 : vector<1x32x32xf32> to vector<32x32xf32>
    %cst_155 = arith.constant dense<0.000000e+00> : vector<16x32xf32>
    %290 = tpu.matmul %287, %289, %cst_155 {dimension_numbers = #tpu.dot_dimension_numbers<[1], [0], [0], [1], [0, 0, 1, 1], [], []>} : vector<16x32xf32>, vector<32x32xf32>, vector<16x32xf32> -> vector<16x32xf32>
    %291 = arith.addf %286, %290 : vector<16x32xf32>
    %292 = vector.extract_strided_slice %282 {offsets = [2, 0], sizes = [16, 32], strides = [1, 1]} : vector<20x32xf32> to vector<16x32xf32>
    %c2_156 = arith.constant 2 : index
    %c0_157 = arith.constant 0 : index
    %c0_158 = arith.constant 0 : index
    %293 = vector.load %arg35[%c2_156, %c0_157, %c0_158] : memref<5x32x32xf32, #tpu.memory_space<vmem>>, vector<1x32x32xf32>
    %294 = vector.shape_cast %293 : vector<1x32x32xf32> to vector<32x32xf32>
    %cst_159 = arith.constant dense<0.000000e+00> : vector<16x32xf32>
    %295 = tpu.matmul %292, %294, %cst_159 {dimension_numbers = #tpu.dot_dimension_numbers<[1], [0], [0], [1], [0, 0, 1, 1], [], []>} : vector<16x32xf32>, vector<32x32xf32>, vector<16x32xf32> -> vector<16x32xf32>
    %296 = arith.addf %291, %295 : vector<16x32xf32>
    %297 = vector.extract_strided_slice %282 {offsets = [3, 0], sizes = [16, 32], strides = [1, 1]} : vector<20x32xf32> to vector<16x32xf32>
    %c3_160 = arith.constant 3 : index
    %c0_161 = arith.constant 0 : index
    %c0_162 = arith.constant 0 : index
    %298 = vector.load %arg35[%c3_160, %c0_161, %c0_162] : memref<5x32x32xf32, #tpu.memory_space<vmem>>, vector<1x32x32xf32>
    %299 = vector.shape_cast %298 : vector<1x32x32xf32> to vector<32x32xf32>
    %cst_163 = arith.constant dense<0.000000e+00> : vector<16x32xf32>
    %300 = tpu.matmul %297, %299, %cst_163 {dimension_numbers = #tpu.dot_dimension_numbers<[1], [0], [0], [1], [0, 0, 1, 1], [], []>} : vector<16x32xf32>, vector<32x32xf32>, vector<16x32xf32> -> vector<16x32xf32>
    %301 = arith.addf %296, %300 : vector<16x32xf32>
    %302 = vector.extract_strided_slice %282 {offsets = [4, 0], sizes = [16, 32], strides = [1, 1]} : vector<20x32xf32> to vector<16x32xf32>
    %c4_164 = arith.constant 4 : index
    %c0_165 = arith.constant 0 : index
    %c0_166 = arith.constant 0 : index
    %303 = vector.load %arg35[%c4_164, %c0_165, %c0_166] : memref<5x32x32xf32, #tpu.memory_space<vmem>>, vector<1x32x32xf32>
    %304 = vector.shape_cast %303 : vector<1x32x32xf32> to vector<32x32xf32>
    %cst_167 = arith.constant dense<0.000000e+00> : vector<16x32xf32>
    %305 = tpu.matmul %302, %304, %cst_167 {dimension_numbers = #tpu.dot_dimension_numbers<[1], [0], [0], [1], [0, 0, 1, 1], [], []>} : vector<16x32xf32>, vector<32x32xf32>, vector<16x32xf32> -> vector<16x32xf32>
    %306 = arith.addf %301, %305 : vector<16x32xf32>
    %c0_168 = arith.constant 0 : index
    %c0_169 = arith.constant 0 : index
    %307 = vector.load %arg36[%c0_168, %c0_169] : memref<1x32xf32, #tpu.memory_space<vmem>>, vector<1x32xf32>
    %308 = vector.broadcast %307 : vector<1x32xf32> to vector<16x32xf32>
    %309 = arith.mulf %306, %308 : vector<16x32xf32>
    %c0_170 = arith.constant 0 : index
    %c0_171 = arith.constant 0 : index
    %310 = vector.load %arg37[%c0_170, %c0_171] : memref<1x32xf32, #tpu.memory_space<vmem>>, vector<1x32xf32>
    %311 = vector.broadcast %310 : vector<1x32xf32> to vector<16x32xf32>
    %312 = arith.addf %309, %311 : vector<16x32xf32>
    %313 = math.tanh %312 : vector<16x32xf32>
    %cst_172 = arith.constant 0.000000e+00 : f32
    %314 = vector.broadcast %cst_172 : f32 to vector<2x32xf32>
    %315 = tpu.concatenate %314, %313, %314 in 0 : vector<2x32xf32>, vector<16x32xf32>, vector<2x32xf32> -> vector<20x32xf32>
    %316 = vector.extract_strided_slice %315 {offsets = [0, 0], sizes = [16, 32], strides = [1, 1]} : vector<20x32xf32> to vector<16x32xf32>
    %c0_173 = arith.constant 0 : index
    %c0_174 = arith.constant 0 : index
    %c0_175 = arith.constant 0 : index
    %317 = vector.load %arg38[%c0_173, %c0_174, %c0_175] : memref<5x32x16xf32, #tpu.memory_space<vmem>>, vector<1x32x16xf32>
    %318 = vector.shape_cast %317 : vector<1x32x16xf32> to vector<32x16xf32>
    %cst_176 = arith.constant dense<0.000000e+00> : vector<16x16xf32>
    %319 = tpu.matmul %316, %318, %cst_176 {dimension_numbers = #tpu.dot_dimension_numbers<[1], [0], [0], [1], [0, 0, 1, 1], [], []>} : vector<16x32xf32>, vector<32x16xf32>, vector<16x16xf32> -> vector<16x16xf32>
    %320 = vector.extract_strided_slice %315 {offsets = [1, 0], sizes = [16, 32], strides = [1, 1]} : vector<20x32xf32> to vector<16x32xf32>
    %c1_177 = arith.constant 1 : index
    %c0_178 = arith.constant 0 : index
    %c0_179 = arith.constant 0 : index
    %321 = vector.load %arg38[%c1_177, %c0_178, %c0_179] : memref<5x32x16xf32, #tpu.memory_space<vmem>>, vector<1x32x16xf32>
    %322 = vector.shape_cast %321 : vector<1x32x16xf32> to vector<32x16xf32>
    %cst_180 = arith.constant dense<0.000000e+00> : vector<16x16xf32>
    %323 = tpu.matmul %320, %322, %cst_180 {dimension_numbers = #tpu.dot_dimension_numbers<[1], [0], [0], [1], [0, 0, 1, 1], [], []>} : vector<16x32xf32>, vector<32x16xf32>, vector<16x16xf32> -> vector<16x16xf32>
    %324 = arith.addf %319, %323 : vector<16x16xf32>
    %325 = vector.extract_strided_slice %315 {offsets = [2, 0], sizes = [16, 32], strides = [1, 1]} : vector<20x32xf32> to vector<16x32xf32>
    %c2_181 = arith.constant 2 : index
    %c0_182 = arith.constant 0 : index
    %c0_183 = arith.constant 0 : index
    %326 = vector.load %arg38[%c2_181, %c0_182, %c0_183] : memref<5x32x16xf32, #tpu.memory_space<vmem>>, vector<1x32x16xf32>
    %327 = vector.shape_cast %326 : vector<1x32x16xf32> to vector<32x16xf32>
    %cst_184 = arith.constant dense<0.000000e+00> : vector<16x16xf32>
    %328 = tpu.matmul %325, %327, %cst_184 {dimension_numbers = #tpu.dot_dimension_numbers<[1], [0], [0], [1], [0, 0, 1, 1], [], []>} : vector<16x32xf32>, vector<32x16xf32>, vector<16x16xf32> -> vector<16x16xf32>
    %329 = arith.addf %324, %328 : vector<16x16xf32>
    %330 = vector.extract_strided_slice %315 {offsets = [3, 0], sizes = [16, 32], strides = [1, 1]} : vector<20x32xf32> to vector<16x32xf32>
    %c3_185 = arith.constant 3 : index
    %c0_186 = arith.constant 0 : index
    %c0_187 = arith.constant 0 : index
    %331 = vector.load %arg38[%c3_185, %c0_186, %c0_187] : memref<5x32x16xf32, #tpu.memory_space<vmem>>, vector<1x32x16xf32>
    %332 = vector.shape_cast %331 : vector<1x32x16xf32> to vector<32x16xf32>
    %cst_188 = arith.constant dense<0.000000e+00> : vector<16x16xf32>
    %333 = tpu.matmul %330, %332, %cst_188 {dimension_numbers = #tpu.dot_dimension_numbers<[1], [0], [0], [1], [0, 0, 1, 1], [], []>} : vector<16x32xf32>, vector<32x16xf32>, vector<16x16xf32> -> vector<16x16xf32>
    %334 = arith.addf %329, %333 : vector<16x16xf32>
    %335 = vector.extract_strided_slice %315 {offsets = [4, 0], sizes = [16, 32], strides = [1, 1]} : vector<20x32xf32> to vector<16x32xf32>
    %c4_189 = arith.constant 4 : index
    %c0_190 = arith.constant 0 : index
    %c0_191 = arith.constant 0 : index
    %336 = vector.load %arg38[%c4_189, %c0_190, %c0_191] : memref<5x32x16xf32, #tpu.memory_space<vmem>>, vector<1x32x16xf32>
    %337 = vector.shape_cast %336 : vector<1x32x16xf32> to vector<32x16xf32>
    %cst_192 = arith.constant dense<0.000000e+00> : vector<16x16xf32>
    %338 = tpu.matmul %335, %337, %cst_192 {dimension_numbers = #tpu.dot_dimension_numbers<[1], [0], [0], [1], [0, 0, 1, 1], [], []>} : vector<16x32xf32>, vector<32x16xf32>, vector<16x16xf32> -> vector<16x16xf32>
    %339 = arith.addf %334, %338 : vector<16x16xf32>
    %c0_193 = arith.constant 0 : index
    %c0_194 = arith.constant 0 : index
    %340 = vector.load %arg39[%c0_193, %c0_194] : memref<1x16xf32, #tpu.memory_space<vmem>>, vector<1x16xf32>
    %341 = vector.broadcast %340 : vector<1x16xf32> to vector<16x16xf32>
    %342 = arith.mulf %339, %341 : vector<16x16xf32>
    %c0_195 = arith.constant 0 : index
    %c0_196 = arith.constant 0 : index
    %343 = vector.load %arg40[%c0_195, %c0_196] : memref<1x16xf32, #tpu.memory_space<vmem>>, vector<1x16xf32>
    %344 = vector.broadcast %343 : vector<1x16xf32> to vector<16x16xf32>
    %345 = arith.addf %342, %344 : vector<16x16xf32>
    %346 = arith.addf %247, %345 : vector<16x16xf32>
    %347 = tpu.concatenate %246, %346 in 1 : vector<16x17xf32>, vector<16x16xf32> -> vector<16x33xf32>
    %c0_197 = arith.constant 0 : index
    %c0_198 = arith.constant 0 : index
    %c0_199 = arith.constant 0 : index
    %348 = vector.load %arg41[%c0_197, %c0_198, %c0_199] : memref<1x16x33xf32, #tpu.memory_space<vmem>>, vector<1x16x33xf32>
    %349 = vector.shape_cast %348 : vector<1x16x33xf32> to vector<16x33xf32>
    %350 = vector.shape_cast %347 : vector<16x33xf32> to vector<1x16x33xf32>
    tpu.vector_store %arg41[%c0_197, %c0_198, %c0_199], %350 {strides = array<i32>} : memref<1x16x33xf32, #tpu.memory_space<vmem>>, vector<1x16x33xf32>,
    return
  }
  func.func @transform_0(%arg0: i32) -> (i32, i32, i32) {
    %c0_i32 = arith.constant 0 : i32
    %c0_i32_0 = arith.constant 0 : i32
    %c0_i32_1 = arith.constant 0 : i32
    return %arg0, %c0_i32, %c0_i32_0 : i32, i32, i32
  }
  func.func @transform_1(%arg0: i32) -> (i32, i32, i32) {
    %c0_i32 = arith.constant 0 : i32
    %c0_i32_0 = arith.constant 0 : i32
    %c0_i32_1 = arith.constant 0 : i32
    return %arg0, %c0_i32, %c0_i32_0 : i32, i32, i32
  }
  func.func @transform_2(%arg0: i32) -> (i32, i32, i32) {
    %c0_i32 = arith.constant 0 : i32
    %c0_i32_0 = arith.constant 0 : i32
    %c0_i32_1 = arith.constant 0 : i32
    return %arg0, %c0_i32, %c0_i32_0 : i32, i32, i32
  }
  func.func @transform_3(%arg0: i32) -> (i32, i32, i32) {
    %c0_i32 = arith.constant 0 : i32
    %c0_i32_0 = arith.constant 0 : i32
    %c0_i32_1 = arith.constant 0 : i32
    return %arg0, %c0_i32, %c0_i32_0 : i32, i32, i32
  }
  func.func @transform_4(%arg0: i32) -> (i32, i32) {
    %c0_i32 = arith.constant 0 : i32
    %c0_i32_0 = arith.constant 0 : i32
    %c0_i32_1 = arith.constant 0 : i32
    return %c0_i32, %c0_i32_0 : i32, i32
  }
  func.func @transform_5(%arg0: i32) -> (i32, i32) {
    %c0_i32 = arith.constant 0 : i32
    %c0_i32_0 = arith.constant 0 : i32
    %c0_i32_1 = arith.constant 0 : i32
    return %c0_i32, %c0_i32_0 : i32, i32
  }
  func.func @transform_6(%arg0: i32) -> (i32, i32) {
    %c0_i32 = arith.constant 0 : i32
    %c0_i32_0 = arith.constant 0 : i32
    %c0_i32_1 = arith.constant 0 : i32
    return %c0_i32, %c0_i32_0 : i32, i32
  }
  func.func @transform_7(%arg0: i32) -> (i32, i32) {
    %c0_i32 = arith.constant 0 : i32
    %c0_i32_0 = arith.constant 0 : i32
    %c0_i32_1 = arith.constant 0 : i32
    return %c0_i32, %c0_i32_0 : i32, i32
  }
  func.func @transform_8(%arg0: i32) -> (i32, i32) {
    %c0_i32 = arith.constant 0 : i32
    %c0_i32_0 = arith.constant 0 : i32
    %c0_i32_1 = arith.constant 0 : i32
    return %c0_i32, %c0_i32_0 : i32, i32
  }
  func.func @transform_9(%arg0: i32) -> (i32, i32) {
    %c0_i32 = arith.constant 0 : i32
    %c0_i32_0 = arith.constant 0 : i32
    %c0_i32_1 = arith.constant 0 : i32
    return %c0_i32, %c0_i32_0 : i32, i32
  }
  func.func @transform_10(%arg0: i32) -> (i32, i32) {
    %c0_i32 = arith.constant 0 : i32
    %c0_i32_0 = arith.constant 0 : i32
    %c0_i32_1 = arith.constant 0 : i32
    return %c0_i32, %c0_i32_0 : i32, i32
  }
  func.func @transform_11(%arg0: i32) -> (i32, i32) {
    %c0_i32 = arith.constant 0 : i32
    %c0_i32_0 = arith.constant 0 : i32
    %c0_i32_1 = arith.constant 0 : i32
    return %c0_i32, %c0_i32_0 : i32, i32
  }
  func.func @transform_12(%arg0: i32) -> (i32, i32) {
    %c0_i32 = arith.constant 0 : i32
    %c0_i32_0 = arith.constant 0 : i32
    %c0_i32_1 = arith.constant 0 : i32
    return %c0_i32, %c0_i32_0 : i32, i32
  }
  func.func @transform_13(%arg0: i32) -> (i32, i32) {
    %c0_i32 = arith.constant 0 : i32
    %c0_i32_0 = arith.constant 0 : i32
    %c0_i32_1 = arith.constant 0 : i32
    return %c0_i32, %c0_i32_0 : i32, i32
  }
  func.func @transform_14(%arg0: i32) -> (i32, i32) {
    %c0_i32 = arith.constant 0 : i32
    %c0_i32_0 = arith.constant 0 : i32
    %c0_i32_1 = arith.constant 0 : i32
    return %c0_i32, %c0_i32_0 : i32, i32
  }
  func.func @transform_15(%arg0: i32) -> (i32, i32) {
    %c0_i32 = arith.constant 0 : i32
    %c0_i32_0 = arith.constant 0 : i32
    %c0_i32_1 = arith.constant 0 : i32
    return %c0_i32, %c0_i32_0 : i32, i32
  }
  func.func @transform_16(%arg0: i32) -> (i32, i32) {
    %c0_i32 = arith.constant 0 : i32
    %c0_i32_0 = arith.constant 0 : i32
    %c0_i32_1 = arith.constant 0 : i32
    return %c0_i32, %c0_i32_0 : i32, i32
  }
  func.func @transform_17(%arg0: i32) -> (i32, i32) {
    %c0_i32 = arith.constant 0 : i32
    %c0_i32_0 = arith.constant 0 : i32
    %c0_i32_1 = arith.constant 0 : i32
    return %c0_i32, %c0_i32_0 : i32, i32
  }
  func.func @transform_18(%arg0: i32) -> (i32, i32) {
    %c0_i32 = arith.constant 0 : i32
    %c0_i32_0 = arith.constant 0 : i32
    %c0_i32_1 = arith.constant 0 : i32
    return %c0_i32, %c0_i32_0 : i32, i32
  }
  func.func @transform_19(%arg0: i32) -> (i32, i32) {
    %c0_i32 = arith.constant 0 : i32
    %c0_i32_0 = arith.constant 0 : i32
    %c0_i32_1 = arith.constant 0 : i32
    return %c0_i32, %c0_i32_0 : i32, i32
  }
  func.func @transform_20(%arg0: i32) -> (i32, i32) {
    %c0_i32 = arith.constant 0 : i32
    %c0_i32_0 = arith.constant 0 : i32
    %c0_i32_1 = arith.constant 0 : i32
    return %c0_i32, %c0_i32_0 : i32, i32
  }
  func.func @transform_21(%arg0: i32) -> (i32, i32) {
    %c0_i32 = arith.constant 0 : i32
    %c0_i32_0 = arith.constant 0 : i32
    %c0_i32_1 = arith.constant 0 : i32
    return %c0_i32, %c0_i32_0 : i32, i32
  }
  func.func @transform_22(%arg0: i32) -> (i32, i32) {
    %c0_i32 = arith.constant 0 : i32
    %c0_i32_0 = arith.constant 0 : i32
    %c0_i32_1 = arith.constant 0 : i32
    return %c0_i32, %c0_i32_0 : i32, i32
  }
  func.func @transform_23(%arg0: i32) -> (i32, i32) {
    %c0_i32 = arith.constant 0 : i32
    %c0_i32_0 = arith.constant 0 : i32
    %c0_i32_1 = arith.constant 0 : i32
    return %c0_i32, %c0_i32_0 : i32, i32
  }
  func.func @transform_24(%arg0: i32) -> (i32, i32) {
    %c0_i32 = arith.constant 0 : i32
    %c0_i32_0 = arith.constant 0 : i32
    %c0_i32_1 = arith.constant 0 : i32
    return %c0_i32, %c0_i32_0 : i32, i32
  }
  func.func @transform_25(%arg0: i32) -> (i32, i32) {
    %c0_i32 = arith.constant 0 : i32
    %c0_i32_0 = arith.constant 0 : i32
    %c0_i32_1 = arith.constant 0 : i32
    return %c0_i32, %c0_i32_0 : i32, i32
  }
  func.func @transform_26(%arg0: i32) -> (i32, i32) {
    %c0_i32 = arith.constant 0 : i32
    %c0_i32_0 = arith.constant 0 : i32
    %c0_i32_1 = arith.constant 0 : i32
    return %c0_i32, %c0_i32_0 : i32, i32
  }
  func.func @transform_27(%arg0: i32) -> (i32, i32) {
    %c0_i32 = arith.constant 0 : i32
    %c0_i32_0 = arith.constant 0 : i32
    %c0_i32_1 = arith.constant 0 : i32
    return %c0_i32, %c0_i32_0 : i32, i32
  }
  func.func @transform_28(%arg0: i32) -> (i32, i32) {
    %c0_i32 = arith.constant 0 : i32
    %c0_i32_0 = arith.constant 0 : i32
    %c0_i32_1 = arith.constant 0 : i32
    return %c0_i32, %c0_i32_0 : i32, i32
  }
  func.func @transform_29(%arg0: i32) -> (i32, i32) {
    %c0_i32 = arith.constant 0 : i32
    %c0_i32_0 = arith.constant 0 : i32
    %c0_i32_1 = arith.constant 0 : i32
    return %c0_i32, %c0_i32_0 : i32, i32
  }
  func.func @transform_30(%arg0: i32) -> (i32, i32) {
    %c0_i32 = arith.constant 0 : i32
    %c0_i32_0 = arith.constant 0 : i32
    %c0_i32_1 = arith.constant 0 : i32
    return %c0_i32, %c0_i32_0 : i32, i32
  }
  func.func @transform_31(%arg0: i32) -> (i32, i32, i32) {
    %c0_i32 = arith.constant 0 : i32
    %c0_i32_0 = arith.constant 0 : i32
    %c0_i32_1 = arith.constant 0 : i32
    %c0_i32_2 = arith.constant 0 : i32
    return %c0_i32, %c0_i32_0, %c0_i32_1 : i32, i32, i32
  }
  func.func @transform_32(%arg0: i32) -> (i32, i32) {
    %c0_i32 = arith.constant 0 : i32
    %c0_i32_0 = arith.constant 0 : i32
    %c0_i32_1 = arith.constant 0 : i32
    return %c0_i32, %c0_i32_0 : i32, i32
  }
  func.func @transform_33(%arg0: i32) -> (i32, i32) {
    %c0_i32 = arith.constant 0 : i32
    %c0_i32_0 = arith.constant 0 : i32
    %c0_i32_1 = arith.constant 0 : i32
    return %c0_i32, %c0_i32_0 : i32, i32
  }
  func.func @transform_34(%arg0: i32) -> (i32, i32, i32) {
    %c0_i32 = arith.constant 0 : i32
    %c0_i32_0 = arith.constant 0 : i32
    %c0_i32_1 = arith.constant 0 : i32
    %c0_i32_2 = arith.constant 0 : i32
    return %c0_i32, %c0_i32_0, %c0_i32_1 : i32, i32, i32
  }
  func.func @transform_35(%arg0: i32) -> (i32, i32) {
    %c0_i32 = arith.constant 0 : i32
    %c0_i32_0 = arith.constant 0 : i32
    %c0_i32_1 = arith.constant 0 : i32
    return %c0_i32, %c0_i32_0 : i32, i32
  }
  func.func @transform_36(%arg0: i32) -> (i32, i32) {
    %c0_i32 = arith.constant 0 : i32
    %c0_i32_0 = arith.constant 0 : i32
    %c0_i32_1 = arith.constant 0 : i32
    return %c0_i32, %c0_i32_0 : i32, i32
  }
  func.func @transform_37(%arg0: i32) -> (i32, i32, i32) {
    %c0_i32 = arith.constant 0 : i32
    %c0_i32_0 = arith.constant 0 : i32
    %c0_i32_1 = arith.constant 0 : i32
    %c0_i32_2 = arith.constant 0 : i32
    return %c0_i32, %c0_i32_0, %c0_i32_1 : i32, i32, i32
  }
  func.func @transform_38(%arg0: i32) -> (i32, i32) {
    %c0_i32 = arith.constant 0 : i32
    %c0_i32_0 = arith.constant 0 : i32
    %c0_i32_1 = arith.constant 0 : i32
    return %c0_i32, %c0_i32_0 : i32, i32
  }
  func.func @transform_39(%arg0: i32) -> (i32, i32) {
    %c0_i32 = arith.constant 0 : i32
    %c0_i32_0 = arith.constant 0 : i32
    %c0_i32_1 = arith.constant 0 : i32
    return %c0_i32, %c0_i32_0 : i32, i32
  }
  func.func @transform_40(%arg0: i32) -> (i32, i32, i32) {
    %c0_i32 = arith.constant 0 : i32
    %c0_i32_0 = arith.constant 0 : i32
    %c0_i32_1 = arith.constant 0 : i32
    return %arg0, %c0_i32, %c0_i32_0 : i32, i32, i32
  }
  func.func @transform_41(%arg0: i32) -> (i32, i32, i32, i32) {
    %c0_i32 = arith.constant 0 : i32
    %c0_i32_0 = arith.constant 0 : i32
    %c0_i32_1 = arith.constant 0 : i32
    %c0_i32_2 = arith.constant 0 : i32
    return %arg0, %c0_i32, %c0_i32_0, %c0_i32_1 : i32, i32, i32, i32
  }
}

</mosaic_0001>

<bundles_post_ra>
// kernel: reformer_tts_forward.2
= control target key start
LH: loop header
LB: loop body
LE: loop exit
PB: predicated region body
PF: predicated region fallthrough
CT: control target
= control target key end

     0   :  { %s3744_s0 = inlined_call_operand.vmem [shape: s32[2,8,1], index: 0, kind: input, shape index: {}]   ;;  %s3745_s1 = inlined_call_operand.vmem [shape: f32[2,1,8], index: 1, kind: input, shape index: {}]   ;;  %s3746_s2 = inlined_call_operand.vmem [shape: f32[8,32], index: 2, kind: input, shape index: {}]   ;;  %s3747_s3 = inlined_call_operand.vmem [shape: f32[11,32], index: 3, kind: input, shape index: {}]   ;;  %s3748_s4 = inlined_call_operand.vmem [shape: f32[5,32,32], index: 4, kind: input, shape index: {}]   ;;  %s3749_s5 = inlined_call_operand.vmem [shape: f32[1,32], index: 5, kind: input, shape index: {}]   ;;  %s3750_s6 = inlined_call_operand.vmem [shape: f32[1,32], index: 6, kind: input, shape index: {}]   ;;  %s3751_s7 = inlined_call_operand.vmem [shape: f32[5,32,32], index: 7, kind: input, shape index: {}]   ;;  %s3752_s8 = inlined_call_operand.vmem [shape: f32[1,32], index: 8, kind: input, shape index: {}]   ;;  %s3753_s9 = inlined_call_operand.vmem [shape: f32[1,32], index: 9, kind: input, shape index: {}]   ;;  %s3754_s10 = inlined_call_operand.vmem [shape: f32[32,32], index: 10, kind: input, shape index: {}]   ;;  %s3755_s11 = inlined_call_operand.vmem [shape: f32[1,32], index: 11, kind: input, shape index: {}]   ;;  %s3756_s12 = inlined_call_operand.vmem [shape: f32[1,32], index: 12, kind: input, shape index: {}]   ;;  %s3757_s13 = inlined_call_operand.vmem [shape: f32[1,32], index: 13, kind: input, shape index: {}]   ;;  %s3758_s14 = inlined_call_operand.vmem [shape: f32[32,96], index: 14, kind: input, shape index: {}]   ;;  %s3759_s15 = inlined_call_operand.vmem [shape: f32[1,96], index: 15, kind: input, shape index: {}]   ;;  %s3760_s16 = inlined_call_operand.vmem [shape: f32[32,32], index: 16, kind: input, shape index: {}]   ;;  %s3761_s17 = inlined_call_operand.vmem [shape: f32[1,32], index: 17, kind: input, shape index: {}]   ;;  %s3762_s18 = inlined_call_operand.vmem [shape: f32[1,32], index: 18, kind: input, shape index: {}]   ;;  %s3763_s19 = inlined_call_operand.vmem [shape: f32[1,32], index: 19, kind: input, shape index: {}]   ;;  %s3764_s20 = inlined_call_operand.vmem [shape: f32[32,64], index: 20, kind: input, shape index: {}]   ;;  %s3765_s21 = inlined_call_operand.vmem [shape: f32[1,64], index: 21, kind: input, shape index: {}]   ;;  %s3766_s22 = inlined_call_operand.vmem [shape: f32[64,32], index: 22, kind: input, shape index: {}]   ;;  %s3767_s23 = inlined_call_operand.vmem [shape: f32[1,32], index: 23, kind: input, shape index: {}]   ;;  %s3768_s24 = inlined_call_operand.vmem [shape: f32[2,8,32], index: 24, kind: output, shape index: {}]  }
   0x1   :  { %3773 = sst [smem:[#allocation2_spill]] %s3744_s0 }
   0x2   :  { %3774 = sst [smem:[#allocation3_spill]] %s3745_s1 }
   0x3   :  { %3775 = sst [smem:[#allocation4_spill]] %s3746_s2 }
   0x4   :  { %3776 = sst [smem:[#allocation5_spill]] %s3747_s3 }
   0x5   :  { %3777 = sst [smem:[#allocation6_spill]] %s3748_s4 }
   0x6   :  { %3778 = sst [smem:[#allocation7_spill]] %s3749_s5  ;;  %s3331_s5 = smov 0  }
   0x7   :  { %3779 = sst [smem:[#allocation8_spill]] %s3750_s6 }
   0x8   :  { %3780 = sst [smem:[#allocation9_spill]] %s3751_s7 }
   0x9   :  { %3781 = sst [smem:[#allocation10_spill]] %s3752_s8 }
   0xa LB: > { %s2665_s26 = sadd.s32 4294967295, %s3194_s5   ;;  %p2669_p0 = scmp.ge.s32.totalorder %s3194_s5, 1  ;;  %s3194_s5 = sphi %s3331_s5, %s34_s5  }
   0xb   : > { %p669_p1 = scmp.lt.s32.totalorder %s3194_s5, 3 }
   0xd   : > { %p670_p2 = pnand %p2669_p0, %p669_p1 }
   0xe   : > { %p736_p3 = scmp.lt.s32.totalorder (!%p670_p2), %s2665_s26, 1  ;;  %s3782_s6 = sld [smem:[#allocation5_spill]] (!%p670_p2)  ;;  %v3196_v2 = vmov (!%p670_p2), 0   ;;  %v3197_v3 = vmov (!%p670_p2), 0.0|0.0   ;;  %vm762_vm0 = vcmask (!%p670_p2), 1042432   ;;  %vm3198_vm1 = vmmov (!%p670_p2), 1  }
   0xf   : > { %673 = sbr.rel (%p670_p2) target bundleno = 3475 (0xd93), region = 116  ;;  %3173 = vset.pattern.permute.xlu0 (!%p670_p2), %v3196_v2  ;;  %3039 = vmatprep.subr.bf16.mxu1 (!%p670_p2), %v3197_v3  ;;  %vm3041_vm2 = vmpackc.low (!%p670_p2), %vm762_vm0, %vm3198_vm1  ;;  %s3783_s3 = sld [smem:[#allocation2_spill]] (!%p670_p2)  ;;  %vm3199_vm3 = vmmov (!%p670_p2), 0   ;;  %v3200_v6 = vmov (!%p670_p2), 0.0   ;;  %v748_v7 = vlaneseq (!%p670_p2)  ;;  %vm758_vm4 = vcmask (!%p670_p2), 89088  }
  0x10   : > { %3073 = vmatprep.subr.bf16.mxu0 (!%p670_p2), %v3197_v3  ;;  %2840 = vmatprep.mubr.msk.f32.mxu1 (!%p670_p2), %vm3199_vm3, %v3200_v6  ;;  %s3784_s1 = sld [smem:[#allocation6_spill]] (!%p670_p2)  ;;  %vm839_vm6 = vcmask (!%p670_p2), 1041408   ;;  %vm853_vm7 = vcmask (!%p670_p2), 1046528   ;;  %vm857_vm8 = vcmask (!%p670_p2), 261120   ;;  %vm1007_vm9 = vcmask (!%p670_p2), 1045504   ;;  %s3785_s27 = sld [smem:[#allocation9_spill]] (!%p670_p2) }
  0x11   : > { %2906 = vmatprep.mubr.msk.f32.mxu0 (!%p670_p2), %vm3199_vm3, %v3200_v6  ;;  %v749_v8 = vand.u32 (!%p670_p2), 127, %v748_v7  ;;  %vm1089_vm10 = vcmask (!%p670_p2), 1044480   ;;  %vm1171_vm11 = vcmask (!%p670_p2), 1043456   ;;  %s3786_s4 = sld [smem:[#allocation7_spill]] (!%p670_p2)  ;;  %s3788_s30 = sld [smem:[#allocation10_spill]] (!%p670_p2)  ;;  %vm1892_vm12 = vcmask (!%p670_p2), 130048  }
  0x12   : > { %s3789_s2 = sld [smem:[#allocation4_spill]] (!%p670_p2)  ;;  %s3203_s8 = smov (!%p670_p2), 112   ;;  %vm1975_vm13 = vcmask (!%p670_p2), 64512   ;;  %vm2519_vm14 = vcmask (!%p670_p2), 523264  }
  0x13   : > { %s3204_s7 = smov (!%p670_p2), 48  }
  0x14   : > { %v756_v0 = vld [vmem:[%s3782_s6] sm:$0xff] (!%p670_p2)  ;;  %v757_v1 = vld [vmem:[%s3782_s6 + $0x8] sm:$0x7] (!%p670_p2) }
  0x15   : > { %v3040_v4 = vpack.c.bf16 (!%p670_p2), %v757_v1, %v756_v0 }
  0x16   : > { %s3793_s26 = smov (!%p736_p3, %s2665_s26), 1  ;;  %v2675_v9 = vld [vmem:[%s3784_s1 + $0x20] sm:$0xff]  ;;  %v2676_v10 = vld [vmem:[%s3784_s1 + $0x28] sm:$0xff]  ;;  %v2677_v14 = vld [vmem:[%s3784_s1 + $0x30] sm:$0xff] }
  0x17   : > { %3042 = vmatpush3.bf16.msk.msra.mxu1 %vm3041_vm2, %v3040_v4  ;;  %s3772_s0 = sshll.u32 %s3793_s26, 3  ;;  %v3044_v12 = vpack.c.bf16 %v2676_v10, %v2675_v9  ;;  %v2678_v15 = vld [vmem:[%s3784_s1 + $0x38] sm:$0xff]  ;;  %v842_v20 = vld [vmem:[%s3784_s1] sm:$0xff]  ;;  %v843_v21 = vld [vmem:[%s3784_s1 + $0x8] sm:$0xff] }
  0x18   : > { %3043 = vmatprep.subr.bf16.mxu1 %v3197_v3  ;;  %s739_s25 = scalar_lea.vmem %s3783_s3, %s3772_s0  ;;  %v3047_v16 = vpack.c.bf16 %v2678_v15, %v2677_v14  ;;  %v3050_v26 = vpack.c.bf16 %v843_v21, %v842_v20  ;;  %v844_v27 = vld [vmem:[%s3784_s1 + $0x10] sm:$0xff]  ;;  %v845_v28 = vld [vmem:[%s3784_s1 + $0x18] sm:$0xff]  ;;  %v2681_v31 = vld [vmem:[%s3784_s1 + $0x40] sm:$0xff]  ;;  %s3787_s0 = sld [smem:[#allocation8_spill]] }
  0x19   : > { %v747_v5 = vld [vmem:[%s739_s25] sm:$0xff]  ;;  %v3053_v30 = vpack.c.bf16 %v845_v28, %v844_v27  ;;  %v2682_v32 = vld [vmem:[%s3784_s1 + $0x48] sm:$0xff]  ;;  %v2683_v34 = vld [vmem:[%s3784_s1 + $0x50] sm:$0xff]  ;;  %s3202_s25 = smov 80  }
  0x1a   : > { %751 = vperm.xlu0 %3173, %v747_v5   ;;  %v3056_v33 = vpack.c.bf16 %v2682_v32, %v2681_v31  ;;  %v2684_v35 = vld [vmem:[%s3784_s1 + $0x58] sm:$0xff]  ;;  %v2686_v37 = vld [vmem:[%s3784_s1 + $0x60] sm:$0xff]  ;;  %v2687_v38 = vld [vmem:[%s3784_s1 + $0x68] sm:$0xff] }
  0x1b   : > { %v3059_v36 = vpack.c.bf16 %v2684_v35, %v2683_v34  ;;  %v3062_v41 = vpack.c.bf16 %v2687_v38, %v2686_v37  ;;  %v2688_v42 = vld [vmem:[%s3784_s1 + $0x70] sm:$0xff]  ;;  %v2689_v43 = vld [vmem:[%s3784_s1 + $0x78] sm:$0xff]  ;;  %v2691_v46 = vld [vmem:[%s3784_s1 + $0x80] sm:$0xff] }
  0x1c   : > { %v3065_v45 = vpack.c.bf16 %v2689_v43, %v2688_v42  ;;  %v2692_v47 = vld [vmem:[%s3784_s1 + $0x88] sm:$0xff]  ;;  %v2693_v51 = vld [vmem:[%s3784_s1 + $0x90] sm:$0xff]  ;;  %v2694_v52 = vld [vmem:[%s3784_s1 + $0x98] sm:$0xff] }
  0x1d   : > { %v3068_v50 = vpack.c.bf16 %v2692_v47, %v2691_v46  ;;  %v3071_v54 = vpack.c.bf16 %v2694_v52, %v2693_v51  ;;  %v2698_v58 = vld [vmem:[%s3785_s27 + $0x20] sm:$0xff]  ;;  %v2699_v59 = vld [vmem:[%s3785_s27 + $0x28] sm:$0xff]  ;;  %v2700_v61 = vld [vmem:[%s3785_s27 + $0x30] sm:$0xff] }
  0x1e   : > { %v3074_v60 = vpack.c.bf16 %v2699_v59, %v2698_v58  ;;  %v2701_v62 = vld [vmem:[%s3785_s27 + $0x38] sm:$0xff]  ;;  %v2696_v0 = vld [vmem:[%s3786_s4] ss:$0 sm:$0xff]  ;;  %v2710_v28 = vld [vmem:[%s3785_s27 + $0x68] sm:$0xff] }
  0x1f   : > { %v3077_v63 = vpack.c.bf16 %v2701_v62, %v2700_v61  ;;  %v2697_v2 = vld [vmem:[%s3787_s0] ss:$0 sm:$0xff]  ;;  %v2711_v32 = vld [vmem:[%s3785_s27 + $0x70] sm:$0xff]  ;;  %v2715_v37 = vld [vmem:[%s3785_s27 + $0x88] sm:$0xff]  ;;  %s3201_s0 = smov 96  }
  0x20   : > { %3075 = vmatpush3.bf16.msra.mxu0 %v3074_v60  ;;  %v1270_v10 = vld [vmem:[%s3785_s27] sm:$0xff]  ;;  %v2717_v42 = vld [vmem:[%s3785_s27 + $0x98] sm:$0xff]  ;;  %v1690_v51 = vld [vmem:[%s3754_s10 + $0x10] sm:$0xff] }
  0x21   : > { %3076 = vmatprep.subr.bf16.mxu0 %v3197_v3  ;;  %v2704_v21 = vld [vmem:[%s3785_s27 + $0x40] sm:$0xff]  ;;  %v1691_v52 = vld [vmem:[%s3754_s10 + $0x18] sm:$0xff] }
  0x22   : > { %v2709_v27 = vld [vmem:[%s3785_s27 + $0x60] sm:$0xff] }
  0x23   : > { %v3092_v31 = vpack.c.bf16 %v2710_v28, %v2709_v27  ;;  %v2721_v61 = vld [vmem:[%s3755_s11] ss:$0 sm:$0xff] }
  0x24   : > { %3078 = vmatpush3.bf16.msra.mxu0 %v3077_v63  ;;  %v1772_v63 = vld [vmem:[%s3789_s2] sm:$0xff]  ;;  %s3790_s2 = sld [smem:[#allocation3_spill]] }
  0x25   : > { %3079 = vmatprep.subr.bf16.mxu0 %v3197_v3 }
  0x2a   : > { %s742_s29 = scalar_lea.vmem %s3790_s2, %s3793_s26 }
  0x99   : > { %v752_v11 = vpop.permute.xlu0 %751 }
  0x9a   : > { %vm753_vm5 = vcmp.eq.s32.totalorder %v749_v8, %v752_v11  ;;  %v1271_v11 = vld [vmem:[%s3785_s27 + $0x8] sm:$0xff] }
  0x9b   : > { %v2672_v13 = vsel %vm753_vm5, 1.0, %v3200_v6 }
  0x9c   : > { %2841 = vmatmul.mubr.msk.f32.vlgmr.msra.gmra.mrb[0].mxu1 %vm758_vm4, %v2672_v13 }
  0x9d   : > { %3045 = vmatpush3.bf16.msra.mxu1 %v3044_v12  ;;  %2851 = vmatprep.mubr.msk.f32.mxu1 %vm3199_vm3, %v3200_v6 }
  0x9e   : > { %3046 = vmatprep.subr.bf16.mxu1 %v3197_v3 }
  0xa1   : > { %3048 = vmatpush3.bf16.msra.mxu1 %v3047_v16  ;;  %v3080_v16 = vpack.c.bf16 %v1271_v11, %v1270_v10  ;;  %v1805_v11 = vld [vmem:[%s3758_s14] sm:$0xff] }
  0xa2   : > { %3049 = vmatprep.subr.bf16.mxu1 %v3197_v3 }
 0x16f   : > { %v832_v17 = vpop.f32.mrb[0].mxu1 }
 0x170   : > { %v837_v18 = vrot.slane %v832_v17, 6  ;;  %v2842_v19 = vpop.f32.mrb[1].mxu1  ;;  %v1272_v17 = vld [vmem:[%s3785_s27 + $0x10] sm:$0xff] }
 0x172   : > { %v3384_v22 = vsel %vm839_vm6, 0.0, %v837_v18  ;;  %v3387_v23 = vsel %vm839_vm6, %v837_v18, 0.0  ;;  %v1273_v18 = vld [vmem:[%s3785_s27 + $0x18] sm:$0xff] }
 0x173   : > { %v854_v24 = vrot.slane %v3384_v22, 1  ;;  %v855_v25 = vrot.slane %v3387_v23, 1  ;;  %v1008_v39 = vrot.slane %v3384_v22, 2  ;;  %v1009_v40 = vrot.slane %v3387_v23, 2 }
 0x174   : > { %v1090_v48 = vrot.slane %v3384_v22, 3  ;;  %v1091_v49 = vrot.slane %v3387_v23, 3  ;;  %v1172_v55 = vrot.slane %v3384_v22, 4  ;;  %v1173_v56 = vrot.slane %v3387_v23, 4 }
 0x175   : > { %v856_v29 = vsel %vm853_vm7, %v854_v24, %v855_v25  ;;  %v1010_v44 = vsel %vm1007_vm9, %v1008_v39, %v1009_v40  ;;  %v3083_v20 = vpack.c.bf16 %v1273_v18, %v1272_v17  ;;  %v2706_v24 = vld [vmem:[%s3785_s27 + $0x50] sm:$0xff]  ;;  %v2707_v25 = vld [vmem:[%s3785_s27 + $0x58] sm:$0xff] }
 0x176   : > { %2852 = vmatmul.mubr.msk.f32.vlgmr.msra.gmra.mrb[2].mxu1 %vm857_vm8, %v856_v29  ;;  %v1092_v53 = vsel %vm1089_vm10, %v1090_v48, %v1091_v49  ;;  %v1174_v57 = vsel %vm1171_vm11, %v1172_v55, %v1173_v56  ;;  %v1688_v48 = vld [vmem:[%s3754_s10] sm:$0xff]  ;;  %v1689_v49 = vld [vmem:[%s3754_s10 + $0x8] sm:$0xff] }
 0x177   : > { %3051 = vmatpush3.bf16.msra.mxu1 %v3050_v26  ;;  %2862 = vmatprep.mubr.msk.f32.mxu1 %vm3199_vm3, %v3200_v6  ;;  %v3089_v26 = vpack.c.bf16 %v2707_v25, %v2706_v24  ;;  %v2720_v56 = vld [vmem:[%s3753_s9] ss:$0 sm:$0xff] }
 0x178   : > { %3052 = vmatprep.subr.bf16.mxu1 %v3197_v3 }
 0x17b   : > { %3054 = vmatpush3.bf16.msra.mxu1 %v3053_v30 }
 0x17c   : > { %3055 = vmatprep.subr.bf16.mxu1 %v3197_v3 }
 0x17e   : > { %2863 = vmatmul.mubr.msk.f32.vlgmr.msra.gmra.mrb[2].mxu1 %vm857_vm8, %v3384_v22  ;;  %v2705_v22 = vld [vmem:[%s3785_s27 + $0x48] sm:$0xff] }
 0x17f   : > { %3057 = vmatpush3.bf16.msra.mxu1 %v3056_v33  ;;  %2873 = vmatprep.mubr.msk.f32.mxu1 %vm3199_vm3, %v3200_v6  ;;  %v3086_v23 = vpack.c.bf16 %v2705_v22, %v2704_v21  ;;  %v2712_v33 = vld [vmem:[%s3785_s27 + $0x78] sm:$0xff]  ;;  %v2723_v21 = vld [vmem:[%s3756_s12] ss:$0 sm:$0xff] }
 0x180   : > { %3058 = vmatprep.subr.bf16.mxu1 %v3197_v3  ;;  %v3095_v35 = vpack.c.bf16 %v2712_v33, %v2711_v32 }
 0x183   : > { %3060 = vmatpush3.bf16.msra.mxu1 %v3059_v36  ;;  %v2714_v36 = vld [vmem:[%s3785_s27 + $0x80] sm:$0xff] }
 0x184   : > { %3061 = vmatprep.subr.bf16.mxu1 %v3197_v3  ;;  %v3098_v40 = vpack.c.bf16 %v2715_v37, %v2714_v36 }
 0x186   : > { %2874 = vmatmul.mubr.msk.f32.vlgmr.msra.gmra.mrb[2].mxu1 %vm857_vm8, %v1010_v44 }
 0x187   : > { %3063 = vmatpush3.bf16.msra.mxu1 %v3062_v41  ;;  %2884 = vmatprep.mubr.msk.f32.mxu1 %vm3199_vm3, %v3200_v6  ;;  %v2716_v41 = vld [vmem:[%s3785_s27 + $0x90] sm:$0xff] }
 0x188   : > { %3064 = vmatprep.subr.bf16.mxu1 %v3197_v3  ;;  %v3101_v44 = vpack.c.bf16 %v2717_v42, %v2716_v41 }
 0x18b   : > { %3066 = vmatpush3.bf16.msra.mxu1 %v3065_v45 }
 0x18c   : > { %3067 = vmatprep.subr.bf16.mxu1 %v3197_v3 }
 0x18e   : > { %2885 = vmatmul.mubr.msk.f32.vlgmr.msra.gmra.mrb[2].mxu1 %vm857_vm8, %v1092_v53  ;;  %v3107_v53 = vpack.c.bf16 %v1691_v52, %v1690_v51 }
 0x18f   : > { %3069 = vmatpush3.bf16.msra.mxu1 %v3068_v50  ;;  %2895 = vmatprep.mubr.msk.f32.mxu1 %vm3199_vm3, %v3200_v6  ;;  %v3104_v50 = vpack.c.bf16 %v1689_v49, %v1688_v48 }
 0x190   : > { %3070 = vmatprep.subr.bf16.mxu1 %v3197_v3 }
 0x193   : > { %3072 = vmatpush3.bf16.msra.mxu1 %v3071_v54  ;;  %v2719_v54 = vld [vmem:[%s3788_s30] ss:$0 sm:$0xff]  ;;  %s3205_s30 = smov 64  }
 0x194   : > { %3103 = vmatprep.subr.bf16.mxu1 %v3197_v3 }
 0x196   : > { %2896 = vmatmul.mubr.msk.f32.vlgmr.msra.gmra.mrb[2].mxu1 %vm857_vm8, %v1174_v57 }
 0x197   : > { %2961 = vmatprep.mubr.msk.f32.mxu1 %vm3199_vm3, %v3200_v6  ;;  %3105 = vmatpush3.bf16.msra.mxu1 %v3104_v50 }
 0x198   : > { %3106 = vmatprep.subr.bf16.mxu1 %v3197_v3 }
 0x19b   : > { %3108 = vmatpush3.bf16.msra.mxu1 %v3107_v53 }
 0x19c   : > { %2975 = vmatprep.subr.mxu1 %v3200_v6 }
 0x269   : > { %v1243_v1 = vpop.f32.mrb[2].mxu1 }
 0x26a   : > { %v1255_v4 = vmul.f32 %v2696_v0, %v1243_v1  ;;  %v2897_v5 = vpop.f32.mrb[3].mxu1 }
 0x26c   : > { %v1263_v7 = vadd.f32 %v2697_v2, %v1255_v4 }
 0x26e   : > { %v1264_v8 = vmax.f32 %v1263_v7, 0.0 }
 0x270   : > { %v1266_v9 = vrot.slane %v1264_v8, 6 }
 0x272   : > { %v1268_v12 = vsel %vm839_vm6, 0.0, %v1266_v9  ;;  %v1269_v13 = vsel %vm839_vm6, %v1266_v9, 0.0 }
 0x273   : > { %v1281_v14 = vrot.slane %v1268_v12, 1  ;;  %v1282_v15 = vrot.slane %v1269_v13, 1  ;;  %v1434_v29 = vrot.slane %v1269_v13, 2  ;;  %v1433_v30 = vrot.slane %v1268_v12, 2 }
 0x274   : > { %v1515_v38 = vrot.slane %v1269_v13, 3  ;;  %v1514_v39 = vrot.slane %v1268_v12, 3  ;;  %v1596_v45 = vrot.slane %v1269_v13, 4  ;;  %v1595_v46 = vrot.slane %v1268_v12, 4 }
 0x275   : > { %v1283_v19 = vsel %vm853_vm7, %v1281_v14, %v1282_v15  ;;  %v1435_v34 = vsel %vm1007_vm9, %v1433_v30, %v1434_v29  ;;  %v1807_v14 = vld [vmem:[%s3758_s14 + $0x10] sm:$0xff]  ;;  %v1808_v15 = vld [vmem:[%s3758_s14 + $0x18] sm:$0xff] }
 0x276   : > { %2907 = vmatmul.mubr.msk.f32.vlgmr.msra.gmra.mrb[0].mxu0 %vm857_vm8, %v1283_v19  ;;  %v1516_v43 = vsel %vm1089_vm10, %v1514_v39, %v1515_v38  ;;  %v1597_v47 = vsel %vm1171_vm11, %v1595_v46, %v1596_v45 }
 0x277   : > { %3081 = vmatpush3.bf16.msra.mxu0 %v3080_v16  ;;  %2917 = vmatprep.mubr.msk.f32.mxu0 %vm3199_vm3, %v3200_v6  ;;  %v3113_v16 = vpack.c.bf16 %v1808_v15, %v1807_v14 }
 0x278   : > { %3082 = vmatprep.subr.bf16.mxu0 %v3197_v3 }
 0x27b   : > { %3084 = vmatpush3.bf16.msra.mxu0 %v3083_v20 }
 0x27c   : > { %3085 = vmatprep.subr.bf16.mxu0 %v3197_v3 }
 0x27e   : > { %2918 = vmatmul.mubr.msk.f32.vlgmr.msra.gmra.mrb[0].mxu0 %vm857_vm8, %v1268_v12  ;;  %v1806_v12 = vld [vmem:[%s3758_s14 + $0x8] sm:$0xff] }
 0x27f   : > { %3087 = vmatpush3.bf16.msra.mxu0 %v3086_v23  ;;  %2928 = vmatprep.mubr.msk.f32.mxu0 %vm3199_vm3, %v3200_v6  ;;  %v3110_v13 = vpack.c.bf16 %v1806_v12, %v1805_v11  ;;  %v2724_v23 = vld [vmem:[%s3757_s13] ss:$0 sm:$0xff] }
 0x280   : > { %3088 = vmatprep.subr.bf16.mxu0 %v3197_v3 }
 0x283   : > { %3090 = vmatpush3.bf16.msra.mxu0 %v3089_v26  ;;  %v2725_v26 = vld [vmem:[%s3759_s15] ss:$0 sm:$0xff] }
 0x284   : > { %3091 = vmatprep.subr.bf16.mxu0 %v3197_v3 }
 0x286   : > { %2929 = vmatmul.mubr.msk.f32.vlgmr.msra.gmra.mrb[0].mxu0 %vm857_vm8, %v1435_v34  ;;  %v2729_v34 = vld [vmem:[%s742_s29] ss:$0 sm:$0xff] }
 0x287   : > { %3093 = vmatpush3.bf16.msra.mxu0 %v3092_v31  ;;  %2939 = vmatprep.mubr.msk.f32.mxu0 %vm3199_vm3, %v3200_v6 }
 0x288   : > { %3094 = vmatprep.subr.bf16.mxu0 %v3197_v3 }
 0x28b   : > { %3096 = vmatpush3.bf16.msra.mxu0 %v3095_v35 }
 0x28c   : > { %3097 = vmatprep.subr.bf16.mxu0 %v3197_v3 }
 0x28e   : > { %2940 = vmatmul.mubr.msk.f32.vlgmr.msra.gmra.mrb[0].mxu0 %vm857_vm8, %v1516_v43 }
 0x28f   : > { %3099 = vmatpush3.bf16.msra.mxu0 %v3098_v40  ;;  %2950 = vmatprep.mubr.msk.f32.mxu0 %vm3199_vm3, %v3200_v6 }
 0x290   : > { %3100 = vmatprep.subr.bf16.mxu0 %v3197_v3 }
 0x293   : > { %3102 = vmatpush3.bf16.msra.mxu0 %v3101_v44 }
 0x294   : > { %3109 = vmatprep.subr.bf16.mxu0 %v3197_v3 }
 0x296   : > { %2951 = vmatmul.mubr.msk.f32.vlgmr.msra.gmra.mrb[0].mxu0 %vm857_vm8, %v1597_v47 }
 0x297   : > { %2972 = vmatprep.mubr.msk.f32.mxu0 %vm3199_vm3, %v3200_v6  ;;  %3111 = vmatpush3.bf16.msra.mxu0 %v3110_v13 }
 0x298   : > { %3112 = vmatprep.subr.bf16.mxu0 %v3197_v3 }
 0x29b   : > { %3114 = vmatpush3.bf16.msra.mxu0 %v3113_v16  ;;  %v2736_v16 = vld [vmem:[%s3761_s17] ss:$0 sm:$0xff] }
 0x29c   : > { %2980 = vmatprep.subr.mxu0 %v3200_v6 }
 0x369   : > { %v1666_v55 = vpop.f32.mrb[0].mxu0 }
 0x36a   : > { %v1678_v57 = vmul.f32 %v2719_v54, %v1666_v55  ;;  %v2952_v58 = vpop.f32.mrb[1].mxu0 }
 0x36c   : > { %v1686_v59 = vadd.f32 %v2720_v56, %v1678_v57 }
 0x36e   : > { %v1687_v60 = vmax.f32 %v1686_v59, 0.0  ;;  %v2063_v59 = vld [vmem:[%s3760_s16] sm:$0xff] }
 0x370   : > { %2962 = vmatmul.mubr.msk.f32.vlgmr.msra.gmra.mrb[4].mxu1 %vm857_vm8, %v1687_v60  ;;  %v2064_v60 = vld [vmem:[%s3760_s16 + $0x8] sm:$0xff] }
 0x371   : > { %2977 = vmatprep.mubr.msk.f32.mxu1 %vm3199_vm3, %v3200_v6 }
 0x443   : > { %v1768_v62 = vpop.f32.mrb[4].mxu1 }
 0x444   : > { %v1769_v0 = vadd.f32 %v2721_v61, %v1768_v62  ;;  %v2963_v1 = vpop.f32.mrb[5].mxu1 }
 0x445   : > { %v2232_v1 = vld [vmem:[%s3760_s16 + $0x10] sm:$0xff] }
 0x446   : > { %v3593_v2 = vadd.f32 %v1772_v63, %v1769_v0  ;;  %v3119_v63 = vpack.c.bf16 %v2064_v60, %v2063_v59 }
 0x448   : > { %v1777_v4 = vsel %vm857_vm8, %v3593_v2, 0.0 }
 0x449   : > { %1778 = vadd.xlane.f32.xlu0 %v1777_v4  ;;  %v2233_v4 = vld [vmem:[%s3760_s16 + $0x18] sm:$0xff] }
 0x4d6   : > { %v1779_v5 = vpop.xlane.xlu0 %1778 }
 0x4d7   : > { %v1781_v7 = vmul.f32 0.03125, %v1779_v5  ;;  %v3116_v5 = vpack.c.bf16 %v2233_v4, %v2232_v1 }
 0x4d9   : > { %v1782_v8 = vsub.f32 %v3593_v2, %v1781_v7 }
 0x4db   : > { %v1783_v9 = vmul.f32 %v1782_v8, %v1782_v8 }
 0x4dd   : > { %v1784_v10 = vsel %vm857_vm8, %v1783_v9, 0.0 }
 0x4de   : > { %1785 = vadd.xlane.f32.xlu1 %v1784_v10 }
 0x56b   : > { %v1786_v17 = vpop.xlane.xlu1 %1785 }
 0x56c   : > { %v1787_v18 = vmul.f32 0.03125, %v1786_v17 }
 0x56e   : > { %v1788_v19 = vadd.f32 1e-05, %v1787_v18 }
 0x570   : > { %3174 = vrsqrt.f32 %v1788_v19 }
 0x57a   : > { %v3175_v20 = vpop.eup %3174 }
 0x57b   : > { %v1790_v22 = vmul.f32 %v3175_v20, %v1782_v8 }
 0x57d   : > { %v1797_v24 = vmul.f32 %v2723_v21, %v1790_v22 }
 0x57f   : > { %v1804_v25 = vadd.f32 %v2724_v23, %v1797_v24  ;;  %v2418_v24 = vld [vmem:[%s3764_s20] sm:$0xff] }
 0x581   : > { %2973 = vmatmul.mubr.msk.f32.vlgmr.msra.gmra.mrb[2].mxu0 %vm857_vm8, %v1804_v25 }
 0x582   : > { %2982 = vmatprep.mubr.msk.f32.mxu0 %vm3199_vm3, %v3200_v6 }
 0x654   : > { %v1885_v27 = vpop.f32.mrb[2].mxu0 }
 0x655   : > { %v1886_v28 = vadd.f32 %v2725_v26, %v1885_v27  ;;  %v2974_v29 = vpop.f32.mrb[3].mxu0  ;;  %v2420_v26 = vld [vmem:[%s3764_s20 + $0x10] sm:$0xff]  ;;  %v2421_v27 = vld [vmem:[%s3764_s20 + $0x18] sm:$0xff] }
 0x657   : > { %1890 = vrot.lane.b32.xlu1 %v1886_v28, %s3201_s0 }
 0x65b   : > { %2067 = vrot.lane.b32.xlu1 %v1886_v28, %s3202_s25  ;;  %s3791_s25 = sshll.u32 %s3793_s26, 3 }
 0x65c   : > { %s746_s28 = scalar_lea.vmem %s3768_s24, %s3791_s25 }
 0x65f   : > { %2065 = vrot.lane.b32.xlu1 %v1886_v28, %s3203_s8 }
 0x6c9   : > { %v1891_v30 = vpop.permute.xlu1 %1890 }
 0x6ca   : > { %2976 = vmatpush3.xpose.msk.msra.mxu1 %vm1892_vm12, %v1891_v30 }
 0x6cb   : > { %2985 = vmatprep.subr.mxu1 %v3200_v6 }
 0x6cd   : > { %2978 = vmatmul.mubr.msk.f32.vlgmr.msra.gmra.mrb[6].mxu1 %vm1892_vm12, %v1886_v28  ;;  %v2068_v31 = vpop.permute.xlu1 %2067 }
 0x6ce   : > { %2986 = vmatpush3.xpose.msk.msra.mxu1 %vm1892_vm12, %v2068_v31  ;;  %2987 = vmatprep.mubr.msk.f32.mxu1 %vm3199_vm3, %v3200_v6 }
 0x6cf   : > { %3115 = vmatprep.subr.bf16.mxu1 %v3197_v3 }
 0x6d1   : > { %v2066_v32 = vpop.permute.xlu1 %2065 }
 0x6d2   : > { %2988 = vmatmul.mubr.msk.f32.vlgmr.msra.gmra.mrb[8].mxu1 %vm1892_vm12, %v2066_v32 }
 0x6d3   : > { %2999 = vmatprep.mubr.msk.f32.mxu1 %vm3199_vm3, %v3200_v6  ;;  %3117 = vmatpush3.bf16.msra.mxu1 %v3116_v5 }
 0x6d4   : > { %3121 = vmatprep.subr.bf16.mxu1 %v3197_v3 }
 0x7a0   : > { %v1963_v33 = vpop.f32.mrb[6].mxu1 }
 0x7a1   : > { %v1967_v35 = vmul.f32 0.25, %v1963_v33  ;;  %v2979_v36 = vpop.f32.mrb[7].mxu1  ;;  %v2737_v33 = vld [vmem:[%s3762_s18] ss:$0 sm:$0xff] }
 0x7a3   : > { %v1974_v37 = vadd.f32 %v2729_v34, %v1967_v35  ;;  %v2738_v35 = vld [vmem:[%s3763_s19] ss:$0 sm:$0xff] }
 0x7a5   : > { %v2139_v38 = vpop.f32.mrb[8].mxu1  ;;  %v1976_v39 = vsel %vm1975_vm13, %v1974_v37, -inf }
 0x7a6   : > { %v2143_v40 = vmul.f32 0.25, %v2139_v38  ;;  %1977 = vmax.xlane.f32.xlu1 %v1976_v39  ;;  %v2989_v41 = vpop.f32.mrb[9].mxu1  ;;  %v2511_v38 = vld [vmem:[%s3766_s22] sm:$0xff]  ;;  %v2512_v39 = vld [vmem:[%s3766_s22 + $0x8] sm:$0xff] }
 0x7a7   : > { %v2513_v41 = vld [vmem:[%s3766_s22 + $0x10] sm:$0xff] }
 0x7a8   : > { %v2144_v42 = vadd.f32 %v2729_v34, %v2143_v40  ;;  %v3128_v40 = vpack.c.bf16 %v2512_v39, %v2511_v38 }
 0x7aa   : > { %v2145_v43 = vsel %vm1975_vm13, %v2144_v42, -inf }
 0x7ab   : > { %2146 = vmax.xlane.f32.xlu0 %v2145_v43 }
 0x7b7   : > { %2156 = vrot.lane.b32.xlu1 %v1886_v28, %s3204_s7 }
 0x833   : > { %v1978_v44 = vpop.xlane.xlu1 %1977 }
 0x834   : > { %v1979_v45 = vsub.f32 %v1974_v37, %v1978_v44  ;;  %v2515_v44 = vld [vmem:[%s3766_s22 + $0x20] sm:$0xff] }
 0x836   : > { %v1980_v46 = vmul.f32 1.442695, %v1979_v45  ;;  %v2516_v45 = vld [vmem:[%s3766_s22 + $0x28] sm:$0xff] }
 0x837   : > { %v2157_v61 = vpop.permute.xlu1 %2156 }
 0x838   : > { %3176 = vpow2.f32 %v1980_v46  ;;  %v2147_v47 = vpop.xlane.xlu0 %2146  ;;  %v3134_v46 = vpack.c.bf16 %v2516_v45, %v2515_v44 }
 0x839   : > { %v2148_v48 = vsub.f32 %v2144_v42, %v2147_v47  ;;  %v2514_v42 = vld [vmem:[%s3766_s22 + $0x18] sm:$0xff]  ;;  %v2517_v47 = vld [vmem:[%s3766_s22 + $0x30] sm:$0xff] }
 0x83a   : > { %v3131_v43 = vpack.c.bf16 %v2514_v42, %v2513_v41 }
 0x83b   : > { %v2149_v49 = vmul.f32 1.442695, %v2148_v48  ;;  %v2518_v48 = vld [vmem:[%s3766_s22 + $0x38] sm:$0xff] }
 0x83d   : > { %3178 = vpow2.f32 %v2149_v49  ;;  %v3137_v49 = vpack.c.bf16 %v2518_v48, %v2517_v47 }
 0x842   : > { %v3177_v50 = vpop.eup %3176 }
 0x843   : > { %v1982_v51 = vsel %vm1975_vm13, %v3177_v50, 0.0 }
 0x844   : > { %1983 = vadd.xlane.f32.xlu0 %v1982_v51 }
 0x847   : > { %v3179_v52 = vpop.eup %3178 }
 0x848   : > { %v2151_v53 = vsel %vm1975_vm13, %v3179_v52, 0.0 }
 0x849   : > { %2152 = vadd.xlane.f32.xlu0 %v2151_v53 }
 0x85f   : > { %1987 = vrot.lane.b32.xlu0 %v1886_v28, %s3205_s30  ;;  %v3125_v28 = vpack.c.bf16 %v2421_v27, %v2420_v26 }
 0x8d1   : > { %v1984_v54 = vpop.xlane.xlu0 %1983 }
 0x8d2   : > { %3180 = vrcp.f32 %v1984_v54 }
 0x8d6   : > { %v2153_v55 = vpop.xlane.xlu0 %2152 }
 0x8d7   : > { %3182 = vrcp.f32 %v2153_v55 }
 0x8da   : > { %v1988_v56 = vpop.permute.xlu0 %1987 }
 0x8db   : > { %2981 = vmatpush3.msra.mxu0 %v1988_v56 }
 0x8dc   : > { %v3181_v57 = vpop.eup %3180  ;;  %2990 = vmatprep.subr.mxu0 %v3200_v6 }
 0x8dd   : > { %v1986_v58 = vmul.f32 %v3181_v57, %v3177_v50  ;;  %v2739_v50 = vld [vmem:[%s3765_s21] ss:$0 sm:$0xff] }
 0x8df   : > { %2983 = vmatmul.mubr.msk.f32.vlgmr.msra.gmra.mrb[4].mxu0 %vm1975_vm13, %v1986_v58 }
 0x8e0   : > { %2991 = vmatpush3.msra.mxu0 %v2157_v61  ;;  %2992 = vmatprep.mubr.msk.f32.mxu0 %vm3199_vm3, %v3200_v6 }
 0x8e1   : > { %v3183_v62 = vpop.eup %3182  ;;  %3118 = vmatprep.subr.bf16.mxu0 %v3197_v3 }
 0x8e2   : > { %v2155_v0 = vmul.f32 %v3183_v62, %v3179_v52 }
 0x8e4   : > { %2993 = vmatmul.mubr.msk.f32.vlgmr.msra.gmra.mrb[6].mxu0 %vm1975_vm13, %v2155_v0 }
 0x8e5   : > { %3120 = vmatpush3.bf16.msra.mxu0 %v3119_v63  ;;  %3006 = vmatprep.mubr.msk.f32.mxu0 %vm3199_vm3, %v3200_v6  ;;  %v2742_v63 = vld [vmem:[%s3767_s23] ss:$0 sm:$0xff] }
 0x8e6   : > { %3127 = vmatprep.subr.bf16.mxu0 %v3197_v3 }
 0x9b2   : > { %v2059_v7 = vpop.f32.mrb[4].mxu0 }
 0x9b3   : > { %v2984_v8 = vpop.f32.mrb[5].mxu0  ;;  %3007 = vmatmul.mubr.msk.f32.vlgmr.msra.gmra.mrb[8].mxu0 %vm1892_vm12, %v2059_v7 }
 0x9b4   : > { %3036 = vmatprep.mubr.msk.f32.mxu0 %vm3199_vm3, %v3200_v6  ;;  %3129 = vmatpush3.bf16.msra.mxu0 %v3128_v40 }
 0x9b5   : > { %3130 = vmatprep.subr.bf16.mxu0 %v3197_v3 }
 0x9b7   : > { %v2228_v9 = vpop.f32.mrb[6].mxu0 }
 0x9b8   : > { %v2994_v10 = vpop.f32.mrb[7].mxu0  ;;  %3000 = vmatmul.mubr.msk.f32.vlgmr.msra.gmra.mrb[10].mxu1 %vm1892_vm12, %v2228_v9  ;;  %3132 = vmatpush3.bf16.msra.mxu0 %v3131_v43 }
 0x9b9   : > { %3017 = vmatprep.mubr.msk.f32.mxu1 %vm3199_vm3, %v3200_v6  ;;  %3133 = vmatprep.subr.bf16.mxu0 %v3197_v3 }
 0x9bc   : > { %3135 = vmatpush3.bf16.msra.mxu0 %v3134_v46 }
 0x9bd   : > { %3136 = vmatprep.subr.bf16.mxu0 %v3197_v3 }
 0x9c0   : > { %3138 = vmatpush3.bf16.msra.mxu0 %v3137_v49 }
 0xa86   : > { %v2376_v11 = vpop.f32.mrb[8].mxu0 }
 0xa87   : > { %v3008_v12 = vpop.f32.mrb[9].mxu0 }
 0xa8b   : > { %v2303_v13 = vpop.f32.mrb[10].mxu1 }
 0xa8c   : > { %v2377_v14 = vadd.f32 %v2376_v11, %v2303_v13  ;;  %v3001_v15 = vpop.f32.mrb[11].mxu1 }
 0xa8e   : > { %v2380_v17 = vadd.f32 %v2377_v14, %v3593_v2  ;;  %v2419_v2 = vld [vmem:[%s3764_s20 + $0x8] sm:$0xff] }
 0xa8f   : > { %v3122_v25 = vpack.c.bf16 %v2419_v2, %v2418_v24 }
 0xa90   : > { %v3675_v18 = vadd.f32 %v2736_v16, %v2380_v17 }
 0xa91   : > { %3123 = vmatpush3.bf16.msra.mxu1 %v3122_v25 }
 0xa92   : > { %v2391_v19 = vsel %vm857_vm8, %v3675_v18, 0.0  ;;  %3124 = vmatprep.subr.bf16.mxu1 %v3197_v3 }
 0xa93   : > { %2392 = vadd.xlane.f32.xlu0 %v2391_v19 }
 0xa95   : > { %3126 = vmatpush3.bf16.msra.mxu1 %v3125_v28 }
 0xb20   : > { %v2393_v20 = vpop.xlane.xlu0 %2392 }
 0xb21   : > { %v2394_v21 = vmul.f32 0.03125, %v2393_v20 }
 0xb23   : > { %v2395_v6 = vsub.f32 %v3675_v18, %v2394_v21 }
 0xb25   : > { %v2396_v22 = vmul.f32 %v2395_v6, %v2395_v6 }
 0xb27   : > { %v2397_v23 = vsel %vm857_vm8, %v2396_v22, 0.0 }
 0xb28   : > { %2398 = vadd.xlane.f32.xlu1 %v2397_v23 }
 0xbb5   : > { %v2399_v29 = vpop.xlane.xlu1 %2398 }
 0xbb6   : > { %v2400_v30 = vmul.f32 0.03125, %v2399_v29 }
 0xbb8   : > { %v2401_v31 = vadd.f32 1e-05, %v2400_v30 }
 0xbba   : > { %3184 = vrsqrt.f32 %v2401_v31 }
 0xbc4   : > { %v3185_v32 = vpop.eup %3184 }
 0xbc5   : > { %v2403_v34 = vmul.f32 %v3185_v32, %v2395_v6 }
 0xbc7   : > { %v2410_v36 = vmul.f32 %v2737_v33, %v2403_v34 }
 0xbc9   : > { %v2417_v37 = vadd.f32 %v2738_v35, %v2410_v36 }
 0xbcb   : > { %3018 = vmatmul.mubr.msk.f32.vlgmr.msra.gmra.mrb[12].mxu1 %vm857_vm8, %v2417_v37 }
 0xc9e   : > { %v2498_v51 = vpop.f32.mrb[12].mxu1 }
 0xc9f   : > { %v2499_v52 = vadd.f32 %v2739_v50, %v2498_v51  ;;  %v3019_v53 = vpop.f32.mrb[13].mxu1 }
 0xca1   : > { %v2503_v54 = vmul.f32 0.044715, %v2499_v52  ;;  %v2502_v60 = vmul.f32 0.5, %v2499_v52 }
 0xca3   : > { %v2504_v55 = vmul.f32 %v2503_v54, %v2499_v52 }
 0xca5   : > { %v2505_v56 = vmul.f32 %v2504_v55, %v2499_v52 }
 0xca7   : > { %v2506_v57 = vadd.f32 %v2505_v56, %v2499_v52 }
 0xca9   : > { %v2507_v58 = vmul.f32 0.7978846, %v2506_v57 }
 0xcab   : > { %3186 = vtanh.f32 %v2507_v58 }
 0xcb5   : > { %v3187_v59 = vpop.eup %3186 }
 0xcb6   : > { %v2509_v61 = vadd.f32 1.0, %v3187_v59 }
 0xcb8   : > { %v2510_v3 = vmul.f32 %v2509_v61, %v2502_v60 }
 0xcba   : > { %3037 = vmatmul.mubr.msk.f32.vlgmr.msra.gmra.mrb[10].mxu0 %vm2519_vm14, %v2510_v3 }
 0xd8d   : > { %v2589_v62 = vpop.f32.mrb[10].mxu0 }
 0xd8e   : > { %v2593_v0 = vadd.f32 %v2589_v62, %v3675_v18  ;;  %v3038_v1 = vpop.f32.mrb[11].mxu0 }
 0xd90   : > { %v2601_v4 = vadd.f32 %v2742_v63, %v2593_v0 }
 0xd92   : > { %2602 = vst.msk [vmem:[%s746_s28] sm:$0xff] %vm857_vm8, %v2601_v4 }
 0xd93 PF: > { %s34_s5 = sadd.s32 1, %s3194_s5  }
 0xd94   : > { %p31_p4 = scmp.ge.s32.totalorder %s34_s5, 4  }
 0xd96   :  { %33 = sbr.rel (!%p31_p4) target bundleno = 10 (0xa), region = 157 }

// kernel: reformer_tts_forward.3
= control target key start
LH: loop header
LB: loop body
LE: loop exit
PB: predicated region body
PF: predicated region fallthrough
CT: control target
= control target key end

     0   :  { %s6900_s6 = smov 1   ;;  %s6901_s10 = smov 2   ;;  %s7760_s0 = inlined_call_operand.smem [shape: u32[42], index: -1, kind: input, shape index: {}] }
   0x1   :  { %s6974_s5 = sld [smem:[%s7760_s0]]   ;;  %s6902_s14 = smov 3  }
   0x2   :  { %s6979_s9 = sld [smem:[%s7760_s0 + %s6900_s6]]   ;;  %s6903_s18 = smov 4  }
   0x3   :  { %s6984_s13 = sld [smem:[%s7760_s0 + %s6901_s10]]   ;;  %s6904_s22 = smov 5  }
   0x4   :  { %s6989_s17 = sld [smem:[%s7760_s0 + %s6902_s14]]   ;;  %s6905_s26 = smov 6  }
   0x5   :  { %s6994_s21 = sld [smem:[%s7760_s0 + %s6903_s18]]   ;;  %s6906_s30 = smov 7  }
   0x6   :  { %s6999_s25 = sld [smem:[%s7760_s0 + %s6904_s22]]   ;;  %s6907_s4 = smov 8  }
   0x7   :  { %s7004_s29 = sld [smem:[%s7760_s0 + %s6905_s26]]   ;;  %s6908_s10 = smov 9  }
   0x8   :  { %7784 = sst [smem:[#allocation32_spill]] %s6979_s9  ;;  %s6909_s15 = smov 10  }
   0x9   :  { %7785 = sst [smem:[#allocation33_spill]] %s6984_s13  ;;  %s6910_s20 = smov 11  }
   0xa   :  { %7786 = sst [smem:[#allocation34_spill]] %s6989_s17  ;;  %s6911_s26 = smov 12  }
   0xb   :  { %7787 = sst [smem:[#allocation35_spill]] %s6994_s21  ;;  %s6912_s1 = smov 13  }
   0xc   :  { %s7009_s3 = sld [smem:[%s7760_s0 + %s6906_s30]]   ;;  %s6913_s7 = smov 14  }
   0xd   :  { %7788 = sst [smem:[#allocation36_spill]] %s7004_s29  ;;  %s6915_s22 = smov 16  }
   0xe   :  { %s7014_s8 = sld [smem:[%s7760_s0 + %s6907_s4]]   ;;  %s6916_s28 = smov 17  }
   0xf   :  { %s7019_s14 = sld [smem:[%s7760_s0 + %s6908_s10]]  }
  0x10   :  { %s7024_s19 = sld [smem:[%s7760_s0 + %s6909_s15]]   ;;  %s6914_s15 = smov 15  }
  0x11   :  { %s7029_s24 = sld [smem:[%s7760_s0 + %s6910_s20]]  }
  0x12   :  { %7789 = sst [smem:[#allocation37_spill]] %s7009_s3 }
  0x13   :  { %s7034_s30 = sld [smem:[%s7760_s0 + %s6911_s26]]  }
  0x14   :  { %7790 = sst [smem:[#allocation38_spill]] %s7014_s8 }
  0x15   :  { %7791 = sst [smem:[#allocation39_spill]] %s7019_s14 }
  0x16   :  { %7792 = sst [smem:[#allocation40_spill]] %s7024_s19 }
  0x17   :  { %7793 = sst [smem:[#allocation41_spill]] %s7029_s24 }
  0x18   :  { %s7039_s6 = sld [smem:[%s7760_s0 + %s6912_s1]]  }
  0x19   :  { %7794 = sst [smem:[#allocation42_spill]] %s7034_s30 }
  0x1a   :  { %s7044_s12 = sld [smem:[%s7760_s0 + %s6913_s7]]   ;;  %s6917_s7 = smov 18  }
  0x1b   :  { %s7049_s20 = sld [smem:[%s7760_s0 + %s6914_s15]]   ;;  %s6918_s15 = smov 19  }
  0x1c   :  { %s7054_s27 = sld [smem:[%s7760_s0 + %s6915_s22]]   ;;  %s6919_s22 = smov 20  }
  0x1d   :  { %s7059_s4 = sld [smem:[%s7760_s0 + %s6916_s28]]   ;;  %s6920_s28 = smov 21  }
  0x1e   :  { %7795 = sst [smem:[#allocation43_spill]] %s7039_s6 }
  0x1f   :  { %s7064_s17 = sld [smem:[%s7760_s0 + %s6917_s7]]   ;;  %s6921_s7 = smov 22  }
  0x20   :  { %7796 = sst [smem:[#allocation44_spill]] %s7044_s12 }
  0x21   :  { %7797 = sst [smem:[#allocation45_spill]] %s7049_s20 }
  0x22   :  { %7798 = sst [smem:[#allocation46_spill]] %s7054_s27 }
  0x23   :  { %7799 = sst [smem:[#allocation47_spill]] %s7059_s4 }
  0x24   :  { %s7069_s20 = sld [smem:[%s7760_s0 + %s6918_s15]]   ;;  %s6922_s15 = smov 23  }
  0x25   :  { %s7074_s27 = sld [smem:[%s7760_s0 + %s6919_s22]]   ;;  %s6923_s22 = smov 24  }
  0x26   :  { %s7079_s9 = sld [smem:[%s7760_s0 + %s6920_s28]]   ;;  %s6924_s28 = smov 25  }
  0x27   :  { %s7084_s4 = sld [smem:[%s7760_s0 + %s6921_s7]]   ;;  %s6925_s7 = smov 26  }
  0x28   :  { %s7094_s12 = sld [smem:[%s7760_s0 + %s6923_s22]]   ;;  %s6927_s22 = smov 28  }
  0x29   :  { %s7104_s6 = sld [smem:[%s7760_s0 + %s6925_s7]]   ;;  %s6929_s7 = smov 30  }
  0x2a   :  { %7800 = sst [smem:[#allocation48_spill]] %s7069_s20 }
  0x2b   :  { %s7089_s20 = sld [smem:[%s7760_s0 + %s6922_s15]]   ;;  %s6926_s15 = smov 27  }
  0x2c   :  { %7801 = sst [smem:[#allocation49_spill]] %s7079_s9 }
  0x2d   :  { %s7099_s9 = sld [smem:[%s7760_s0 + %s6924_s28]]   ;;  %s6928_s28 = smov 29  }
  0x2e   :  { %s7109_s13 = sld [smem:[%s7760_s0 + %s6926_s15]]   ;;  %s6930_s15 = smov 31  }
  0x2f   :  { %s7114_s30 = sld [smem:[%s7760_s0 + %s6927_s22]]   ;;  %s6931_s22 = smov 32  }
  0x30   :  { %s7124_s19 = sld [smem:[%s7760_s0 + %s6929_s7]]   ;;  %s6933_s7 = smov 34  }
  0x31   :  { %s7134_s14 = sld [smem:[%s7760_s0 + %s6931_s22]]   ;;  %s6935_s22 = smov 36  }
  0x32   :  { %s7144_s24 = sld [smem:[%s7760_s0 + %s6933_s7]]   ;;  %s6937_s7 = smov 38  }
  0x33   :  { %7802 = sst [smem:[#allocation50_spill]] %s7099_s9 }
  0x34   :  { %7803 = sst [smem:[#allocation51_spill]] %s7109_s13 }
  0x35   :  { %s7119_s9 = sld [smem:[%s7760_s0 + %s6928_s28]]   ;;  %s6932_s28 = smov 33  }
  0x36   :  { %s7129_s13 = sld [smem:[%s7760_s0 + %s6930_s15]]   ;;  %s6934_s15 = smov 35  }
  0x37   :  { %s7154_s21 = sld [smem:[%s7760_s0 + %s6935_s22]]   ;;  %s6939_s22 = smov 40  }
  0x38   :  { %7806 = sst [smem:[#allocation54_spill]] %s7144_s24 }
  0x39   :  { %s7164_s24 = sld [smem:[%s7760_s0 + %s6937_s7]]  }
  0x3a   :  { %s7174_s3 = sld [smem:[%s7760_s0 + %s6939_s22]]  }
  0x3b   :  { %7804 = sst [smem:[#allocation52_spill]] %s7119_s9 }
  0x3c   :  { %7805 = sst [smem:[#allocation53_spill]] %s7129_s13 }
  0x3d   :  { %s7139_s9 = sld [smem:[%s7760_s0 + %s6932_s28]]   ;;  %s6936_s28 = smov 37  }
  0x3e   :  { %s7149_s13 = sld [smem:[%s7760_s0 + %s6934_s15]]   ;;  %s6938_s15 = smov 39  }
  0x3f   :  { %s7159_s8 = sld [smem:[%s7760_s0 + %s6936_s28]]   ;;  %s6940_s28 = smov 41  }
  0x40   :  { %s7169_s29 = sld [smem:[%s7760_s0 + %s6938_s15]]  }
  0x45   :  { %7807 = sst [smem:[#allocation55_spill]] %s7159_s8 }
  0x46   :  { %s7179_s8 = sld [smem:[%s7760_s0 + %s6940_s28]]  }
  0x47   :  { %89 = vsyncpa [#allocation3], 0 }
  0x48   :  { %90 = vsyncpa [#allocation5], 0 }
  0x49   :  { %91 = vsyncpa [#allocation8], 0 }
  0x4a   :  { %92 = vsyncpa [#allocation11], 0 }
  0x4b   :  { %93 = vsyncpa [#allocation14], 0 }
  0x4c   :  { %94 = vsyncpa [#allocation17], 0 }
  0x4d   :  { %95 = vsyncpa [#allocation20], 0 }
  0x4e   :  { %96 = vsyncpa [#allocation23], 0  ;;  %s7181_s7 = smov 0  }
  0x4f LB: > { %s6941_s0 = smov [#allocation4]   ;;  %s7187_s11 = sadd.s32 4294967295, %s6898_s7   ;;  %s6898_s7 = sphi %s7181_s7, %s102_s7  }
  0x50   : > { %s1088_s10 = sshll.u32 %s6941_s0, 4  ;;  %p5293_p0 = scmp.ge.s32.totalorder %s6898_s7, 1  ;;  %s7192_s10 = int_to_ptr.vmem [resolvable:$true] %s1088_s10 }
  0x51   : > { %p1019_p1 = scmp.lt.s32.totalorder %s6898_s7, 3  ;;  %p7774_p2 = scmp.eq.s32.totalorder %s7187_s11, 0 }
  0x52   : > { %s6942_s16 = smov [#allocation7]   ;;  %s6943_s22 = smov [#allocation10]  }
  0x53   : > { %p7194_p3 = pnand %p5293_p0, %p1019_p1  ;;  %s1113_s18 = sshll.u32 %s6942_s16, 4  ;;  %s7200_s18 = int_to_ptr.vmem [resolvable:$true] %s1113_s18 }
  0x54   : > { %s1138_s23 = sshll.u32 %s6943_s22, 4  ;;  %s6944_s28 = smov [#allocation13]   ;;  %s7208_s23 = int_to_ptr.vmem [resolvable:$true] %s1138_s23 }
  0x55   : > { %s7808_s15 = scalar_select %p7194_p3, 1, 0 }
  0x56   : > { %p6247_p4 = pneg %p7194_p3  ;;  %s1166_s1 = sshll.u32 %s6944_s28, 4  ;;  %s7210_s1 = int_to_ptr.vmem [resolvable:$true] %s1166_s1 }
  0x57   : > { %s6468_s2 = scalar_lea.hbm %s7074_s27, 16 }
  0x58   : > { %p7204_p5 = pnand %p7774_p2, %p6247_p4  ;;  %p6469_p6 = scmp.ne.s32.totalorder %s7074_s27, %s6468_s2 }
  0x59   : > { %p6475_p10 = scmp.lt.u32.totalorder %s6468_s2, %s7074_s27 }
  0x5a   : > { %p7216_p7 = pneg %p7204_p5 }
  0x5c   : > { %p6471_p8 = pnand %p7216_p7, %p6469_p6 }
  0x5e   : > { %p6472_p9 = pneg %p6471_p8 }
  0x60   : > { %p6477_p11 = pnand %p6475_p10, %p6472_p9 }
  0x62   : > { %6480 = shalt.err (!%p6477_p11)
}
  0x63   : > { %s6481_s16 = scalar_lea.vmem %s7192_s10, 16  ;;  %s6488_s22 = scalar_lea.vmem %s7192_s10, 32 }
  0x64   : > { %p6482_p12 = scmp.ne.s32.totalorder %s7192_s10, %s6481_s16  ;;  %p6489_p1 = scmp.lt.s32.totalorder %s7192_s10, %s7192_s10 }
  0x65   : > { %p6490_p4 = scmp.lt.s32.totalorder %s6488_s22, %s6481_s16 }
  0x66   : > { %p6484_p13 = pnand %p6482_p12, %p7216_p7 }
  0x67   : > { %p6491_p2 = por %p6490_p4, %p6489_p1 }
  0x68   : > { %p6485_p0 = pneg %p6484_p13 }
  0x6a   : > { %p6492_p6 = pnand %p6491_p2, %p6485_p0 }
  0x6c   : > { %6495 = shalt.err (!%p6492_p6)
}
  0x6d   : > { %6253 = dma.hbm_to_vmem [thread:$0]  (!%p7204_p5), %s7074_s27, 16, %s7192_s10, [#allocation5]  }
  0x6e   : > { %s6496_s28 = scalar_lea.hbm %s7089_s20, 16 }
  0x6f   : > { %p6497_p8 = scmp.ne.s32.totalorder %s7089_s20, %s6496_s28  ;;  %p6503_p11 = scmp.lt.u32.totalorder %s6496_s28, %s7089_s20 }
  0x71   : > { %p6499_p9 = pnand %p6497_p8, %p7216_p7 }
  0x73   : > { %p6500_p10 = pneg %p6499_p9 }
  0x75   : > { %p6505_p12 = pnand %p6503_p11, %p6500_p10 }
  0x77   : > { %6508 = shalt.err (!%p6505_p12)
}
  0x78   : > { %s6509_s2 = scalar_lea.vmem %s7200_s18, 16  ;;  %s6516_s16 = scalar_lea.vmem %s7200_s18, 32 }
  0x79   : > { %p6510_p2 = scmp.ne.s32.totalorder %s7200_s18, %s6509_s2  ;;  %p6517_p1 = scmp.lt.s32.totalorder %s7200_s18, %s7200_s18 }
  0x7a   : > { %p6518_p4 = scmp.lt.s32.totalorder %s6516_s16, %s6509_s2 }
  0x7b   : > { %p6512_p13 = pnand %p6510_p2, %p7216_p7 }
  0x7c   : > { %p6519_p6 = por %p6518_p4, %p6517_p1 }
  0x7d   : > { %p6513_p0 = pneg %p6512_p13 }
  0x7f   : > { %p6520_p8 = pnand %p6519_p6, %p6513_p0 }
  0x81   : > { %6523 = shalt.err (!%p6520_p8)
}
  0x82   : > { %6259 = dma.hbm_to_vmem [thread:$0]  (!%p7204_p5), %s7089_s20, 16, %s7200_s18, [#allocation8]  }
  0x83   : > { %s6524_s10 = scalar_lea.hbm %s7104_s6, 16 }
  0x84   : > { %p6525_p9 = scmp.ne.s32.totalorder %s7104_s6, %s6524_s10  ;;  %p6531_p12 = scmp.lt.u32.totalorder %s6524_s10, %s7104_s6 }
  0x86   : > { %p6527_p10 = pnand %p6525_p9, %p7216_p7 }
  0x88   : > { %p6528_p11 = pneg %p6527_p10 }
  0x8a   : > { %p6533_p2 = pnand %p6531_p12, %p6528_p11 }
  0x8c   : > { %6536 = shalt.err (!%p6533_p2)
}
  0x8d   : > { %s6537_s22 = scalar_lea.vmem %s7208_s23, 16  ;;  %s6544_s28 = scalar_lea.vmem %s7208_s23, 32 }
  0x8e   : > { %p6538_p13 = scmp.ne.s32.totalorder %s7208_s23, %s6537_s22  ;;  %p6545_p4 = scmp.lt.s32.totalorder %s7208_s23, %s7208_s23 }
  0x8f   : > { %p6546_p6 = scmp.lt.s32.totalorder %s6544_s28, %s6537_s22 }
  0x90   : > { %p6540_p0 = pnand %p6538_p13, %p7216_p7 }
  0x91   : > { %p6547_p8 = por %p6546_p6, %p6545_p4 }
  0x92   : > { %p6541_p1 = pneg %p6540_p0 }
  0x94   : > { %p6548_p9 = pnand %p6547_p8, %p6541_p1 }
  0x96   : > { %6551 = shalt.err (!%p6548_p9)
}
  0x97   : > { %6265 = dma.hbm_to_vmem [thread:$0]  (!%p7204_p5), %s7104_s6, 16, %s7208_s23, [#allocation11]  }
  0x98   : > { %s6552_s18 = scalar_lea.hbm %s7124_s19, 16 }
  0x99   : > { %p6553_p10 = scmp.ne.s32.totalorder %s7124_s19, %s6552_s18  ;;  %p6559_p2 = scmp.lt.u32.totalorder %s6552_s18, %s7124_s19 }
  0x9b   : > { %p6555_p11 = pnand %p6553_p10, %p7216_p7 }
  0x9d   : > { %p6556_p12 = pneg %p6555_p11 }
  0x9f   : > { %p6561_p13 = pnand %p6559_p2, %p6556_p12 }
  0xa1   : > { %6564 = shalt.err (!%p6561_p13)
}
  0xa2   : > { %s6565_s2 = scalar_lea.vmem %s7210_s1, 16  ;;  %s6572_s16 = scalar_lea.vmem %s7210_s1, 32 }
  0xa3   : > { %p6566_p0 = scmp.ne.s32.totalorder %s7210_s1, %s6565_s2  ;;  %p6573_p6 = scmp.lt.s32.totalorder %s7210_s1, %s7210_s1 }
  0xa4   : > { %p6574_p8 = scmp.lt.s32.totalorder %s6572_s16, %s6565_s2 }
  0xa5   : > { %p6568_p1 = pnand %p6566_p0, %p7216_p7 }
  0xa6   : > { %p6575_p9 = por %p6574_p8, %p6573_p6 }
  0xa7   : > { %p6569_p4 = pneg %p6568_p1 }
  0xa9   : > { %p6576_p10 = pnand %p6575_p9, %p6569_p4 }
  0xab   : > { %6579 = shalt.err (!%p6576_p10)
}
  0xac   : > { %6271 = dma.hbm_to_vmem [thread:$0]  (!%p7204_p5), %s7124_s19, 16, %s7210_s1, [#allocation14]  }
  0xad   : > { %s6945_s23 = smov [#allocation16]   ;;  %s6946_s22 = smov [#allocation19]  }
  0xae   : > { %s1191_s10 = sshll.u32 %s6945_s23, 4  ;;  %s1216_s28 = sshll.u32 %s6946_s22, 4  ;;  %s1192_s10 = int_to_ptr.vmem [resolvable:$true] %s1191_s10  ;;  %s1217_s28 = int_to_ptr.vmem [resolvable:$true] %s1216_s28 }
  0xaf   : > { %s6580_s18 = scalar_lea.hbm %s7139_s9, 16 }
  0xb0   : > { %p6581_p11 = scmp.ne.s32.totalorder %s7139_s9, %s6580_s18  ;;  %p6587_p13 = scmp.lt.u32.totalorder %s6580_s18, %s7139_s9 }
  0xb2   : > { %p6583_p12 = pnand %p6581_p11, %p7216_p7 }
  0xb4   : > { %p6584_p2 = pneg %p6583_p12 }
  0xb6   : > { %p6589_p0 = pnand %p6587_p13, %p6584_p2 }
  0xb8   : > { %6592 = shalt.err (!%p6589_p0)
}
  0xb9   : > { %s6593_s2 = scalar_lea.vmem %s1192_s10, 16  ;;  %s6600_s1 = scalar_lea.vmem %s1192_s10, 32 }
  0xba   : > { %p6594_p1 = scmp.ne.s32.totalorder %s1192_s10, %s6593_s2  ;;  %p6601_p8 = scmp.lt.s32.totalorder %s1192_s10, %s1192_s10 }
  0xbb   : > { %p6602_p9 = scmp.lt.s32.totalorder %s6600_s1, %s6593_s2 }
  0xbc   : > { %p6596_p4 = pnand %p6594_p1, %p7216_p7 }
  0xbd   : > { %p6603_p10 = por %p6602_p9, %p6601_p8 }
  0xbe   : > { %p6597_p6 = pneg %p6596_p4 }
  0xc0   : > { %p6604_p3 = pnand %p6603_p10, %p6597_p6 }
  0xc2   : > { %6607 = shalt.err (!%p6604_p3)
}
  0xc3   : > { %6277 = dma.hbm_to_vmem [thread:$0]  (!%p7204_p5), %s7139_s9, 16, %s1192_s10, [#allocation17]  }
  0xc4   : > { %s6608_s16 = scalar_lea.hbm %s7154_s21, 16 }
  0xc5   : > { %p6609_p11 = scmp.ne.s32.totalorder %s7154_s21, %s6608_s16  ;;  %p6615_p13 = scmp.lt.u32.totalorder %s6608_s16, %s7154_s21 }
  0xc7   : > { %p6611_p12 = pnand %p6609_p11, %p7216_p7 }
  0xc9   : > { %p6612_p2 = pneg %p6611_p12 }
  0xcb   : > { %p6617_p0 = pnand %p6615_p13, %p6612_p2 }
  0xcd   : > { %6620 = shalt.err (!%p6617_p0)
}
  0xce   : > { %s6621_s23 = scalar_lea.vmem %s1217_s28, 16  ;;  %s6628_s22 = scalar_lea.vmem %s1217_s28, 32 }
  0xcf   : > { %p6622_p3 = scmp.ne.s32.totalorder %s1217_s28, %s6621_s23  ;;  %p6629_p6 = scmp.lt.s32.totalorder %s1217_s28, %s1217_s28 }
  0xd0   : > { %p6630_p8 = scmp.lt.s32.totalorder %s6628_s22, %s6621_s23 }
  0xd1   : > { %p6624_p1 = pnand %p6622_p3, %p7216_p7 }
  0xd2   : > { %p6631_p9 = por %p6630_p8, %p6629_p6 }
  0xd3   : > { %p6625_p4 = pneg %p6624_p1 }
  0xd5   : > { %p6632_p10 = pnand %p6631_p9, %p6625_p4 }
  0xd7   : > { %6635 = shalt.err (!%p6632_p10)
}
  0xd8   : > { %6283 = dma.hbm_to_vmem [thread:$0]  (!%p7204_p5), %s7154_s21, 16, %s1217_s28, [#allocation20]  }
  0xd9   : > { %s6947_s10 = smov [#allocation2]   ;;  %s6948_s2 = smov [#allocation6]  }
  0xda   : > { %s1074_s18 = sshll.u32 %s6947_s10, 4  ;;  %s1102_s1 = sshll.u32 %s6948_s2, 4  ;;  %s1075_s18 = int_to_ptr.vmem [resolvable:$true] %s1074_s18  ;;  %s1103_s1 = int_to_ptr.vmem [resolvable:$true] %s1102_s1 }
  0xdb   : > { %s6636_s16 = scalar_lea.hbm %s7064_s17, 16 }
  0xdc   : > { %p6637_p11 = scmp.ne.s32.totalorder %s7064_s17, %s6636_s16  ;;  %p6643_p13 = scmp.lt.u32.totalorder %s6636_s16, %s7064_s17 }
  0xde   : > { %p6639_p12 = pnand %p6637_p11, %p7216_p7 }
  0xe0   : > { %p6640_p2 = pneg %p6639_p12 }
  0xe2   : > { %p6645_p0 = pnand %p6643_p13, %p6640_p2 }
  0xe4   : > { %6648 = shalt.err (!%p6645_p0)
}
  0xe5   : > { %s6649_s23 = scalar_lea.vmem %s1075_s18, 16  ;;  %s6656_s28 = scalar_lea.vmem %s1075_s18, 32 }
  0xe6   : > { %p6650_p3 = scmp.ne.s32.totalorder %s1075_s18, %s6649_s23  ;;  %p6657_p6 = scmp.lt.s32.totalorder %s1075_s18, %s1075_s18 }
  0xe7   : > { %p6658_p8 = scmp.lt.s32.totalorder %s6656_s28, %s6649_s23 }
  0xe8   : > { %p6652_p1 = pnand %p6650_p3, %p7216_p7 }
  0xe9   : > { %p6659_p9 = por %p6658_p8, %p6657_p6 }
  0xea   : > { %p6653_p4 = pneg %p6652_p1 }
  0xec   : > { %p6660_p10 = pnand %p6659_p9, %p6653_p4 }
  0xee   : > { %6663 = shalt.err (!%p6660_p10)
}
  0xef   : > { %6250 = dma.hbm_to_vmem [thread:$0]  (!%p7204_p5), %s7064_s17, 16, %s1075_s18, [#allocation3]  }
  0xf0   : > { %s6664_s22 = scalar_lea.hbm %s7084_s4, 16 }
  0xf1   : > { %p6665_p11 = scmp.ne.s32.totalorder %s7084_s4, %s6664_s22  ;;  %p6671_p13 = scmp.lt.u32.totalorder %s6664_s22, %s7084_s4 }
  0xf3   : > { %p6667_p12 = pnand %p6665_p11, %p7216_p7 }
  0xf5   : > { %p6668_p2 = pneg %p6667_p12 }
  0xf7   : > { %p6673_p0 = pnand %p6671_p13, %p6668_p2 }
  0xf9   : > { %6676 = shalt.err (!%p6673_p0)
}
  0xfa   : > { %s6677_s10 = scalar_lea.vmem %s1103_s1, 16  ;;  %s6684_s2 = scalar_lea.vmem %s1103_s1, 32 }
  0xfb   : > { %p6678_p3 = scmp.ne.s32.totalorder %s1103_s1, %s6677_s10  ;;  %p6685_p6 = scmp.lt.s32.totalorder %s1103_s1, %s1103_s1 }
  0xfc   : > { %p6686_p8 = scmp.lt.s32.totalorder %s6684_s2, %s6677_s10 }
  0xfd   : > { %p6680_p1 = pnand %p6678_p3, %p7216_p7 }
  0xfe   : > { %p6687_p9 = por %p6686_p8, %p6685_p6 }
  0xff   : > { %p6681_p4 = pneg %p6680_p1 }
 0x101   : > { %p6688_p10 = pnand %p6687_p9, %p6681_p4 }
 0x103   : > { %6691 = shalt.err (!%p6688_p10)
}
 0x104   : > { %6256 = dma.hbm_to_vmem [thread:$0]  (!%p7204_p5), %s7084_s4, 16, %s1103_s1, [#allocation5]  }
 0x105   : > { %s6949_s18 = smov [#allocation9]   ;;  %s6950_s23 = smov [#allocation12]  }
 0x106   : > { %s1124_s16 = sshll.u32 %s6949_s18, 4  ;;  %s1152_s28 = sshll.u32 %s6950_s23, 4  ;;  %s1125_s16 = int_to_ptr.vmem [resolvable:$true] %s1124_s16  ;;  %s1153_s28 = int_to_ptr.vmem [resolvable:$true] %s1152_s28 }
 0x107   : > { %s6692_s22 = scalar_lea.hbm %s7094_s12, 16 }
 0x108   : > { %p6693_p11 = scmp.ne.s32.totalorder %s7094_s12, %s6692_s22  ;;  %p6699_p13 = scmp.lt.u32.totalorder %s6692_s22, %s7094_s12 }
 0x10a   : > { %p6695_p12 = pnand %p6693_p11, %p7216_p7 }
 0x10c   : > { %p6696_p2 = pneg %p6695_p12 }
 0x10e   : > { %p6701_p0 = pnand %p6699_p13, %p6696_p2 }
 0x110   : > { %6704 = shalt.err (!%p6701_p0)
}
 0x111   : > { %s6705_s10 = scalar_lea.vmem %s1125_s16, 16  ;;  %s6712_s1 = scalar_lea.vmem %s1125_s16, 32 }
 0x112   : > { %p6706_p3 = scmp.ne.s32.totalorder %s1125_s16, %s6705_s10  ;;  %p6713_p6 = scmp.lt.s32.totalorder %s1125_s16, %s1125_s16 }
 0x113   : > { %p6714_p8 = scmp.lt.s32.totalorder %s6712_s1, %s6705_s10 }
 0x114   : > { %p6708_p1 = pnand %p6706_p3, %p7216_p7 }
 0x115   : > { %p6715_p9 = por %p6714_p8, %p6713_p6 }
 0x116   : > { %p6709_p4 = pneg %p6708_p1 }
 0x118   : > { %p6716_p10 = pnand %p6715_p9, %p6709_p4 }
 0x11a   : > { %6719 = shalt.err (!%p6716_p10)
}
 0x11b   : > { %6262 = dma.hbm_to_vmem [thread:$0]  (!%p7204_p5), %s7094_s12, 16, %s1125_s16, [#allocation8]  }
 0x11c   : > { %s6720_s2 = scalar_lea.hbm %s7114_s30, 16 }
 0x11d   : > { %p6721_p11 = scmp.ne.s32.totalorder %s7114_s30, %s6720_s2  ;;  %p6727_p13 = scmp.lt.u32.totalorder %s6720_s2, %s7114_s30 }
 0x11f   : > { %p6723_p12 = pnand %p6721_p11, %p7216_p7 }
 0x121   : > { %p6724_p2 = pneg %p6723_p12 }
 0x123   : > { %p6729_p0 = pnand %p6727_p13, %p6724_p2 }
 0x125   : > { %6732 = shalt.err (!%p6729_p0)
}
 0x126   : > { %s6733_s18 = scalar_lea.vmem %s1153_s28, 16  ;;  %s6740_s23 = scalar_lea.vmem %s1153_s28, 32 }
 0x127   : > { %p6734_p3 = scmp.ne.s32.totalorder %s1153_s28, %s6733_s18  ;;  %p6741_p6 = scmp.lt.s32.totalorder %s1153_s28, %s1153_s28 }
 0x128   : > { %p6742_p8 = scmp.lt.s32.totalorder %s6740_s23, %s6733_s18 }
 0x129   : > { %p6736_p1 = pnand %p6734_p3, %p7216_p7 }
 0x12a   : > { %p6743_p9 = por %p6742_p8, %p6741_p6 }
 0x12b   : > { %p6737_p4 = pneg %p6736_p1 }
 0x12d   : > { %p6744_p10 = pnand %p6743_p9, %p6737_p4 }
 0x12f   : > { %6747 = shalt.err (!%p6744_p10)
}
 0x130   : > { %6268 = dma.hbm_to_vmem [thread:$0]  (!%p7204_p5), %s7114_s30, 16, %s1153_s28, [#allocation11]  }
 0x131   : > { %s6951_s16 = smov [#allocation15]   ;;  %s6952_s10 = smov [#allocation18]  }
 0x132   : > { %s1180_s22 = sshll.u32 %s6951_s16, 4  ;;  %s1205_s1 = sshll.u32 %s6952_s10, 4  ;;  %s1181_s22 = int_to_ptr.vmem [resolvable:$true] %s1180_s22  ;;  %s1206_s1 = int_to_ptr.vmem [resolvable:$true] %s1205_s1 }
 0x133   : > { %s6748_s2 = scalar_lea.hbm %s7134_s14, 16 }
 0x134   : > { %p6749_p11 = scmp.ne.s32.totalorder %s7134_s14, %s6748_s2  ;;  %p6755_p13 = scmp.lt.u32.totalorder %s6748_s2, %s7134_s14 }
 0x136   : > { %p6751_p12 = pnand %p6749_p11, %p7216_p7 }
 0x138   : > { %p6752_p2 = pneg %p6751_p12 }
 0x13a   : > { %p6757_p0 = pnand %p6755_p13, %p6752_p2 }
 0x13c   : > { %6760 = shalt.err (!%p6757_p0)
}
 0x13d   : > { %s6761_s18 = scalar_lea.vmem %s1181_s22, 16  ;;  %s6768_s28 = scalar_lea.vmem %s1181_s22, 32 }
 0x13e   : > { %p6762_p3 = scmp.ne.s32.totalorder %s1181_s22, %s6761_s18  ;;  %p6769_p6 = scmp.lt.s32.totalorder %s1181_s22, %s1181_s22 }
 0x13f   : > { %p6770_p8 = scmp.lt.s32.totalorder %s6768_s28, %s6761_s18 }
 0x140   : > { %p6764_p1 = pnand %p6762_p3, %p7216_p7 }
 0x141   : > { %p6771_p9 = por %p6770_p8, %p6769_p6 }
 0x142   : > { %p6765_p4 = pneg %p6764_p1 }
 0x144   : > { %p6772_p10 = pnand %p6771_p9, %p6765_p4 }
 0x146   : > { %6775 = shalt.err (!%p6772_p10)
}
 0x147   : > { %6274 = dma.hbm_to_vmem [thread:$0]  (!%p7204_p5), %s7134_s14, 16, %s1181_s22, [#allocation14]  }
 0x148   : > { %s6776_s23 = scalar_lea.hbm %s7149_s13, 16 }
 0x149   : > { %p6777_p11 = scmp.ne.s32.totalorder %s7149_s13, %s6776_s23  ;;  %p6783_p13 = scmp.lt.u32.totalorder %s6776_s23, %s7149_s13 }
 0x14b   : > { %p6779_p12 = pnand %p6777_p11, %p7216_p7 }
 0x14d   : > { %p6780_p2 = pneg %p6779_p12 }
 0x14f   : > { %p6785_p0 = pnand %p6783_p13, %p6780_p2 }
 0x151   : > { %6788 = shalt.err (!%p6785_p0)
}
 0x152   : > { %s6789_s16 = scalar_lea.vmem %s1206_s1, 16  ;;  %s6796_s10 = scalar_lea.vmem %s1206_s1, 32 }
 0x153   : > { %p6790_p3 = scmp.ne.s32.totalorder %s1206_s1, %s6789_s16  ;;  %p6797_p6 = scmp.lt.s32.totalorder %s1206_s1, %s1206_s1 }
 0x154   : > { %p6798_p8 = scmp.lt.s32.totalorder %s6796_s10, %s6789_s16 }
 0x155   : > { %p6792_p1 = pnand %p6790_p3, %p7216_p7 }
 0x156   : > { %p6799_p9 = por %p6798_p8, %p6797_p6 }
 0x157   : > { %p6793_p4 = pneg %p6792_p1 }
 0x159   : > { %p6800_p10 = pnand %p6799_p9, %p6793_p4 }
 0x15b   : > { %6803 = shalt.err (!%p6800_p10)
}
 0x15c   : > { %6280 = dma.hbm_to_vmem [thread:$0]  (!%p7204_p5), %s7149_s13, 16, %s1206_s1, [#allocation17]  }
 0x15d   : > { %s6953_s22 = smov [#allocation21]   ;;  %s6954_s18 = smov [#allocation22]  }
 0x15e   : > { %s1230_s2 = sshll.u32 %s6953_s22, 4  ;;  %s1241_s28 = sshll.u32 %s6954_s18, 4  ;;  %s1231_s2 = int_to_ptr.vmem [resolvable:$true] %s1230_s2  ;;  %s1242_s28 = int_to_ptr.vmem [resolvable:$true] %s1241_s28 }
 0x15f   : > { %s6804_s23 = scalar_lea.hbm %s7164_s24, 16 }
 0x160   : > { %p6805_p11 = scmp.ne.s32.totalorder %s7164_s24, %s6804_s23  ;;  %p6811_p13 = scmp.lt.u32.totalorder %s6804_s23, %s7164_s24 }
 0x162   : > { %p6807_p12 = pnand %p6805_p11, %p7216_p7 }
 0x164   : > { %p6808_p2 = pneg %p6807_p12 }
 0x166   : > { %p6813_p0 = pnand %p6811_p13, %p6808_p2 }
 0x168   : > { %6816 = shalt.err (!%p6813_p0)
}
 0x169   : > { %s6817_s16 = scalar_lea.vmem %s1231_s2, 16  ;;  %s6824_s1 = scalar_lea.vmem %s1231_s2, 32 }
 0x16a   : > { %p6818_p3 = scmp.ne.s32.totalorder %s1231_s2, %s6817_s16  ;;  %p6825_p6 = scmp.lt.s32.totalorder %s1231_s2, %s1231_s2 }
 0x16b   : > { %p6826_p8 = scmp.lt.s32.totalorder %s6824_s1, %s6817_s16 }
 0x16c   : > { %p6820_p1 = pnand %p6818_p3, %p7216_p7 }
 0x16d   : > { %p6827_p9 = por %p6826_p8, %p6825_p6 }
 0x16e   : > { %p6821_p4 = pneg %p6820_p1 }
 0x170   : > { %p6828_p10 = pnand %p6827_p9, %p6821_p4 }
 0x172   : > { %6831 = shalt.err (!%p6828_p10)
}
 0x173   : > { %6286 = dma.hbm_to_vmem [thread:$0]  (!%p7204_p5), %s7164_s24, 16, %s1231_s2, [#allocation20]  }
 0x174   : > { %s6832_s10 = scalar_lea.hbm %s7169_s29, 16 }
 0x175   : > { %p6833_p11 = scmp.ne.s32.totalorder %s7169_s29, %s6832_s10  ;;  %p6839_p13 = scmp.lt.u32.totalorder %s6832_s10, %s7169_s29 }
 0x177   : > { %p6835_p12 = pnand %p6833_p11, %p7216_p7 }
 0x179   : > { %p6836_p2 = pneg %p6835_p12 }
 0x17b   : > { %p6841_p0 = pnand %p6839_p13, %p6836_p2 }
 0x17d   : > { %6844 = shalt.err (!%p6841_p0)
}
 0x17e   : > { %s6845_s22 = scalar_lea.vmem %s1242_s28, 16  ;;  %s6852_s18 = scalar_lea.vmem %s1242_s28, 32 }
 0x17f   : > { %p6846_p3 = scmp.ne.s32.totalorder %s1242_s28, %s6845_s22  ;;  %p6853_p6 = scmp.lt.s32.totalorder %s1242_s28, %s1242_s28 }
 0x180   : > { %p6854_p8 = scmp.lt.s32.totalorder %s6852_s18, %s6845_s22 }
 0x181   : > { %p6848_p1 = pnand %p6846_p3, %p7216_p7 }
 0x182   : > { %p6855_p9 = por %p6854_p8, %p6853_p6 }
 0x183   : > { %p6849_p4 = pneg %p6848_p1 }
 0x185   : > { %p6856_p10 = pnand %p6855_p9, %p6849_p4 }
 0x187   : > { %6859 = shalt.err (!%p6856_p10)
}
 0x188   : > { %6289 = dma.hbm_to_vmem [thread:$0]  (!%p7204_p5), %s7169_s29, 16, %s1242_s28, [#allocation23]  }
 0x189   : > { %p7811_p11 = scmp.ne.s32.totalorder %s7808_s15, 0 }
 0x18a   : > { %p7812_p12 = scmp.eq.s32.totalorder (!%p7811_p11), %s7187_s11, 0 }
 0x18b   : > { %1281 = sbr.rel (%p7811_p11) target bundleno = 6578 (0x19b2), region = 180 }
 0x192   : > { %6865 = dma.done.wait (%p7812_p12), [#allocation3], 16   ;;  %p7813_p2 = pmov %p7812_p12 }
 0x194   : > { %6867 = vsyncadd (%p7813_p2), [#allocation3], 4294967280  ;;  %p7814_p7 = pmov %p7813_p2 }
 0x195   : > { %p7815_p13 = pmov %p7813_p2 }
 0x196   : > { %6869 = dma.done.wait (%p7814_p7), [#allocation5], 32  }
 0x197   : > { %6871 = vsyncadd (%p7815_p13), [#allocation5], 4294967264  ;;  %p7816_p0 = pmov %p7813_p2 }
 0x199   : > { %6873 = dma.done.wait (%p7816_p0), [#allocation8], 32   ;;  %p7817_p5 = pmov %p7816_p0 }
 0x19a   : > { %p7818_p3 = pmov %p7816_p0 }
 0x19b   : > { %6875 = vsyncadd (%p7817_p5), [#allocation8], 4294967264 }
 0x19c   : > { %6877 = dma.done.wait (%p7818_p3), [#allocation11], 32   ;;  %p7819_p1 = pmov %p7816_p0 }
 0x19d   : > { %p7820_p4 = pmov %p7816_p0 }
 0x19e   : > { %6879 = vsyncadd (%p7819_p1), [#allocation11], 4294967264 }
 0x19f   : > { %6881 = dma.done.wait (%p7820_p4), [#allocation14], 32   ;;  %p7821_p6 = pmov %p7816_p0 }
 0x1a0   : > { %p7822_p8 = pmov %p7816_p0 }
 0x1a1   : > { %6883 = vsyncadd (%p7821_p6), [#allocation14], 4294967264 }
 0x1a2   : > { %6885 = dma.done.wait (%p7822_p8), [#allocation17], 32   ;;  %p7823_p9 = pmov %p7816_p0 }
 0x1a3   : > { %p7824_p10 = pmov %p7816_p0 }
 0x1a4   : > { %6887 = vsyncadd (%p7823_p9), [#allocation17], 4294967264 }
 0x1a5   : > { %6889 = dma.done.wait (%p7824_p10), [#allocation20], 32   ;;  %p7825_p11 = pmov %p7816_p0 }
 0x1a6   : > { %p7826_p12 = pmov %p7816_p0 }
 0x1a7   : > { %6891 = vsyncadd (%p7825_p11), [#allocation20], 4294967264 }
 0x1a8   : > { %6893 = dma.done.wait (%p7826_p12), [#allocation23], 16   ;;  %p7827_p2 = pmov %p7816_p0 }
 0x1a9   : > { %s7828_s15 = sld [smem:[#allocation37_spill]]  ;;  %p1448_p7 = scmp.lt.s32.totalorder %s7187_s11, 1  ;;  %vm1485_vm0 = vcmask 130048   ;;  %v1476_v0 = vld [vmem:[%s6999_s25] sm:$0xff]  ;;  %v1477_v1 = vld [vmem:[%s6999_s25 + $0x8] sm:$0xff]  ;;  %vm1580_vm1 = vcmask 261120  }
 0x1aa   : > { %6895 = vsyncadd (%p7827_p2), [#allocation23], 4294967280  ;;  %v5961_v3 = vpack.c.bf16 %v1477_v1, %v1476_v0  ;;  %s7829_s2 = sld [smem:[#allocation36_spill]]  ;;  %s7830_s28 = sld [smem:[#allocation38_spill]]  ;;  %vm6962_vm5 = vmmov 0   ;;  %vm2721_vm6 = vcmask 64512  }
 0x1ab   : > { %s7858_s11 = smov (!%p1448_p7, %s7187_s11), 1  ;;  %s7831_s23 = sld [smem:[#allocation35_spill]]  ;;  %vm7471_vm2 = vmpackc.low %vm1485_vm0, %vm1485_vm0  ;;  %vm3374_vm7 = vcmask 523264   ;;  %vm3561_vm8 = vcmask 1041408   ;;  %vm3576_vm9 = vcmask 1046528   ;;  %vm3743_vm10 = vcmask 1045504  }
 0x1ac   : > { %s7421_s26 = sshll.u32 %s7858_s11, 4  ;;  %5962 = vmatprep.subr.bf16.mxu0 %v5961_v3  ;;  %s7832_s16 = sld [smem:[#allocation41_spill]]  ;;  %vm3833_vm11 = vcmask 1044480   ;;  %vm3923_vm12 = vcmask 1043456   ;;  %vm4990_vm13 = vcmask 138240   ;;  %vm4993_vm14 = vcmask 269312  }
 0x1ad   : > { %s1452_s0 = scalar_lea.vmem %s6974_s5, %s7421_s26  ;;  %5964 = vmatpush3.bf16.msra.mxu0 %v5961_v3  ;;  %s7833_s1 = sld [smem:[#allocation39_spill]] }
 0x1ae   : > { %v1473_v2 = vld [vmem:[%s1452_s0] sm:$0xff]  ;;  %v1474_v7 = vld [vmem:[%s1452_s0 + $0x8] sm:$0xff]  ;;  %s7834_s10 = sld [smem:[#allocation40_spill]]  ;;  %s7835_s22 = sld [smem:[#allocation42_spill]] }
 0x1af   : > { %5652 = vmatprep.mubr.msk.f32.mxu0 %vm1485_vm0, %v1473_v2  ;;  %v1569_v4 = vld [vmem:[%s7828_s15] sm:$0xff]  ;;  %v1570_v5 = vld [vmem:[%s7828_s15 + $0x8] sm:$0xff]  ;;  %v1571_v8 = vld [vmem:[%s7828_s15 + $0x10] sm:$0xff]  ;;  %s7777_s18 = smov 96   ;;  %s7776_s0 = smov 80  }
 0x1b0   : > { %v5965_v6 = vpack.c.bf16 %v1570_v5, %v1569_v4  ;;  %5653 = vmatmul.mubr.msk.f32.vlgmr.msra.gmra.mrb[0].mxu0 %vm1485_vm0, %v1474_v7  ;;  %v1572_v9 = vld [vmem:[%s7828_s15 + $0x18] sm:$0xff]  ;;  %v5331_v11 = vld [vmem:[%s7829_s2] ss:$0 sm:$0xff]  ;;  %s7836_s2 = sld [smem:[#allocation33_spill]] }
 0x1b1   : > { %v5969_v10 = vpack.c.bf16 %v1572_v9, %v1571_v8  ;;  %v5334_v18 = vld [vmem:[%s7830_s28] ss:$0 sm:$0xff]  ;;  %v1665_v26 = vld [vmem:[%s7831_s23 + $0x8] sm:$0xff]  ;;  %s7778_s28 = smov 112  }
 0x1b2   : > { %5966 = vmatprep.subr.bf16.mxu1 %v5965_v6  ;;  %v1664_v23 = vld [vmem:[%s7831_s23] sm:$0xff]  ;;  %v1733_v42 = vld [vmem:[%s7832_s16 + $0x8] sm:$0xff]  ;;  %v1734_v44 = vld [vmem:[%s7832_s16 + $0x10] sm:$0xff] }
 0x1b3   : > { %5968 = vmatpush3.bf16.msra.mxu1 %v5965_v6  ;;  %v1732_v41 = vld [vmem:[%s7832_s16] sm:$0xff]  ;;  %v1735_v45 = vld [vmem:[%s7832_s16 + $0x18] sm:$0xff] }
 0x1b4   : > { %5970 = vmatprep.subr.bf16.mxu1 %v5969_v10  ;;  %v5973_v43 = vpack.c.bf16 %v1733_v42, %v1732_v41  ;;  %v5977_v46 = vpack.c.bf16 %v1735_v45, %v1734_v44  ;;  %v5338_v54 = vld [vmem:[%s7833_s1] ss:$0 sm:$0xff] }
 0x1b5   : > { %v5339_v56 = vld [vmem:[%s7834_s10] ss:$0 sm:$0xff]  ;;  %s6959_s10 = smov 64  }
 0x1b6   : > { %v5340_v63 = vld [vmem:[%s7835_s22] ss:$0 sm:$0xff]  ;;  %s1459_s1 = scalar_lea.vmem %s7836_s2, %s7858_s11  ;;  %s6960_s22 = smov 48  }
 0x1b7   : > { %5972 = vmatpush3.bf16.msra.mxu1 %v5969_v10  ;;  %v1668_v10 = vlaneseq  ;;  %s7839_s2 = sld [smem:[#allocation43_spill]] }
 0x1b8   : > { %5974 = vmatprep.subr.bf16.mxu1 %v5973_v43 }
 0x283   : > { %v5654_v12 = vpop.f32.mrb[0].mxu0 }
 0x284   : > { %v1564_v13 = vadd.f32 %v5654_v12, %v5331_v11  ;;  %v1558_v14 = vpop.f32.mrb[1].mxu0  ;;  %v1672_v12 = vand.u32 127, %v1668_v10 }
 0x285   : > { %v1559_v15 = vadd.f32 %v5331_v11, %v1558_v14  ;;  %v1669_v11 = vshrl.u32 %v1668_v10, 7  ;;  %v6958_v14 = vmov -1e+09  }
 0x286   : > { %v1568_v17 = vmax.f32 %v1564_v13, 0.0 }
 0x287   : > { %v1567_v16 = vmax.f32 %v1559_v15, 0.0  ;;  %v1670_v13 = vadd.s32 8, %v1669_v11  ;;  %vm1673_vm3 = vcmp.le.s32.totalorder %v1672_v12, %v1669_v11 }
 0x288   : > { %v1675_v15 = vsel %vm1673_vm3, 0.0, %v6958_v14 }
 0x289   : > { %5663 = vmatprep.mubr.msk.f32.mxu1 %vm1580_vm1, %v1567_v16  ;;  %vm1674_vm4 = vcmp.le.s32.totalorder %v1672_v12, %v1670_v13  ;;  %v5337_v16 = vld [vmem:[%s1459_s1] ss:$0 sm:$0xff]  ;;  %s7840_s1 = sld [smem:[#allocation44_spill]] }
 0x28a   : > { %5664 = vmatmul.mubr.msk.f32.vlgmr.msra.gmra.mrb[0].mxu1 %vm1580_vm1, %v1568_v17  ;;  %v1676_v17 = vsel %vm1674_vm4, 0.0, %v6958_v14 }
 0x28b   : > { %5976 = vmatpush3.bf16.msra.mxu1 %v5973_v43 }
 0x28c   : > { %5978 = vmatprep.subr.bf16.mxu1 %v5977_v46 }
 0x28f   : > { %5980 = vmatpush3.bf16.msra.mxu1 %v5977_v46 }
 0x35d   : > { %v5665_v19 = vpop.f32.mrb[0].mxu1 }
 0x35e   : > { %v1659_v20 = vadd.f32 %v5665_v19, %v5334_v18  ;;  %v1653_v21 = vpop.f32.mrb[1].mxu1  ;;  %v1684_v19 = vadd.f32 %v5337_v16, %v1675_v15 }
 0x35f   : > { %v1654_v22 = vadd.f32 %v5334_v18, %v1653_v21 }
 0x360   : > { %v1663_v24 = vmax.f32 %v1659_v20, 0.0 }
 0x361   : > { %v1662_v25 = vmax.f32 %v1654_v22, 0.0 }
 0x362   : > { %v7441_v28 = vadd.f32 %v1665_v26, %v1663_v24 }
 0x363   : > { %v7439_v27 = vadd.f32 %v1664_v23, %v1662_v25  ;;  %v1685_v23 = vadd.f32 %v5337_v16, %v1676_v17  ;;  %v2232_v16 = vld [vmem:[%s7839_s2 + $0x10] sm:$0xff]  ;;  %v2233_v17 = vld [vmem:[%s7839_s2 + $0x18] sm:$0xff] }
 0x364   : > { %v1692_v30 = vsel %vm1580_vm1, %v7441_v28, 0.0 }
 0x365   : > { %v1689_v29 = vsel %vm1580_vm1, %v7439_v27, 0.0 }
 0x366   : > { %1690 = vadd.xlane.f32.xlu0 %v1689_v29 }
 0x36a   : > { %1693 = vadd.xlane.f32.xlu0 %v1692_v30 }
 0x3f3   : > { %v1691_v31 = vpop.xlane.xlu0 %1690 }
 0x3f4   : > { %v1696_v32 = vmul.f32 0.03125, %v1691_v31 }
 0x3f6   : > { %v1698_v33 = vsub.f32 %v7439_v27, %v1696_v32 }
 0x3f7   : > { %v1694_v34 = vpop.xlane.xlu0 %1693 }
 0x3f8   : > { %v1697_v35 = vmul.f32 0.03125, %v1694_v34  ;;  %v1700_v36 = vmul.f32 %v1698_v33, %v1698_v33 }
 0x3fa   : > { %v1699_v37 = vsub.f32 %v7441_v28, %v1697_v35  ;;  %v1702_v38 = vsel %vm1580_vm1, %v1700_v36, 0.0 }
 0x3fb   : > { %1703 = vadd.xlane.f32.xlu1 %v1702_v38 }
 0x3fc   : > { %v1701_v39 = vmul.f32 %v1699_v37, %v1699_v37 }
 0x3fe   : > { %v1705_v40 = vsel %vm1580_vm1, %v1701_v39, 0.0 }
 0x3ff   : > { %1706 = vadd.xlane.f32.xlu1 %v1705_v40 }
 0x488   : > { %v1704_v47 = vpop.xlane.xlu1 %1703 }
 0x489   : > { %v1708_v48 = vmul.f32 0.03125, %v1704_v47 }
 0x48b   : > { %v1710_v49 = vadd.f32 1e-05, %v1708_v48 }
 0x48c   : > { %v1707_v50 = vpop.xlane.xlu1 %1706 }
 0x48d   : > { %6412 = vrsqrt.f32 %v1710_v49  ;;  %v1709_v51 = vmul.f32 0.03125, %v1707_v50 }
 0x48f   : > { %v1711_v52 = vadd.f32 1e-05, %v1709_v51 }
 0x491   : > { %6414 = vrsqrt.f32 %v1711_v52 }
 0x497   : > { %v6413_v53 = vpop.eup %6412 }
 0x498   : > { %v1714_v55 = vmul.f32 %v6413_v53, %v1698_v33 }
 0x49a   : > { %v1722_v57 = vmul.f32 %v5338_v54, %v1714_v55 }
 0x49b   : > { %v6415_v58 = vpop.eup %6414 }
 0x49c   : > { %v1715_v59 = vmul.f32 %v6415_v58, %v1699_v37  ;;  %v1730_v60 = vadd.f32 %v5339_v56, %v1722_v57 }
 0x49e   : > { %v1723_v61 = vmul.f32 %v5338_v54, %v1715_v59  ;;  %5674 = vmatprep.mubr.msk.f32.mxu1 %vm1580_vm1, %v1730_v60 }
 0x4a0   : > { %v1731_v62 = vadd.f32 %v5339_v56, %v1723_v61 }
 0x4a2   : > { %5675 = vmatmul.mubr.msk.f32.vlgmr.msra.gmra.mrb[2].mxu1 %vm1580_vm1, %v1731_v62 }
 0x575   : > { %v5676_v0 = vpop.f32.mrb[2].mxu1 }
 0x576   : > { %v1821_v1 = vadd.f32 %v5676_v0, %v5340_v63  ;;  %v1815_v2 = vpop.f32.mrb[3].mxu1 }
 0x577   : > { %v1816_v3 = vadd.f32 %v5340_v63, %v1815_v2 }
 0x579   : > { %5681 = vmatprep.mubr.msk.f32.mxu1 %vm1485_vm0, %v1816_v3  ;;  %v7461_v4 = vpack.i.bf16 %v1821_v1, %v1816_v3 }
 0x57b   : > { %6393 = vrot.lane.b32.xlu0 %v7461_v4, %s7777_s18 }
 0x57f   : > { %6403 = vrot.lane.b32.xlu0 %v7461_v4, %s7776_s0  ;;  %s5326_s0 = sshll.u32 %s7858_s11, 3 }
 0x583   : > { %2028 = vrot.lane.b32.xlu0 %v1816_v3, %s7778_s28 }
 0x587   : > { %2030 = vrot.lane.b32.xlu0 %v1821_v1, %s7778_s28  ;;  %s7844_s28 = sld [smem:[#allocation45_spill]] }
 0x5ed   : > { %v6394_v5 = vpop.permute.xlu0 %6393 }
 0x5ee   : > { %v6396_v6 = vunpack.i.h.bf16 %v6394_v5  ;;  %v6395_v7 = vunpack.i.l.bf16 %v6394_v5 }
 0x5f0   : > { %v5981_v9 = vpack.c.bf16 %v6396_v6, %v6395_v7 }
 0x5f1   : > { %v6404_v42 = vpop.permute.xlu0 %6403 }
 0x5f2   : > { %5983 = vmatprep.subr.msk.bf16.mxu1 %vm7471_vm2, %v5981_v9  ;;  %v6406_v44 = vunpack.i.h.bf16 %v6404_v42  ;;  %v6405_v45 = vunpack.i.l.bf16 %v6404_v42 }
 0x5f3   : > { %5986 = vmatpush3.bf16.xpose.msk.msra.mxu1 %vm7471_vm2, %v5981_v9 }
 0x5f4   : > { %v5991_v49 = vpack.c.bf16 %v6406_v44, %v6405_v45 }
 0x5f5   : > { %v2029_v54 = vpop.permute.xlu0 %2028 }
 0x5f9   : > { %v2031_v55 = vpop.permute.xlu0 %2030 }
 0x5fa   : > { %5682 = vmatmul.mubr.msk.f32.vlgmr.msra.gmra.mrb[4].mxu1 %vm1485_vm0, %v1821_v1 }
 0x6cd   : > { %v5683_v18 = vpop.f32.mrb[4].mxu1 }
 0x6ce   : > { %v1904_v20 = vpop.f32.mrb[5].mxu1  ;;  %v1914_v21 = vmul.f32 0.25, %v5683_v18  ;;  %v6001_v18 = vpack.c.bf16 %v2233_v17, %v2232_v16  ;;  %v5365_v16 = vld [vmem:[#allocation4] ss:$0 sm:$0xff] }
 0x6cf   : > { %v1913_v22 = vmul.f32 0.25, %v1904_v20 }
 0x6d0   : > { %v1916_v26 = vadd.f32 %v1914_v21, %v1685_v23 }
 0x6d1   : > { %v1915_v24 = vadd.f32 %v1913_v22, %v1684_v19 }
 0x6d2   : > { %v1920_v29 = vsel %vm1485_vm0, %v1916_v26, -inf }
 0x6d3   : > { %v1917_v25 = vsel %vm1485_vm0, %v1915_v24, -inf }
 0x6d4   : > { %1918 = vmax.xlane.f32.xlu1 %v1917_v25  ;;  %v2026_v25 = vld [vmem:[%s7839_s2] sm:$0xff] }
 0x6d8   : > { %1921 = vmax.xlane.f32.xlu1 %v1920_v29 }
 0x761   : > { %v1919_v30 = vpop.xlane.xlu1 %1918 }
 0x762   : > { %v1923_v31 = vsub.f32 %v1915_v24, %v1919_v30 }
 0x764   : > { %v1925_v34 = vmul.f32 1.442695, %v1923_v31 }
 0x765   : > { %v1922_v32 = vpop.xlane.xlu1 %1921 }
 0x766   : > { %v1924_v33 = vsub.f32 %v1916_v26, %v1922_v32  ;;  %v2027_v26 = vld [vmem:[%s7839_s2 + $0x8] sm:$0xff]  ;;  %s7845_s2 = sld [smem:[#allocation46_spill]] }
 0x767   : > { %v6005_v29 = vpack.c.bf16 %v2027_v26, %v2026_v25 }
 0x768   : > { %v1927_v35 = vmul.f32 1.442695, %v1924_v33  ;;  %v5359_v33 = vld [vmem:[%s7840_s1] ss:$0 sm:$0xff]  ;;  %s7843_s1 = sld [smem:[#allocation32_spill]] }
 0x76a   : > { %6416 = vpow2.f32 %v1927_v35 }
 0x76b   : > { %6418 = vpow2.f32 %v1925_v34 }
 0x76e   : > { %s1456_s18 = scalar_lea.vmem %s7843_s1, %s5326_s0  ;;  %s7847_s0 = sld [smem:[#allocation34_spill]] }
 0x76f   : > { %s7850_s1 = sld [smem:[#allocation49_spill]] }
 0x774   : > { %v6417_v36 = vpop.eup %6416 }
 0x775   : > { %v1932_v37 = vsel %vm1485_vm0, %v6417_v36, 0.0  ;;  %v6419_v38 = vpop.eup %6418 }
 0x776   : > { %1933 = vadd.xlane.f32.xlu1 %v1932_v37  ;;  %v1929_v39 = vsel %vm1485_vm0, %v6419_v38, 0.0 }
 0x77a   : > { %1930 = vadd.xlane.f32.xlu1 %v1929_v39 }
 0x78b   : > { %6398 = vrot.lane.b32.xlu1 %v7461_v4, %s6959_s10  ;;  %s7841_s10 = sld [smem:[#allocation48_spill]] }
 0x803   : > { %v1934_v40 = vpop.xlane.xlu1 %1933 }
 0x804   : > { %6420 = vrcp.f32 %v1934_v40 }
 0x807   : > { %v1931_v41 = vpop.xlane.xlu1 %1930 }
 0x808   : > { %6422 = vrcp.f32 %v1931_v41 }
 0x80b   : > { %v6399_v43 = vpop.permute.xlu1 %6398 }
 0x80c   : > { %v6401_v46 = vunpack.i.h.bf16 %v6399_v43  ;;  %v6400_v47 = vunpack.i.l.bf16 %v6399_v43 }
 0x80e   : > { %v5987_v48 = vpack.c.bf16 %v6401_v46, %v6400_v47  ;;  %v6421_v50 = vpop.eup %6420 }
 0x80f   : > { %v1938_v53 = vmul.f32 %v6421_v50, %v6417_v36  ;;  %v2544_v50 = vld [vmem:[%s7841_s10 + $0x8] sm:$0xff] }
 0x810   : > { %5988 = vmatprep.subr.bf16.mxu0 %v5987_v48 }
 0x811   : > { %5990 = vmatpush3.bf16.msra.mxu0 %v5987_v48 }
 0x812   : > { %v6423_v51 = vpop.eup %6422  ;;  %5993 = vmatprep.subr.msk.bf16.mxu0 %vm7471_vm2, %v5991_v49 }
 0x813   : > { %v1937_v52 = vmul.f32 %v6423_v51, %v6419_v38 }
 0x815   : > { %5688 = vmatprep.mubr.msk.f32.mxu0 %vm1485_vm0, %v1937_v52  ;;  %v6961_v52 = vmov 0.0|0.0  }
 0x816   : > { %5689 = vmatmul.mubr.msk.f32.vlgmr.msra.gmra.mrb[2].mxu0 %vm1485_vm0, %v1938_v53 }
 0x817   : > { %5695 = vmatprep.mubr.msk.f32.mxu0 %vm1485_vm0, %v2029_v54 }
 0x81a   : > { %5996 = vmatpush3.bf16.xpose.msk.msra.mxu0 %vm7471_vm2, %v5991_v49  ;;  %v2543_v49 = vld [vmem:[%s7841_s10] sm:$0xff] }
 0x81b   : > { %v6018_v51 = vpack.c.bf16 %v2544_v50, %v2543_v49 }
 0x821   : > { %5696 = vmatmul.mubr.msk.f32.vlgmr.msra.gmra.mrb[4].mxu0 %vm1485_vm0, %v2031_v55 }
 0x8e9   : > { %v5690_v56 = vpop.f32.mrb[2].mxu0 }
 0x8ea   : > { %v2017_v57 = vpop.f32.mrb[3].mxu0 }
 0x8f4   : > { %v5697_v58 = vpop.f32.mrb[4].mxu0 }
 0x8f5   : > { %v2120_v59 = vmul.f32 0.25, %v5697_v58  ;;  %v2110_v60 = vpop.f32.mrb[5].mxu0 }
 0x8f6   : > { %v2119_v61 = vmul.f32 0.25, %v2110_v60 }
 0x8f7   : > { %v2122_v62 = vadd.f32 %v2120_v59, %v1685_v23 }
 0x8f8   : > { %v2121_v63 = vadd.f32 %v2119_v61, %v1684_v19 }
 0x8f9   : > { %v2126_v0 = vsel %vm1485_vm0, %v2122_v62, -inf }
 0x8fa   : > { %2127 = vmax.xlane.f32.xlu0 %v2126_v0  ;;  %v2123_v1 = vsel %vm1485_vm0, %v2121_v63, -inf }
 0x8fb   : > { %2124 = vmax.xlane.f32.xlu1 %v2123_v1 }
 0x90c   : > { %6408 = vrot.lane.b32.xlu1 %v7461_v4, %s6960_s22  ;;  %s7842_s22 = sld [smem:[#allocation47_spill]] }
 0x912   : > { %v2451_v53 = vld [vmem:[%s7842_s22] sm:$0xff]  ;;  %v2452_v54 = vld [vmem:[%s7842_s22 + $0x8] sm:$0xff]  ;;  %v2453_v59 = vld [vmem:[%s7842_s22 + $0x10] sm:$0xff] }
 0x913   : > { %v6009_v55 = vpack.c.bf16 %v2452_v54, %v2451_v53  ;;  %v2454_v60 = vld [vmem:[%s7842_s22 + $0x18] sm:$0xff] }
 0x914   : > { %v6013_v61 = vpack.c.bf16 %v2454_v60, %v2453_v59 }
 0x915   : > { %6010 = vmatprep.subr.bf16.mxu0 %v6009_v55 }
 0x916   : > { %6012 = vmatpush3.bf16.msra.mxu0 %v6009_v55 }
 0x917   : > { %6014 = vmatprep.subr.bf16.mxu0 %v6013_v61 }
 0x91a   : > { %6016 = vmatpush3.bf16.msra.mxu0 %v6013_v61 }
 0x987   : > { %v2128_v2 = vpop.xlane.xlu0 %2127 }
 0x988   : > { %v2130_v3 = vsub.f32 %v2122_v62, %v2128_v2  ;;  %v2125_v5 = vpop.xlane.xlu1 %2124  ;;  %v6963_v62 = vmov 0.0  }
 0x989   : > { %v2129_v6 = vsub.f32 %v2121_v63, %v2125_v5  ;;  %v1475_v63 = vld [vmem:[%s1456_s18] sm:$0xff]  ;;  %s7846_s18 = smov 112  }
 0x98a   : > { %v2133_v7 = vmul.f32 1.442695, %v2130_v3 }
 0x98b   : > { %v2131_v8 = vmul.f32 1.442695, %v2129_v6 }
 0x98c   : > { %v6409_v9 = vpop.permute.xlu1 %6408 }
 0x98d   : > { %6424 = vpow2.f32 %v2131_v8  ;;  %v6411_v10 = vunpack.i.h.bf16 %v6409_v9  ;;  %v6410_v11 = vunpack.i.l.bf16 %v6409_v9  ;;  %v5360_v8 = vld [vmem:[%s7844_s28] ss:$0 sm:$0xff]  ;;  %s1462_s28 = scalar_lea.vmem %s7847_s0, %s7858_s11  ;;  %s7848_s11 = smov 96  }
 0x98e   : > { %6426 = vpow2.f32 %v2133_v7  ;;  %s6964_s0 = smov 8  }
 0x98f   : > { %v5997_v12 = vpack.c.bf16 %v6411_v10, %v6410_v11  ;;  %v5361_v10 = vld [vmem:[%s7845_s2] ss:$0 sm:$0xff]  ;;  %s7849_s2 = smov 80  }
 0x991   : > { %5998 = vmatprep.subr.bf16.mxu1 %v5997_v12 }
 0x992   : > { %6000 = vmatpush3.bf16.msra.mxu1 %v5997_v12 }
 0x993   : > { %6002 = vmatprep.subr.bf16.mxu1 %v6001_v18 }
 0x997   : > { %v6425_v13 = vpop.eup %6424 }
 0x998   : > { %v2135_v14 = vsel %vm1485_vm0, %v6425_v13, 0.0  ;;  %v6427_v4 = vpop.eup %6426 }
 0x999   : > { %2136 = vadd.xlane.f32.xlu0 %v2135_v14  ;;  %v2138_v15 = vsel %vm1485_vm0, %v6427_v4, 0.0 }
 0x99d   : > { %2139 = vadd.xlane.f32.xlu0 %v2138_v15 }
 0xa26   : > { %v2137_v19 = vpop.xlane.xlu0 %2136 }
 0xa27   : > { %6428 = vrcp.f32 %v2137_v19 }
 0xa2a   : > { %v2140_v20 = vpop.xlane.xlu0 %2139 }
 0xa2b   : > { %6430 = vrcp.f32 %v2140_v20 }
 0xa31   : > { %v6429_v21 = vpop.eup %6428 }
 0xa32   : > { %v2143_v22 = vmul.f32 %v6429_v21, %v6425_v13  ;;  %v5362_v21 = vld [vmem:[#allocation2] ss:$0 sm:$0xff] }
 0xa34   : > { %5702 = vmatprep.mubr.msk.f32.mxu1 %vm1485_vm0, %v2143_v22 }
 0xa35   : > { %v6431_v23 = vpop.eup %6430 }
 0xa36   : > { %v2144_v24 = vmul.f32 %v6431_v23, %v6427_v4 }
 0xa38   : > { %5703 = vmatmul.mubr.msk.f32.vlgmr.msra.gmra.mrb[6].mxu1 %vm1485_vm0, %v2144_v24 }
 0xa39   : > { %6004 = vmatpush3.bf16.msra.mxu1 %v6001_v18 }
 0xa3a   : > { %6006 = vmatprep.subr.bf16.mxu1 %v6005_v29 }
 0xb0b   : > { %v5704_v30 = vpop.f32.mrb[6].mxu1 }
 0xb0c   : > { %v2223_v31 = vpop.f32.mrb[7].mxu1 }
 0xb0d   : > { %5709 = vmatprep.mubr.msk.f32.mxu1 %vm1485_vm0, %v2223_v31  ;;  %v5370_v31 = vld [vmem:[%s1462_s28] ss:$0 sm:$0xff]  ;;  %s1472_s28 = scalar_lea.vmem %s7179_s8, %s7421_s26 }
 0xb0e   : > { %5710 = vmatmul.mubr.msk.f32.vlgmr.msra.gmra.mrb[8].mxu1 %vm1485_vm0, %v5704_v30 }
 0xb0f   : > { %6008 = vmatpush3.bf16.msra.mxu1 %v6005_v29  ;;  %5716 = vmatprep.mubr.msk.f32.mxu1 %vm1485_vm0, %v2017_v57  ;;  %v2546_v57 = vld [vmem:[%s7841_s10 + $0x18] sm:$0xff] }
 0xb10   : > { %6017 = vmatprep.subr.bf16.mxu1 %v6961_v52 }
 0xb16   : > { %5717 = vmatmul.mubr.msk.f32.vlgmr.msra.gmra.mrb[8].mxu1 %vm1485_vm0, %v5690_v56  ;;  %v2545_v56 = vld [vmem:[%s7841_s10 + $0x10] sm:$0xff] }
 0xb17   : > { %6019 = vmatpush3.bf16.msra.mxu1 %v6018_v51  ;;  %v6021_v58 = vpack.c.bf16 %v2546_v57, %v2545_v56  ;;  %5738 = vmatprep.mubr.msk.f32.mxu1 %vm6962_vm5, %v6963_v62 }
 0xb18   : > { %6020 = vmatprep.subr.bf16.mxu1 %v6961_v52 }
 0xb1b   : > { %6022 = vmatpush3.bf16.msra.mxu1 %v6021_v58 }
 0xb1e   : > { %5739 = vmatmul.mubr.msk.f32.vlgmr.msra.gmra.mrb[10].mxu1 %vm1580_vm1, %v1475_v63 }
 0xbe9   : > { %v5718_v32 = vpop.f32.mrb[8].mxu1 }
 0xbea   : > { %v2387_v34 = vpop.f32.mrb[9].mxu1  ;;  %v2397_v35 = vadd.f32 %v5718_v32, %v7441_v28 }
 0xbeb   : > { %v2396_v36 = vadd.f32 %v2387_v34, %v7439_v27 }
 0xbec   : > { %v7515_v38 = vadd.f32 %v5359_v33, %v2397_v35 }
 0xbed   : > { %v7513_v37 = vadd.f32 %v5359_v33, %v2396_v36 }
 0xbee   : > { %v2412_v40 = vsel %vm1580_vm1, %v7515_v38, 0.0 }
 0xbef   : > { %v2409_v39 = vsel %vm1580_vm1, %v7513_v37, 0.0 }
 0xbf0   : > { %2410 = vadd.xlane.f32.xlu0 %v2409_v39 }
 0xbf1   : > { %v2623_v17 = vpop.f32.mrb[10].mxu1 }
 0xbf2   : > { %v7540_v18 = vadd.f32 %v5365_v16, %v2623_v17  ;;  %v5740_v19 = vpop.f32.mrb[11].mxu1  ;;  %v3027_v17 = vld [vmem:[%s7850_s1 + $0x10] sm:$0xff] }
 0xbf4   : > { %2413 = vadd.xlane.f32.xlu0 %v2412_v40  ;;  %2834 = vrot.lane.b32.xlu1 %v7540_v18, %s7846_s18 }
 0xbf5   : > { %5741 = vmatprep.subr.msk.mxu0 %vm1485_vm0, %v7540_v18 }
 0xc66   : > { %v2835_v20 = vpop.permute.xlu1 %2834 }
 0xc67   : > { %5751 = vmatprep.subr.msk.mxu1 %vm1485_vm0, %v2835_v20 }
 0xc68   : > { %5752 = vmatpush3.xpose.msk.msra.mxu1 %vm1485_vm0, %v2835_v20  ;;  %v2828_v20 = vld [vmem:[%s7850_s1] sm:$0xff] }
 0xc7d   : > { %v2411_v41 = vpop.xlane.xlu0 %2410 }
 0xc7e   : > { %v2415_v42 = vmul.f32 0.03125, %v2411_v41 }
 0xc80   : > { %v2417_v28 = vsub.f32 %v7513_v37, %v2415_v42 }
 0xc81   : > { %v2414_v27 = vpop.xlane.xlu0 %2413 }
 0xc82   : > { %v2416_v43 = vmul.f32 0.03125, %v2414_v27  ;;  %v2419_v44 = vmul.f32 %v2417_v28, %v2417_v28 }
 0xc84   : > { %v2418_v45 = vsub.f32 %v7515_v38, %v2416_v43  ;;  %v2421_v46 = vsel %vm1580_vm1, %v2419_v44, 0.0 }
 0xc85   : > { %2422 = vadd.xlane.f32.xlu0 %v2421_v46 }
 0xc86   : > { %v2420_v47 = vmul.f32 %v2418_v45, %v2418_v45 }
 0xc88   : > { %v2424_v48 = vsel %vm1580_vm1, %v2420_v47, 0.0 }
 0xc89   : > { %2425 = vadd.xlane.f32.xlu0 %v2424_v48 }
 0xd12   : > { %v2423_v0 = vpop.xlane.xlu0 %2422 }
 0xd13   : > { %v2427_v1 = vmul.f32 0.03125, %v2423_v0 }
 0xd15   : > { %v2429_v2 = vadd.f32 1e-05, %v2427_v1 }
 0xd16   : > { %v2426_v3 = vpop.xlane.xlu0 %2425 }
 0xd17   : > { %6432 = vrsqrt.f32 %v2429_v2  ;;  %v2428_v5 = vmul.f32 0.03125, %v2426_v3 }
 0xd19   : > { %v2430_v6 = vadd.f32 1e-05, %v2428_v5 }
 0xd1b   : > { %6434 = vrsqrt.f32 %v2430_v6 }
 0xd21   : > { %v6433_v7 = vpop.eup %6432 }
 0xd22   : > { %v2433_v9 = vmul.f32 %v6433_v7, %v2417_v28 }
 0xd24   : > { %v2441_v11 = vmul.f32 %v5360_v8, %v2433_v9 }
 0xd25   : > { %v6435_v12 = vpop.eup %6434 }
 0xd26   : > { %v2434_v13 = vmul.f32 %v6435_v12, %v2418_v45  ;;  %v2449_v14 = vadd.f32 %v5361_v10, %v2441_v11 }
 0xd28   : > { %v2442_v4 = vmul.f32 %v5360_v8, %v2434_v13  ;;  %5727 = vmatprep.mubr.msk.f32.mxu0 %vm1580_vm1, %v2449_v14 }
 0xd2a   : > { %v2450_v15 = vadd.f32 %v5361_v10, %v2442_v4 }
 0xd2c   : > { %5728 = vmatmul.mubr.msk.f32.vlgmr.msra.gmra.mrb[6].mxu0 %vm1580_vm1, %v2450_v15 }
 0xd2d   : > { %5742 = vmatpush3.xpose.msk.msra.mxu0 %vm1485_vm0, %v7540_v18 }
 0xdff   : > { %v5729_v22 = vpop.f32.mrb[6].mxu0 }
 0xe00   : > { %v2540_v23 = vadd.f32 %v5729_v22, %v5362_v21  ;;  %v2534_v24 = vpop.f32.mrb[7].mxu0 }
 0xe01   : > { %v2535_v25 = vadd.f32 %v5362_v21, %v2534_v24  ;;  %v2829_v21 = vld [vmem:[%s7850_s1 + $0x8] sm:$0xff] }
 0xe02   : > { %2832 = vrot.lane.b32.xlu1 %v2540_v23, %s7846_s18  ;;  %v6027_v22 = vpack.c.bf16 %v2829_v21, %v2828_v20 }
 0xe03   : > { %2830 = vrot.lane.b32.xlu0 %v2535_v25, %s7846_s18  ;;  %5743 = vmatprep.mubr.msk.f32.mxu0 %vm1485_vm0, %v2535_v25  ;;  %s7851_s18 = sld [smem:[#allocation50_spill]] }
 0xe04   : > { %5744 = vmatmul.mubr.msk.f32.vlgmr.msra.gmra.mrb[8].mxu0 %vm1485_vm0, %v2540_v23 }
 0xe74   : > { %v2833_v29 = vpop.permute.xlu1 %2832 }
 0xe75   : > { %v2831_v26 = vpop.permute.xlu0 %2830 }
 0xe76   : > { %5753 = vmatprep.mubr.msk.f32.mxu1 %vm1485_vm0, %v2831_v26 }
 0xe77   : > { %5754 = vmatmul.mubr.msk.f32.vlgmr.msra.gmra.mrb[12].mxu1 %vm1485_vm0, %v2833_v29 }
 0xed7   : > { %v5745_v30 = vpop.f32.mrb[8].mxu0 }
 0xed8   : > { %v2712_v32 = vmul.f32 0.25, %v5745_v30  ;;  %v2702_v33 = vpop.f32.mrb[9].mxu0  ;;  %v5382_v30 = vld [vmem:[#allocation6] ss:$0 sm:$0xff] }
 0xed9   : > { %v2711_v34 = vmul.f32 0.25, %v2702_v33 }
 0xeda   : > { %v2720_v35 = vadd.f32 %v5370_v31, %v2712_v32 }
 0xedb   : > { %v2719_v36 = vadd.f32 %v5370_v31, %v2711_v34 }
 0xedc   : > { %v2725_v39 = vsel %vm2721_vm6, %v2720_v35, -inf }
 0xedd   : > { %2726 = vmax.xlane.f32.xlu0 %v2725_v39  ;;  %v2722_v40 = vsel %vm2721_vm6, %v2719_v36, -inf }
 0xede   : > { %2723 = vmax.xlane.f32.xlu1 %v2722_v40 }
 0xf4a   : > { %v5755_v41 = vpop.f32.mrb[12].mxu1 }
 0xf4b   : > { %v2908_v42 = vpop.f32.mrb[13].mxu1  ;;  %v2918_v28 = vmul.f32 0.25, %v5755_v41 }
 0xf4c   : > { %v2917_v27 = vmul.f32 0.25, %v2908_v42 }
 0xf4d   : > { %v2920_v45 = vadd.f32 %v5370_v31, %v2918_v28 }
 0xf4e   : > { %v2919_v43 = vadd.f32 %v5370_v31, %v2917_v27 }
 0xf4f   : > { %v2924_v46 = vsel %vm2721_vm6, %v2920_v45, -inf }
 0xf50   : > { %v2921_v44 = vsel %vm2721_vm6, %v2919_v43, -inf }
 0xf51   : > { %2922 = vmax.xlane.f32.xlu1 %v2921_v44 }
 0xf55   : > { %2925 = vmax.xlane.f32.xlu1 %v2924_v46  ;;  %v3256_v46 = vld [vmem:[%s7851_s18] sm:$0xff] }
 0xf6a   : > { %v2727_v47 = vpop.xlane.xlu0 %2726 }
 0xf6b   : > { %v2729_v48 = vsub.f32 %v2720_v35, %v2727_v47  ;;  %v2724_v49 = vpop.xlane.xlu1 %2723  ;;  %v3257_v47 = vld [vmem:[%s7851_s18 + $0x8] sm:$0xff] }
 0xf6c   : > { %v2728_v50 = vsub.f32 %v2719_v36, %v2724_v49  ;;  %v3258_v49 = vld [vmem:[%s7851_s18 + $0x10] sm:$0xff] }
 0xf6d   : > { %v2732_v51 = vmul.f32 1.442695, %v2729_v48  ;;  %v6031_v48 = vpack.c.bf16 %v3257_v47, %v3256_v46 }
 0xf6e   : > { %v2730_v52 = vmul.f32 1.442695, %v2728_v50  ;;  %v3259_v50 = vld [vmem:[%s7851_s18 + $0x18] sm:$0xff] }
 0xf6f   : > { %6436 = vpow2.f32 %v2732_v51  ;;  %v6035_v51 = vpack.c.bf16 %v3259_v50, %v3258_v49 }
 0xf70   : > { %6438 = vpow2.f32 %v2730_v52 }
 0xf79   : > { %v6437_v53 = vpop.eup %6436 }
 0xf7a   : > { %v6439_v54 = vpop.eup %6438  ;;  %v2737_v55 = vsel %vm2721_vm6, %v6437_v53, 0.0 }
 0xf7b   : > { %2738 = vadd.xlane.f32.xlu0 %v2737_v55  ;;  %v2734_v56 = vsel %vm2721_vm6, %v6439_v54, 0.0 }
 0xf7c   : > { %2735 = vadd.xlane.f32.xlu1 %v2734_v56 }
 0xfde   : > { %v2923_v57 = vpop.xlane.xlu1 %2922 }
 0xfdf   : > { %v2927_v58 = vsub.f32 %v2919_v43, %v2923_v57 }
 0xfe1   : > { %v2929_v59 = vmul.f32 1.442695, %v2927_v58 }
 0xfe2   : > { %v2926_v60 = vpop.xlane.xlu1 %2925 }
 0xfe3   : > { %6440 = vpow2.f32 %v2929_v59  ;;  %v2928_v61 = vsub.f32 %v2920_v45, %v2926_v60 }
 0xfe5   : > { %v2931_v62 = vmul.f32 1.442695, %v2928_v61 }
 0xfe7   : > { %6442 = vpow2.f32 %v2931_v62 }
 0xfed   : > { %v6441_v63 = vpop.eup %6440 }
 0xfee   : > { %v2933_v0 = vsel %vm2721_vm6, %v6441_v63, 0.0 }
 0xfef   : > { %2934 = vadd.xlane.f32.xlu1 %v2933_v0 }
 0xff1   : > { %v6443_v1 = vpop.eup %6442 }
 0xff2   : > { %v2936_v2 = vsel %vm2721_vm6, %v6443_v1, 0.0 }
 0xff3   : > { %2937 = vadd.xlane.f32.xlu0 %v2936_v2 }
0x1000   : > { %2744 = vrot.lane.b32.xlu1 %v7540_v18, %s7848_s11  ;;  %s7852_s11 = sld [smem:[#allocation51_spill]] }
0x1008   : > { %v2739_v7 = vpop.xlane.xlu0 %2738 }
0x1009   : > { %2943 = vrot.lane.b32.xlu0 %v7540_v18, %s7849_s2  ;;  %v2736_v3 = vpop.xlane.xlu1 %2735  ;;  %v3028_v18 = vld [vmem:[%s7850_s1 + $0x18] sm:$0xff]  ;;  %s7853_s2 = sld [smem:[#allocation52_spill]]  ;;  %s1467_s1 = scalar_lea.vmem %s7174_s3, %s7421_s26 }
0x100a   : > { %6444 = vrcp.f32 %v2736_v3  ;;  %v6023_v19 = vpack.c.bf16 %v3028_v18, %v3027_v17  ;;  %v5384_v3 = vld [vmem:[#allocation9] ss:$0 sm:$0xff]  ;;  %v3372_v17 = vld [vmem:[%s7852_s11 + $0x30] sm:$0xff]  ;;  %v3373_v18 = vld [vmem:[%s7852_s11 + $0x38] sm:$0xff] }
0x100b   : > { %6446 = vrcp.f32 %v2739_v7 }
0x100c   : > { %6024 = vmatprep.subr.bf16.mxu1 %v6023_v19 }
0x100d   : > { %6026 = vmatpush3.bf16.msra.mxu1 %v6023_v19  ;;  %v6051_v19 = vpack.c.bf16 %v3373_v18, %v3372_v17 }
0x100e   : > { %6028 = vmatprep.subr.bf16.mxu1 %v6027_v22 }
0x100f   : > { %v3467_v20 = vld [vmem:[%s7853_s2] sm:$0xff]  ;;  %v3468_v21 = vld [vmem:[%s7853_s2 + $0x8] sm:$0xff]  ;;  %v3470_v49 = vld [vmem:[%s7853_s2 + $0x18] sm:$0xff] }
0x1014   : > { %v6445_v5 = vpop.eup %6444 }
0x1015   : > { %v7570_v6 = vmul.f32 %v6445_v5, %v6439_v54  ;;  %v6447_v9 = vpop.eup %6446 }
0x1016   : > { %v7574_v12 = vmul.f32 %v6447_v9, %v6437_v53 }
0x1017   : > { %5748 = vmatprep.mubr.msk.f32.mxu0 %vm2721_vm6, %v7570_v6 }
0x107c   : > { %v2935_v8 = vpop.xlane.xlu1 %2934 }
0x107d   : > { %6448 = vrcp.f32 %v2935_v8 }
0x1080   : > { %v2938_v10 = vpop.xlane.xlu0 %2937  ;;  %v2745_v11 = vpop.permute.xlu1 %2744 }
0x1081   : > { %6450 = vrcp.f32 %v2938_v10  ;;  %5746 = vmatprep.subr.mxu0 %v2745_v11  ;;  %v3367_v10 = vld [vmem:[%s7852_s11 + $0x8] sm:$0xff] }
0x1082   : > { %5747 = vmatpush3.msra.mxu0 %v2745_v11 }
0x1083   : > { %5749 = vmatmul.mubr.msk.f32.vlgmr.msra.gmra.mrb[10].mxu0 %vm2721_vm6, %v7574_v12 }
0x1084   : > { %v2944_v13 = vpop.permute.xlu0 %2943 }
0x1085   : > { %5756 = vmatprep.subr.mxu0 %v2944_v13 }
0x1086   : > { %5757 = vmatpush3.msra.mxu0 %v2944_v13  ;;  %v3369_v13 = vld [vmem:[%s7852_s11 + $0x18] sm:$0xff] }
0x1087   : > { %v6449_v14 = vpop.eup %6448  ;;  %6032 = vmatprep.subr.bf16.mxu0 %v6031_v48 }
0x1088   : > { %v2940_v4 = vmul.f32 %v6449_v14, %v6441_v63  ;;  %v5383_v63 = vld [vmem:[#allocation7] ss:$0 sm:$0xff] }
0x1089   : > { %v3370_v14 = vld [vmem:[%s7852_s11 + $0x20] sm:$0xff] }
0x108a   : > { %5758 = vmatprep.mubr.msk.f32.mxu0 %vm2721_vm6, %v2940_v4 }
0x108b   : > { %v6451_v15 = vpop.eup %6450 }
0x108c   : > { %v2942_v16 = vmul.f32 %v6451_v15, %v6443_v1  ;;  %v3371_v15 = vld [vmem:[%s7852_s11 + $0x28] sm:$0xff] }
0x108e   : > { %5759 = vmatmul.mubr.msk.f32.vlgmr.msra.gmra.mrb[12].mxu0 %vm2721_vm6, %v2942_v16 }
0x108f   : > { %6034 = vmatpush3.bf16.msra.mxu0 %v6031_v48  ;;  %v3469_v48 = vld [vmem:[%s7853_s2 + $0x10] sm:$0xff] }
0x1090   : > { %6036 = vmatprep.subr.bf16.mxu0 %v6035_v51  ;;  %v6059_v50 = vpack.c.bf16 %v3470_v49, %v3469_v48  ;;  %v5412_v48 = vld [vmem:[#allocation15] ss:$0 sm:$0xff] }
0x1093   : > { %6038 = vmatpush3.bf16.msra.mxu0 %v6035_v51 }
0x1156   : > { %v5750_v23 = vpop.f32.mrb[10].mxu0 }
0x1157   : > { %v2819_v24 = vpop.f32.mrb[11].mxu0 }
0x1161   : > { %v5760_v25 = vpop.f32.mrb[12].mxu0 }
0x1162   : > { %v3018_v26 = vpop.f32.mrb[13].mxu0 }
0x1163   : > { %5765 = vmatprep.mubr.msk.f32.mxu1 %vm1485_vm0, %v3018_v26 }
0x1164   : > { %5766 = vmatmul.mubr.msk.f32.vlgmr.msra.gmra.mrb[14].mxu1 %vm1485_vm0, %v5760_v25 }
0x1165   : > { %6030 = vmatpush3.bf16.msra.mxu1 %v6027_v22  ;;  %5772 = vmatprep.mubr.msk.f32.mxu1 %vm1485_vm0, %v2819_v24  ;;  %v6055_v22 = vpack.c.bf16 %v3468_v21, %v3467_v20 }
0x1167   : > { %6056 = vmatprep.subr.bf16.mxu0 %v6055_v22 }
0x116c   : > { %5773 = vmatmul.mubr.msk.f32.vlgmr.msra.gmra.mrb[14].mxu1 %vm1485_vm0, %v5750_v23  ;;  %v5385_v23 = vld [vmem:[#allocation10] ss:$0 sm:$0xff] }
0x123f   : > { %v5774_v29 = vpop.f32.mrb[14].mxu1 }
0x1240   : > { %v3200_v31 = vadd.f32 %v5774_v29, %v7515_v38  ;;  %v3182_v32 = vpop.f32.mrb[15].mxu1 }
0x1241   : > { %v3199_v33 = vadd.f32 %v3182_v32, %v7513_v37 }
0x1242   : > { %v7590_v34 = vadd.f32 %v5382_v30, %v3200_v31 }
0x1243   : > { %v7592_v35 = vadd.f32 %v5382_v30, %v3199_v33 }
0x1244   : > { %v3217_v36 = vsel %vm1580_vm1, %v7590_v34, 0.0 }
0x1245   : > { %3218 = vadd.xlane.f32.xlu0 %v3217_v36  ;;  %v3214_v39 = vsel %vm1580_vm1, %v7592_v35, 0.0 }
0x1246   : > { %3215 = vadd.xlane.f32.xlu1 %v3214_v39 }
0x12d2   : > { %v3219_v40 = vpop.xlane.xlu0 %3218 }
0x12d3   : > { %v3221_v41 = vmul.f32 0.03125, %v3219_v40  ;;  %v3216_v38 = vpop.xlane.xlu1 %3215 }
0x12d4   : > { %v3220_v42 = vmul.f32 0.03125, %v3216_v38 }
0x12d5   : > { %v3223_v37 = vsub.f32 %v7590_v34, %v3221_v41 }
0x12d6   : > { %v3222_v28 = vsub.f32 %v7592_v35, %v3220_v42 }
0x12d7   : > { %v3225_v27 = vmul.f32 %v3223_v37, %v3223_v37 }
0x12d8   : > { %v3224_v43 = vmul.f32 %v3222_v28, %v3222_v28 }
0x12d9   : > { %v3229_v44 = vsel %vm1580_vm1, %v3225_v27, 0.0 }
0x12da   : > { %3230 = vadd.xlane.f32.xlu0 %v3229_v44  ;;  %v3226_v45 = vsel %vm1580_vm1, %v3224_v43, 0.0 }
0x12db   : > { %3227 = vadd.xlane.f32.xlu1 %v3226_v45 }
0x12ec   : > { %3191 = vrot.lane.b32.xlu1 %v2940_v4, %s6964_s0 }
0x12f0   : > { %3193 = vrot.lane.b32.xlu0 %v2942_v16, %s6964_s0  ;;  %v6047_v16 = vpack.c.bf16 %v3371_v15, %v3370_v14  ;;  %s7854_s0 = sld [smem:[#allocation53_spill]] }
0x12f6   : > { %v5405_v17 = vld [vmem:[%s7854_s0 + $0x38] sm:$0xff] }
0x1367   : > { %v3231_v52 = vpop.xlane.xlu0 %3230 }
0x1368   : > { %v3233_v53 = vmul.f32 0.03125, %v3231_v52  ;;  %v3228_v54 = vpop.xlane.xlu1 %3227 }
0x1369   : > { %v3232_v55 = vmul.f32 0.03125, %v3228_v54 }
0x136a   : > { %v3235_v56 = vadd.f32 1e-05, %v3233_v53  ;;  %v5390_v53 = vld [vmem:[#allocation12] ss:$0 sm:$0xff] }
0x136b   : > { %v3234_v57 = vadd.f32 1e-05, %v3232_v55  ;;  %v3194_v58 = vpop.permute.xlu0 %3193 }
0x136c   : > { %6452 = vrsqrt.f32 %v3235_v56  ;;  %v3198_v59 = vsel %vm2721_vm6, %v7574_v12, %v3194_v58  ;;  %v3192_v60 = vpop.permute.xlu1 %3191  ;;  %v3368_v12 = vld [vmem:[%s7852_s11 + $0x10] sm:$0xff] }
0x136d   : > { %6454 = vrsqrt.f32 %v3234_v57  ;;  %3211 = vst.msk [vmem:[%s1472_s28 + $0x8] sm:$0xff] %vm1485_vm0, %v3198_v59  ;;  %v3197_v61 = vsel %vm2721_vm6, %v7570_v6, %v3192_v60  ;;  %v3366_v6 = vld [vmem:[%s7852_s11] sm:$0xff]  ;;  %v6043_v4 = vpack.c.bf16 %v3369_v13, %v3368_v12  ;;  %v5394_v58 = vld [vmem:[%s7854_s0 + $0x10] sm:$0xff]  ;;  %v5395_v59 = vld [vmem:[%s7854_s0 + $0x18] sm:$0xff] }
0x136e   : > { %3210 = vst.msk [vmem:[%s1472_s28] sm:$0xff] %vm1485_vm0, %v3197_v61  ;;  %v6039_v11 = vpack.c.bf16 %v3367_v10, %v3366_v6  ;;  %v6063_v60 = vpack.c.bf16 %v5395_v59, %v5394_v58  ;;  %v3569_v61 = vld [vmem:[%s7854_s0] sm:$0xff]  ;;  %s7855_s28 = sld [smem:[#allocation54_spill]] }
0x136f   : > { %v5400_v10 = vld [vmem:[%s7854_s0 + $0x20] sm:$0xff] }
0x1370   : > { %6040 = vmatprep.subr.bf16.mxu1 %v6039_v11 }
0x1371   : > { %6042 = vmatpush3.bf16.msra.mxu1 %v6039_v11  ;;  %v5401_v11 = vld [vmem:[%s7854_s0 + $0x28] sm:$0xff] }
0x1372   : > { %6044 = vmatprep.subr.bf16.mxu1 %v6043_v4  ;;  %v6071_v15 = vpack.c.bf16 %v5401_v11, %v5400_v10 }
0x1374   : > { %v4042_v58 = vld [vmem:[%s7855_s28 + $0x18] sm:$0xff] }
0x1375   : > { %6046 = vmatpush3.bf16.msra.mxu1 %v6043_v4 }
0x1376   : > { %v6453_v62 = vpop.eup %6452  ;;  %6048 = vmatprep.subr.bf16.mxu1 %v6047_v16 }
0x1377   : > { %v6455_v0 = vpop.eup %6454  ;;  %v3239_v1 = vmul.f32 %v6453_v62, %v3223_v37  ;;  %v3570_v62 = vld [vmem:[%s7854_s0 + $0x8] sm:$0xff] }
0x1378   : > { %v3238_v2 = vmul.f32 %v6455_v0, %v3222_v28 }
0x1379   : > { %v3247_v5 = vmul.f32 %v5383_v63, %v3239_v1  ;;  %6050 = vmatpush3.bf16.msra.mxu1 %v6047_v16  ;;  %v5404_v16 = vld [vmem:[%s7854_s0 + $0x30] sm:$0xff] }
0x137a   : > { %v3246_v7 = vmul.f32 %v5383_v63, %v3238_v2  ;;  %6052 = vmatprep.subr.bf16.mxu1 %v6051_v19  ;;  %v6067_v63 = vpack.c.bf16 %v3570_v62, %v3569_v61  ;;  %v6075_v20 = vpack.c.bf16 %v5405_v17, %v5404_v16  ;;  %v5422_v16 = vld [vmem:[%s7855_s28 + $0x40] sm:$0xff]  ;;  %v5423_v17 = vld [vmem:[%s7855_s28 + $0x48] sm:$0xff] }
0x137b   : > { %v3255_v9 = vadd.f32 %v5384_v3, %v3247_v5 }
0x137c   : > { %v3254_v8 = vadd.f32 %v5384_v3, %v3246_v7 }
0x137d   : > { %6054 = vmatpush3.bf16.msra.mxu1 %v6051_v19 }
0x137e   : > { %5783 = vmatprep.mubr.msk.f32.mxu0 %vm1580_vm1, %v3254_v8 }
0x137f   : > { %5784 = vmatmul.mubr.msk.f32.vlgmr.msra.gmra.mrb[14].mxu0 %vm1580_vm1, %v3255_v9 }
0x1380   : > { %6058 = vmatpush3.bf16.msra.mxu0 %v6055_v22 }
0x1381   : > { %6060 = vmatprep.subr.bf16.mxu0 %v6059_v50 }
0x1384   : > { %6062 = vmatpush3.bf16.msra.mxu0 %v6059_v50  ;;  %v5413_v50 = vld [vmem:[#allocation16] ss:$0 sm:$0xff] }
0x1385   : > { %6064 = vmatprep.subr.bf16.mxu0 %v6063_v60 }
0x1452   : > { %v5785_v24 = vpop.f32.mrb[14].mxu0 }
0x1453   : > { %v3345_v25 = vadd.f32 %v5785_v24, %v5385_v23  ;;  %v3339_v26 = vpop.f32.mrb[15].mxu0  ;;  %v5409_v24 = vld [vmem:[%s7854_s0 + $0x48] sm:$0xff] }
0x1454   : > { %v3340_v29 = vadd.f32 %v5385_v23, %v3339_v26  ;;  %v5408_v23 = vld [vmem:[%s7854_s0 + $0x40] sm:$0xff]  ;;  %s7856_s0 = sld [smem:[#allocation55_spill]] }
0x1455   : > { %v3351_v30 = vmul.f32 0.044715, %v3345_v25  ;;  %v3349_v45 = vmul.f32 0.5, %v3345_v25 }
0x1456   : > { %v3350_v31 = vmul.f32 0.044715, %v3340_v29  ;;  %v3348_v43 = vmul.f32 0.5, %v3340_v29 }
0x1457   : > { %v3353_v32 = vmul.f32 %v3351_v30, %v3345_v25 }
0x1458   : > { %v3352_v33 = vmul.f32 %v3350_v31, %v3340_v29 }
0x1459   : > { %v3355_v36 = vmul.f32 %v3353_v32, %v3345_v25 }
0x145a   : > { %v3354_v39 = vmul.f32 %v3352_v33, %v3340_v29 }
0x145b   : > { %v3357_v40 = vadd.f32 %v3355_v36, %v3345_v25 }
0x145c   : > { %v3356_v41 = vadd.f32 %v3354_v39, %v3340_v29  ;;  %v6079_v29 = vpack.c.bf16 %v5409_v24, %v5408_v23  ;;  %v6099_v24 = vpack.c.bf16 %v5423_v17, %v5422_v16 }
0x145d   : > { %v3359_v38 = vmul.f32 0.7978846, %v3357_v40 }
0x145e   : > { %v3358_v42 = vmul.f32 0.7978846, %v3356_v41 }
0x145f   : > { %6456 = vtanh.f32 %v3359_v38 }
0x1460   : > { %6458 = vtanh.f32 %v3358_v42  ;;  %v5414_v42 = vld [vmem:[%s7855_s28 + $0x20] sm:$0xff] }
0x1469   : > { %v6457_v37 = vpop.eup %6456 }
0x146a   : > { %v6459_v28 = vpop.eup %6458  ;;  %v3363_v27 = vadd.f32 1.0, %v6457_v37  ;;  %v5415_v37 = vld [vmem:[%s7855_s28 + $0x28] sm:$0xff] }
0x146b   : > { %v3362_v44 = vadd.f32 1.0, %v6459_v28  ;;  %v6083_v28 = vpack.c.bf16 %v5415_v37, %v5414_v42  ;;  %v5436_v42 = vld [vmem:[%s7855_s28 + $0x90] sm:$0xff]  ;;  %v5437_v37 = vld [vmem:[%s7855_s28 + $0x98] sm:$0xff] }
0x146c   : > { %v3365_v47 = vmul.f32 %v3363_v27, %v3349_v45  ;;  %v5416_v27 = vld [vmem:[%s7855_s28 + $0x30] sm:$0xff]  ;;  %v4039_v45 = vld [vmem:[%s7855_s28] sm:$0xff] }
0x146d   : > { %v3364_v46 = vmul.f32 %v3362_v44, %v3348_v43  ;;  %v5417_v43 = vld [vmem:[%s7855_s28 + $0x38] sm:$0xff]  ;;  %6084 = vmatprep.subr.bf16.mxu1 %v6083_v28 }
0x146e   : > { %v6087_v44 = vpack.c.bf16 %v5417_v43, %v5416_v27  ;;  %v5442_v27 = vld [vmem:[%s7856_s0 + $0x20] sm:$0xff]  ;;  %v5443_v43 = vld [vmem:[%s7856_s0 + $0x28] sm:$0xff] }
0x146f   : > { %5802 = vmatprep.mubr.msk.f32.mxu1 %vm3374_vm7, %v3364_v46  ;;  %v4040_v46 = vld [vmem:[%s7855_s28 + $0x8] sm:$0xff] }
0x1470   : > { %5803 = vmatmul.mubr.msk.f32.vlgmr.msra.gmra.mrb[16].mxu1 %vm3374_vm7, %v3365_v47  ;;  %v6091_v47 = vpack.c.bf16 %v4040_v46, %v4039_v45  ;;  %v5444_v45 = vld [vmem:[%s7856_s0 + $0x30] sm:$0xff]  ;;  %v5445_v46 = vld [vmem:[%s7856_s0 + $0x38] sm:$0xff] }
0x1471   : > { %6086 = vmatpush3.bf16.msra.mxu1 %v6083_v28  ;;  %v6119_v28 = vpack.c.bf16 %v5437_v37, %v5436_v42  ;;  %v5462_v42 = vld [vmem:[%s7856_s0 + $0x80] sm:$0xff]  ;;  %v5463_v37 = vld [vmem:[%s7856_s0 + $0x88] sm:$0xff] }
0x1472   : > { %6088 = vmatprep.subr.bf16.mxu1 %v6087_v44 }
0x1475   : > { %6090 = vmatpush3.bf16.msra.mxu1 %v6087_v44  ;;  %v6123_v44 = vpack.c.bf16 %v5443_v43, %v5442_v27  ;;  %v5464_v27 = vld [vmem:[%s7856_s0 + $0x90] sm:$0xff]  ;;  %v5465_v43 = vld [vmem:[%s7856_s0 + $0x98] sm:$0xff] }
0x1476   : > { %6092 = vmatprep.subr.bf16.mxu1 %v6091_v47 }
0x1543   : > { %v5804_v51 = vpop.f32.mrb[16].mxu1 }
0x1544   : > { %v3457_v52 = vadd.f32 %v5804_v51, %v7590_v34  ;;  %v3447_v54 = vpop.f32.mrb[17].mxu1  ;;  %v5391_v34 = vld [vmem:[#allocation13] ss:$0 sm:$0xff] }
0x1545   : > { %v3456_v55 = vadd.f32 %v3447_v54, %v7592_v35 }
0x1546   : > { %v3466_v57 = vadd.f32 %v5390_v53, %v3457_v52 }
0x1547   : > { %v3465_v56 = vadd.f32 %v5390_v53, %v3456_v55 }
0x1549   : > { %5813 = vmatprep.mubr.msk.f32.mxu0 %vm1580_vm1, %v3465_v56 }
0x154a   : > { %5814 = vmatmul.mubr.msk.f32.vlgmr.msra.gmra.mrb[16].mxu0 %vm1580_vm1, %v3466_v57  ;;  %v4041_v57 = vld [vmem:[%s7855_s28 + $0x10] sm:$0xff] }
0x154b   : > { %6066 = vmatpush3.bf16.msra.mxu0 %v6063_v60 }
0x154c   : > { %6068 = vmatprep.subr.bf16.mxu0 %v6067_v63 }
0x161d   : > { %v5815_v0 = vpop.f32.mrb[16].mxu0 }
0x161e   : > { %v7636_v35 = vadd.f32 %v5815_v0, %v5391_v34  ;;  %v3550_v1 = vpop.f32.mrb[17].mxu0 }
0x161f   : > { %v7638_v2 = vadd.f32 %v5391_v34, %v3550_v1 }
0x1620   : > { %v3563_v3 = vrot.slane %v7636_v35, 6 }
0x1621   : > { %v3562_v5 = vrot.slane %v7638_v2, 6 }
0x1622   : > { %v3568_v7 = vsel %vm3561_vm8, %v3563_v3, 0.0 }
0x1623   : > { %v3564_v8 = vsel %vm3561_vm8, %v3562_v5, %v3563_v3  ;;  %v3567_v9 = vsel %vm3561_vm8, 0.0, %v3562_v5  ;;  %v3580_v6 = vrot.slane %v3568_v7, 1  ;;  %v3747_v22 = vrot.slane %v3568_v7, 2 }
0x1624   : > { %v3577_v12 = vrot.slane %v3567_v9, 1  ;;  %v3578_v13 = vrot.slane %v3564_v8, 1  ;;  %v3744_v18 = vrot.slane %v3567_v9, 2  ;;  %v3745_v19 = vrot.slane %v3564_v8, 2 }
0x1625   : > { %v3834_v25 = vrot.slane %v3567_v9, 3  ;;  %v3835_v26 = vrot.slane %v3564_v8, 3  ;;  %v3837_v32 = vrot.slane %v3568_v7, 3  ;;  %v3924_v33 = vrot.slane %v3567_v9, 4 }
0x1626   : > { %v3579_v14 = vsel %vm3576_vm9, %v3577_v12, %v3578_v13  ;;  %v3581_v4 = vsel %vm3576_vm9, %v3578_v13, %v3580_v6  ;;  %v3746_v21 = vsel %vm3743_vm10, %v3744_v18, %v3745_v19  ;;  %v3748_v30 = vsel %vm3743_vm10, %v3745_v19, %v3747_v22 }
0x1627   : > { %5820 = vmatprep.mubr.msk.f32.mxu0 %vm1485_vm0, %v3579_v14  ;;  %v3836_v31 = vsel %vm3833_vm11, %v3834_v25, %v3835_v26  ;;  %v3925_v36 = vrot.slane %v3564_v8, 4  ;;  %v3838_v39 = vsel %vm3833_vm11, %v3835_v26, %v3837_v32  ;;  %v3927_v41 = vrot.slane %v3568_v7, 4  ;;  %v5424_v25 = vld [vmem:[%s7855_s28 + $0x50] sm:$0xff]  ;;  %v5425_v26 = vld [vmem:[%s7855_s28 + $0x58] sm:$0xff] }
0x1628   : > { %5821 = vmatmul.mubr.msk.f32.vlgmr.msra.gmra.mrb[18].mxu0 %vm1485_vm0, %v3581_v4 }
0x1629   : > { %6070 = vmatpush3.bf16.msra.mxu0 %v6067_v63  ;;  %5827 = vmatprep.mubr.msk.f32.mxu0 %vm1485_vm0, %v3567_v9  ;;  %v3926_v40 = vsel %vm3923_vm12, %v3924_v33, %v3925_v36  ;;  %v3928_v38 = vsel %vm3923_vm12, %v3925_v36, %v3927_v41  ;;  %v6095_v63 = vpack.c.bf16 %v4042_v58, %v4041_v57  ;;  %v5430_v33 = vld [vmem:[%s7855_s28 + $0x70] sm:$0xff]  ;;  %v5431_v36 = vld [vmem:[%s7855_s28 + $0x78] sm:$0xff]  ;;  %v5435_v41 = vld [vmem:[%s7855_s28 + $0x88] sm:$0xff] }
0x162a   : > { %6072 = vmatprep.subr.bf16.mxu0 %v6071_v15 }
0x1630   : > { %5828 = vmatmul.mubr.msk.f32.vlgmr.msra.gmra.mrb[18].mxu0 %vm1485_vm0, %v3564_v8 }
0x1631   : > { %6074 = vmatpush3.bf16.msra.mxu0 %v6071_v15  ;;  %5834 = vmatprep.mubr.msk.f32.mxu0 %vm1485_vm0, %v3746_v21 }
0x1632   : > { %6076 = vmatprep.subr.bf16.mxu0 %v6075_v20 }
0x1638   : > { %5835 = vmatmul.mubr.msk.f32.vlgmr.msra.gmra.mrb[18].mxu0 %vm1485_vm0, %v3748_v30  ;;  %v5428_v30 = vld [vmem:[%s7855_s28 + $0x60] sm:$0xff] }
0x1639   : > { %6078 = vmatpush3.bf16.msra.mxu0 %v6075_v20  ;;  %5841 = vmatprep.mubr.msk.f32.mxu0 %vm1485_vm0, %v3836_v31  ;;  %v5429_v31 = vld [vmem:[%s7855_s28 + $0x68] sm:$0xff] }
0x163a   : > { %6080 = vmatprep.subr.bf16.mxu0 %v6079_v29  ;;  %v6107_v32 = vpack.c.bf16 %v5429_v31, %v5428_v30  ;;  %v5452_v30 = vld [vmem:[%s7856_s0 + $0x50] sm:$0xff]  ;;  %v5453_v31 = vld [vmem:[%s7856_s0 + $0x58] sm:$0xff] }
0x1640   : > { %5842 = vmatmul.mubr.msk.f32.vlgmr.msra.gmra.mrb[18].mxu0 %vm1485_vm0, %v3838_v39  ;;  %v6111_v39 = vpack.c.bf16 %v5431_v36, %v5430_v33  ;;  %v5456_v33 = vld [vmem:[%s7856_s0 + $0x60] sm:$0xff]  ;;  %v5457_v36 = vld [vmem:[%s7856_s0 + $0x68] sm:$0xff] }
0x1641   : > { %6082 = vmatpush3.bf16.msra.mxu0 %v6079_v29  ;;  %5848 = vmatprep.mubr.msk.f32.mxu0 %vm1485_vm0, %v3926_v40  ;;  %v6103_v29 = vpack.c.bf16 %v5425_v26, %v5424_v25  ;;  %v5434_v40 = vld [vmem:[%s7855_s28 + $0x80] sm:$0xff] }
0x1642   : > { %6124 = vmatprep.subr.bf16.mxu0 %v6123_v44 }
0x1648   : > { %5849 = vmatmul.mubr.msk.f32.vlgmr.msra.gmra.mrb[18].mxu0 %vm1485_vm0, %v3928_v38  ;;  %v6115_v38 = vpack.c.bf16 %v5435_v41, %v5434_v40  ;;  %v5458_v40 = vld [vmem:[%s7856_s0 + $0x70] sm:$0xff]  ;;  %v5459_v41 = vld [vmem:[%s7856_s0 + $0x78] sm:$0xff] }
0x1649   : > { %6126 = vmatpush3.bf16.msra.mxu0 %v6123_v44  ;;  %v6159_v44 = vpack.c.bf16 %v5465_v43, %v5464_v27 }
0x171b   : > { %v5850_v49 = vpop.f32.mrb[18].mxu0 }
0x171c   : > { %v4018_v51 = vmul.f32 %v5850_v49, %v5412_v48  ;;  %v3999_v52 = vpop.f32.mrb[19].mxu0  ;;  %v4516_v49 = vld [vmem:[%s7856_s0 + $0x8] sm:$0xff] }
0x171d   : > { %v4017_v53 = vmul.f32 %v5412_v48, %v3999_v52  ;;  %v4515_v48 = vld [vmem:[%s7856_s0] sm:$0xff] }
0x171e   : > { %v4027_v54 = vadd.f32 %v5413_v50, %v4018_v51  ;;  %v5440_v51 = vld [vmem:[#allocation18] ss:$0 sm:$0xff] }
0x171f   : > { %v4026_v55 = vadd.f32 %v5413_v50, %v4017_v53  ;;  %v6131_v50 = vpack.c.bf16 %v4516_v49, %v4515_v48  ;;  %v5441_v53 = vld [vmem:[#allocation19] ss:$0 sm:$0xff] }
0x1720   : > { %6460 = vtanh.f32 %v4027_v54 }
0x1721   : > { %6462 = vtanh.f32 %v4026_v55 }
0x172a   : > { %v6461_v56 = vpop.eup %6460 }
0x172b   : > { %v6463_v59 = vpop.eup %6462  ;;  %v4033_v60 = vrot.slane %v6461_v56, 6 }
0x172c   : > { %v4032_v61 = vrot.slane %v6463_v59, 6 }
0x172d   : > { %v4038_v62 = vsel %vm3561_vm8, %v4033_v60, 0.0 }
0x172e   : > { %v4034_v34 = vsel %vm3561_vm8, %v4032_v61, %v4033_v60  ;;  %v4037_v0 = vsel %vm3561_vm8, 0.0, %v4032_v61  ;;  %v4053_v1 = vrot.slane %v4038_v62, 1  ;;  %v4221_v3 = vrot.slane %v4038_v62, 2  ;;  %v4517_v60 = vld [vmem:[%s7856_s0 + $0x10] sm:$0xff]  ;;  %v4518_v61 = vld [vmem:[%s7856_s0 + $0x18] sm:$0xff] }
0x172f   : > { %v4050_v5 = vrot.slane %v4037_v0, 1  ;;  %v4051_v7 = vrot.slane %v4034_v34, 1  ;;  %v4218_v8 = vrot.slane %v4037_v0, 2  ;;  %v4219_v9 = vrot.slane %v4034_v34, 2 }
0x1730   : > { %v4309_v6 = vrot.slane %v4037_v0, 3  ;;  %v4310_v10 = vrot.slane %v4034_v34, 3  ;;  %v4312_v11 = vrot.slane %v4038_v62, 3  ;;  %v4400_v12 = vrot.slane %v4037_v0, 4 }
0x1731   : > { %v4052_v13 = vsel %vm3576_vm9, %v4050_v5, %v4051_v7  ;;  %v4054_v14 = vsel %vm3576_vm9, %v4051_v7, %v4053_v1  ;;  %v4220_v4 = vsel %vm3743_vm10, %v4218_v8, %v4219_v9  ;;  %v4222_v15 = vsel %vm3743_vm10, %v4219_v9, %v4221_v3 }
0x1732   : > { %5859 = vmatprep.mubr.msk.f32.mxu1 %vm1580_vm1, %v4052_v13  ;;  %v4311_v18 = vsel %vm3833_vm11, %v4309_v6, %v4310_v10  ;;  %v4313_v19 = vsel %vm3833_vm11, %v4310_v10, %v4312_v11  ;;  %v4401_v20 = vrot.slane %v4034_v34, 4  ;;  %v4403_v21 = vrot.slane %v4038_v62, 4 }
0x1733   : > { %5860 = vmatmul.mubr.msk.f32.vlgmr.msra.gmra.mrb[18].mxu1 %vm1580_vm1, %v4054_v14  ;;  %v6135_v1 = vpack.c.bf16 %v4518_v61, %v4517_v60 }
0x1734   : > { %6094 = vmatpush3.bf16.msra.mxu1 %v6091_v47  ;;  %5870 = vmatprep.mubr.msk.f32.mxu1 %vm1580_vm1, %v4037_v0  ;;  %v4402_v22 = vsel %vm3923_vm12, %v4400_v12, %v4401_v20  ;;  %v4404_v23 = vsel %vm3923_vm12, %v4401_v20, %v4403_v21  ;;  %v6127_v47 = vpack.c.bf16 %v5445_v46, %v5444_v45  ;;  %v5451_v20 = vld [vmem:[%s7856_s0 + $0x48] sm:$0xff]  ;;  %v5468_v45 = vld [vmem:[#allocation21] ss:$0 sm:$0xff] }
0x1735   : > { %6096 = vmatprep.subr.bf16.mxu1 %v6095_v63 }
0x1736   : > { %6128 = vmatprep.subr.bf16.mxu0 %v6127_v47 }
0x1737   : > { %6130 = vmatpush3.bf16.msra.mxu0 %v6127_v47  ;;  %v5469_v47 = vld [vmem:[#allocation22] ss:$0 sm:$0xff] }
0x1738   : > { %6098 = vmatpush3.bf16.msra.mxu1 %v6095_v63  ;;  %6132 = vmatprep.subr.bf16.mxu0 %v6131_v50 }
0x1739   : > { %6100 = vmatprep.subr.bf16.mxu1 %v6099_v24 }
0x173b   : > { %5871 = vmatmul.mubr.msk.f32.vlgmr.msra.gmra.mrb[18].mxu1 %vm1580_vm1, %v4034_v34 }
0x173c   : > { %6102 = vmatpush3.bf16.msra.mxu1 %v6099_v24  ;;  %5881 = vmatprep.mubr.msk.f32.mxu1 %vm1580_vm1, %v4220_v4 }
0x173d   : > { %6104 = vmatprep.subr.bf16.mxu1 %v6103_v29 }
0x1740   : > { %6106 = vmatpush3.bf16.msra.mxu1 %v6103_v29 }
0x1741   : > { %6108 = vmatprep.subr.bf16.mxu1 %v6107_v32 }
0x1743   : > { %5882 = vmatmul.mubr.msk.f32.vlgmr.msra.gmra.mrb[18].mxu1 %vm1580_vm1, %v4222_v15 }
0x1744   : > { %6110 = vmatpush3.bf16.msra.mxu1 %v6107_v32  ;;  %5892 = vmatprep.mubr.msk.f32.mxu1 %vm1580_vm1, %v4311_v18  ;;  %v6143_v32 = vpack.c.bf16 %v5453_v31, %v5452_v30 }
0x1745   : > { %6112 = vmatprep.subr.bf16.mxu1 %v6111_v39 }
0x1748   : > { %6114 = vmatpush3.bf16.msra.mxu1 %v6111_v39  ;;  %v6147_v39 = vpack.c.bf16 %v5457_v36, %v5456_v33 }
0x1749   : > { %6116 = vmatprep.subr.bf16.mxu1 %v6115_v38 }
0x174b   : > { %5893 = vmatmul.mubr.msk.f32.vlgmr.msra.gmra.mrb[18].mxu1 %vm1580_vm1, %v4313_v19  ;;  %v5450_v19 = vld [vmem:[%s7856_s0 + $0x40] sm:$0xff]  ;;  %s6965_s0 = smov 17  }
0x174c   : > { %6118 = vmatpush3.bf16.msra.mxu1 %v6115_v38  ;;  %5903 = vmatprep.mubr.msk.f32.mxu1 %vm1580_vm1, %v4402_v22  ;;  %v6139_v29 = vpack.c.bf16 %v5451_v20, %v5450_v19  ;;  %v6151_v38 = vpack.c.bf16 %v5459_v41, %v5458_v40 }
0x174d   : > { %6120 = vmatprep.subr.bf16.mxu1 %v6119_v28 }
0x1750   : > { %6122 = vmatpush3.bf16.msra.mxu1 %v6119_v28  ;;  %v6155_v28 = vpack.c.bf16 %v5463_v37, %v5462_v42 }
0x1753   : > { %5904 = vmatmul.mubr.msk.f32.vlgmr.msra.gmra.mrb[18].mxu1 %vm1580_vm1, %v4404_v23 }
0x1826   : > { %v5905_v52 = vpop.f32.mrb[18].mxu1 }
0x1827   : > { %v4494_v54 = vmul.f32 %v5905_v52, %v5440_v51  ;;  %v4475_v55 = vpop.f32.mrb[19].mxu1 }
0x1828   : > { %v4493_v56 = vmul.f32 %v5440_v51, %v4475_v55 }
0x1829   : > { %v4503_v57 = vadd.f32 %v5441_v53, %v4494_v54 }
0x182a   : > { %v4502_v58 = vadd.f32 %v5441_v53, %v4493_v56 }
0x182b   : > { %6464 = vtanh.f32 %v4503_v57 }
0x182c   : > { %6466 = vtanh.f32 %v4502_v58 }
0x1835   : > { %v6465_v59 = vpop.eup %6464 }
0x1836   : > { %v6467_v62 = vpop.eup %6466  ;;  %v4509_v63 = vrot.slane %v6465_v59, 6 }
0x1837   : > { %v4508_v34 = vrot.slane %v6467_v62, 6 }
0x1838   : > { %v4514_v0 = vsel %vm3561_vm8, %v4509_v63, 0.0 }
0x1839   : > { %v4510_v3 = vsel %vm3561_vm8, %v4508_v34, %v4509_v63  ;;  %v4513_v5 = vsel %vm3561_vm8, 0.0, %v4508_v34  ;;  %v4529_v7 = vrot.slane %v4514_v0, 1  ;;  %v4697_v8 = vrot.slane %v4514_v0, 2 }
0x183a   : > { %v4526_v9 = vrot.slane %v4513_v5, 1  ;;  %v4527_v6 = vrot.slane %v4510_v3, 1  ;;  %v4694_v10 = vrot.slane %v4513_v5, 2  ;;  %v4695_v11 = vrot.slane %v4510_v3, 2 }
0x183b   : > { %v4785_v12 = vrot.slane %v4513_v5, 3  ;;  %v4786_v13 = vrot.slane %v4510_v3, 3  ;;  %v4788_v14 = vrot.slane %v4514_v0, 3  ;;  %v4876_v4 = vrot.slane %v4513_v5, 4 }
0x183c   : > { %v4528_v15 = vsel %vm3576_vm9, %v4526_v9, %v4527_v6  ;;  %v4530_v16 = vsel %vm3576_vm9, %v4527_v6, %v4529_v7  ;;  %v4696_v17 = vsel %vm3743_vm10, %v4694_v10, %v4695_v11  ;;  %v4698_v18 = vsel %vm3743_vm10, %v4695_v11, %v4697_v8 }
0x183d   : > { %5914 = vmatprep.mubr.msk.f32.mxu0 %vm1580_vm1, %v4528_v15  ;;  %v4787_v21 = vsel %vm3833_vm11, %v4785_v12, %v4786_v13  ;;  %v4789_v22 = vsel %vm3833_vm11, %v4786_v13, %v4788_v14  ;;  %v4877_v23 = vrot.slane %v4510_v3, 4  ;;  %v4879_v24 = vrot.slane %v4514_v0, 4 }
0x183e   : > { %5915 = vmatmul.mubr.msk.f32.vlgmr.msra.gmra.mrb[20].mxu0 %vm1580_vm1, %v4530_v16 }
0x183f   : > { %6134 = vmatpush3.bf16.msra.mxu0 %v6131_v50  ;;  %5925 = vmatprep.mubr.msk.f32.mxu0 %vm1580_vm1, %v4513_v5  ;;  %v4878_v25 = vsel %vm3923_vm12, %v4876_v4, %v4877_v23  ;;  %v4880_v26 = vsel %vm3923_vm12, %v4877_v23, %v4879_v24 }
0x1840   : > { %6136 = vmatprep.subr.bf16.mxu0 %v6135_v1 }
0x1843   : > { %6138 = vmatpush3.bf16.msra.mxu0 %v6135_v1 }
0x1844   : > { %6140 = vmatprep.subr.bf16.mxu0 %v6139_v29 }
0x1846   : > { %5926 = vmatmul.mubr.msk.f32.vlgmr.msra.gmra.mrb[20].mxu0 %vm1580_vm1, %v4510_v3 }
0x1847   : > { %6142 = vmatpush3.bf16.msra.mxu0 %v6139_v29  ;;  %5936 = vmatprep.mubr.msk.f32.mxu0 %vm1580_vm1, %v4696_v17 }
0x1848   : > { %6144 = vmatprep.subr.bf16.mxu0 %v6143_v32 }
0x184b   : > { %6146 = vmatpush3.bf16.msra.mxu0 %v6143_v32 }
0x184c   : > { %6148 = vmatprep.subr.bf16.mxu0 %v6147_v39 }
0x184e   : > { %5937 = vmatmul.mubr.msk.f32.vlgmr.msra.gmra.mrb[20].mxu0 %vm1580_vm1, %v4698_v18 }
0x184f   : > { %6150 = vmatpush3.bf16.msra.mxu0 %v6147_v39  ;;  %5947 = vmatprep.mubr.msk.f32.mxu0 %vm1580_vm1, %v4787_v21 }
0x1850   : > { %6152 = vmatprep.subr.bf16.mxu0 %v6151_v38 }
0x1853   : > { %6154 = vmatpush3.bf16.msra.mxu0 %v6151_v38 }
0x1854   : > { %6156 = vmatprep.subr.bf16.mxu0 %v6155_v28 }
0x1856   : > { %5948 = vmatmul.mubr.msk.f32.vlgmr.msra.gmra.mrb[20].mxu0 %vm1580_vm1, %v4789_v22 }
0x1857   : > { %6158 = vmatpush3.bf16.msra.mxu0 %v6155_v28  ;;  %5958 = vmatprep.mubr.msk.f32.mxu0 %vm1580_vm1, %v4878_v25 }
0x1858   : > { %6160 = vmatprep.subr.bf16.mxu0 %v6159_v44 }
0x185b   : > { %6162 = vmatpush3.bf16.msra.mxu0 %v6159_v44 }
0x185e   : > { %5959 = vmatmul.mubr.msk.f32.vlgmr.msra.gmra.mrb[20].mxu0 %vm1580_vm1, %v4880_v26 }
0x1931   : > { %v5960_v46 = vpop.f32.mrb[20].mxu0 }
0x1932   : > { %v4951_v48 = vpop.f32.mrb[21].mxu0  ;;  %v4970_v49 = vmul.f32 %v5960_v46, %v5468_v45 }
0x1933   : > { %v4969_v50 = vmul.f32 %v5468_v45, %v4951_v48 }
0x1934   : > { %v4979_v52 = vadd.f32 %v5469_v47, %v4970_v49 }
0x1935   : > { %v4978_v51 = vadd.f32 %v5469_v47, %v4969_v50 }
0x1936   : > { %v4981_v54 = vadd.f32 %v4979_v52, %v7636_v35 }
0x1937   : > { %v4980_v53 = vadd.f32 %v4978_v51, %v7638_v2 }
0x1939   : > { %4984 = vrot.lane.b32.xlu1 %v4980_v53, %s6965_s0 }
0x193d   : > { %4986 = vrot.lane.b32.xlu1 %v4981_v54, %s6965_s0 }
0x19ab   : > { %v4985_v55 = vpop.permute.xlu1 %4984 }
0x19ac   : > { %v4991_v56 = vsel %vm4990_vm13, %v7638_v2, %v4985_v55 }
0x19ad   : > { %4994 = vst.msk [vmem:[%s1467_s1] sm:$0xff] %vm4993_vm14, %v4991_v56 }
0x19af   : > { %v4987_v57 = vpop.permute.xlu1 %4986 }
0x19b0   : > { %v4992_v58 = vsel %vm4990_vm13, %v7636_v35, %v4987_v57 }
0x19b1   : > { %4995 = vst.msk [vmem:[%s1467_s1 + $0x8] sm:$0xff] %vm4993_vm14, %v4992_v58 }
0x19b2 PF: > { %s102_s7 = sadd.s32 1, %s6898_s7  }
0x19b3   : > { %p99_p13 = scmp.ge.s32.totalorder %s102_s7, 4  }
0x19b5   :  { %101 = sbr.rel (!%p99_p13) target bundleno = 79 (0x4f), region = 341 }
0x19bc   :  { %5033 = vsyncpa [#allocation3], 1 }
0x19bd   :  { %5035 = vsyncpa [#allocation3 + $0x1], 1 }
0x19be   :  { %5036 = vsyncpa [#allocation5], 1 }
0x19bf   :  { %5037 = vsyncpa [#allocation8], 1 }
0x19c0   :  { %5038 = vsyncpa [#allocation11], 1 }
0x19c1   :  { %5039 = vsyncpa [#allocation14], 1 }
0x19c2   :  { %5040 = vsyncpa [#allocation17], 1 }
0x19c3   :  { %5041 = vsyncpa [#allocation20], 1 }
0x19c4   :  { %5042 = vsyncpa [#allocation23], 1 }

</bundles_post_ra>
